<compile_context>
chip_gen: v7x
topology: tpu7x:2x2x1
jax: 0.10.0
libtpu: 0.0.40
codegen_flags: <defaults>
</compile_context>

<pallas_src>
import functools

import numpy as np

import jax
import jax.numpy as jnp
from jax import lax
from jax.experimental import pallas as pl
from jax.experimental.pallas import tpu as pltpu


# ----------------------------------------------------------------------------
# Kernel
# ----------------------------------------------------------------------------
def _identity_block2_kernel(x_ref, mask_ref, w1_ref, b1_ref, w2_ref, b2_ref,
                            o_ref, *, K, W, C, P):
    """Fused conv1+bn1+relu -> conv2+bn2 -> +x -> relu for NBP image packs.

    x_ref   : (NBP, C*P, HW)   packed activations; row index = ci*P + p
                               (channel-major within a pack of P images),
                               spatial flattened onto lanes.
    mask_ref: (K*K, 1, HW)     precomputed "SAME" zero-padding validity masks.
    w*_ref  : (K*K*C, C*P, 1)  BN-folded compact conv taps; row (t*C + ci),
                               sublane (co*P + p), lane-broadcast in-kernel.
    b*_ref  : (C*P, 1)         BN-folded shift, lane-broadcast in-kernel.
    o_ref   : (NBP, C*P, HW)   outputs (same packing as x_ref).
    """
    NBP, CP, HW = x_ref.shape
    pad = (K - 1) // 2

    # Static per-tap lane shifts (same ordering as the folded weights):
    #   rolled[i] = x[i + oy*W + ox]; out-of-image positions are zeroed by the
    #   precomputed mask (cross-image lane wrap is also covered by the mask).
    taps = []
    for dy in range(K):
        for dx in range(K):
            oy, ox = dy - pad, dx - pad
            taps.append(((-(oy * W + ox)) % HW, oy == 0 and ox == 0))

    def conv_stage(inp, w_ref, b_ref):
        """VPU conv over a (C*P, HW) pack; returns (C*P, HW) f32."""
        accs = [None, None, None, None]          # independent VALU chains
        for t, (shift, is_center) in enumerate(taps):
            if is_center:
                m = inp
            else:
                # XLU roll + precomputed sublane-broadcast mask multiply.
                m = pltpu.roll(inp, shift, axis=1) * mask_ref[t]
            base = t * C
            for ci in range(C):
                src = m[ci * P:(ci + 1) * P, :]              # (P, HW)
                if P == 1:
                    bc = src                                  # sublane bcast
                else:
                    # Replicate this channel's P image rows to all C output
                    # channel groups (row co*P + p <- src[p]).
                    bc = jnp.concatenate([src] * C, axis=0)   # (C*P, HW)
                term = w_ref[base + ci] * bc                  # (C*P,1)*(C*P,HW)
                s = ci & 3
                accs[s] = term if accs[s] is None else accs[s] + term
        total = None
        for a in accs:
            if a is not None:
                total = a if total is None else total + a
        return total + b_ref[...]                             # + folded BN shift

    def process(n):
        x_img = x_ref[n].astype(jnp.float32)                  # (C*P, HW)
        y = jnp.maximum(conv_stage(x_img, w1_ref, b1_ref), 0.0)
        z = conv_stage(y, w2_ref, b2_ref) + x_img             # residual add
        o_ref[n] = jnp.maximum(z, 0.0).astype(o_ref.dtype)

    if NBP <= 4:                       # small blocks: static unroll
        for n in range(NBP):
            process(n)
    else:                              # large blocks: keep live ranges bounded
        def body(n, carry):
            process(n)
            return carry
        lax.fori_loop(0, NBP, body, 0)


# ----------------------------------------------------------------------------
# Glue: packing, BN folding, grid selection
# ----------------------------------------------------------------------------
def _num_tensorcores():
    """2 TensorCores only on v7x-class chips; 1 otherwise."""
    try:
        kind = jax.devices()[0].device_kind.lower()
    except Exception:
        return 1
    return 2 if "7" in kind else 1


def _pick_pair_block(num_packs, num_cores):
    """Largest pack-block; keep >= num_cores grid steps only on multi-TC chips."""
    if num_cores <= 1 or num_packs < 2:
        return num_packs                       # single fat step (v5e / v6e)
    best = 1
    for blk in range(1, num_packs + 1):
        if num_packs % blk == 0 and num_packs // blk >= num_cores:
            best = blk
    return best


def _tap_masks(K, H, W):
    """(K*K, 1, HW) f32 validity masks for 'SAME' zero padding (numpy, free)."""
    pad = (K - 1) // 2
    HW = H * W
    pos = np.arange(HW)
    row, col = pos // W, pos % W
    m = np.zeros((K * K, 1, HW), np.float32)
    t = 0
    for dy in range(K):
        for dx in range(K):
            oy, ox = dy - pad, dx - pad
            valid = ((row + oy >= 0) & (row + oy < H) &
                     (col + ox >= 0) & (col + ox < W))
            m[t, 0] = valid.astype(np.float32)
            t += 1
    return jnp.asarray(m)


def _fold_bn_into_conv(w_oihw, bn, eps, P):
    """Fold FrozenBatchNorm2d into compact, sublane-packed conv taps + bias."""
    gamma, beta = bn["weight"], bn["bias"]
    mean, var = bn["running_mean"], bn["running_var"]
    s = gamma / jnp.sqrt(var + eps)                      # (Cout,)
    b = beta - mean * s                                  # (Cout,)
    cout, cin, k, _ = w_oihw.shape
    w_scaled = w_oihw.astype(jnp.float32) * s[:, None, None, None]
    # (Cout, Cin, K, K) -> (K, K, Cin, Cout) -> (K*K*Cin, Cout):
    #   row index = (dy*K + dx)*Cin + ci, matching the kernel's tap order.
    wt = jnp.transpose(w_scaled, (2, 3, 1, 0)).reshape(k * k * cin, cout)
    # Pack the sublane dim as co*P + p (weight independent of image p).
    w_packed = jnp.repeat(wt, P, axis=1).reshape(k * k * cin, cout * P, 1)
    b_packed = jnp.repeat(b.astype(jnp.float32), P).reshape(cout * P, 1)
    return w_packed, b_packed


def _pallas_identity_block2(x_pack, masks, w1, b1, w2, b2, *, K, H, W, C, P):
    NP, CP, HW = x_pack.shape
    KK = K * K
    NBP = _pick_pair_block(NP, _num_tensorcores())
    grid = (NP // NBP,)

    kernel = functools.partial(_identity_block2_kernel, K=K, W=W, C=C, P=P)

    grid_spec = pltpu.PrefetchScalarGridSpec(
        num_scalar_prefetch=0,
        grid=grid,
        in_specs=[
            pl.BlockSpec((NBP, CP, HW), lambda n: (n, 0, 0)),
            pl.BlockSpec((KK, 1, HW), lambda n: (0, 0, 0)),
            pl.BlockSpec((KK * C, CP, 1), lambda n: (0, 0, 0)),
            pl.BlockSpec((CP, 1), lambda n: (0, 0)),
            pl.BlockSpec((KK * C, CP, 1), lambda n: (0, 0, 0)),
            pl.BlockSpec((CP, 1), lambda n: (0, 0)),
        ],
        out_specs=pl.BlockSpec((NBP, CP, HW), lambda n: (n, 0, 0)),
    )

    return pl.pallas_call(
        kernel,
        out_shape=jax.ShapeDtypeStruct((NP, CP, HW), x_pack.dtype),
        grid_spec=grid_spec,
        compiler_params=pltpu.CompilerParams(
            dimension_semantics=("parallel",)),
    )(x_pack, masks, w1, b1, w2, b2)


def identity_block2_forward(x_nchw, conv1_w_oihw, bn1, conv2_w_oihw, bn2,
                            eps=1e-5):
    """PyTorch-convention entry point.  x_nchw: (N, C, H, W); weights OIHW.

    bn1 / bn2: dicts with 'weight', 'bias', 'running_mean', 'running_var'
    (FrozenBatchNorm2d buffers), each of shape (C,).
    Requires inplanes == outplanes (identity residual).
    """
    N, C, H, W = x_nchw.shape
    HW = H * W
    K = conv1_w_oihw.shape[-1]
    assert conv1_w_oihw.shape[0] == C, "residual add requires Cin == Cout"

    # Images per sublane pack: fill the 8 sublanes when possible.
    P = 1
    if C <= 8 and 8 % C == 0 and N % (8 // C) == 0:
        P = 8 // C
    NP = N // P

    # Glue (layout plumbing only, all tiny): fold frozen BN, build masks, and
    # pack P images channel-major onto the sublane dim.
    w1, b1 = _fold_bn_into_conv(conv1_w_oihw, bn1, eps, P)
    w2, b2 = _fold_bn_into_conv(conv2_w_oihw, bn2, eps, P)
    masks = _tap_masks(K, H, W)

    x_pack = x_nchw.reshape(NP, P, C, HW)
    if P > 1:
        x_pack = jnp.transpose(x_pack, (0, 2, 1, 3))     # -> (NP, C, P, HW)
    x_pack = x_pack.reshape(NP, C * P, HW)               # row = ci*P + p

    out_pack = _pallas_identity_block2(x_pack, masks, w1, b1, w2, b2,
                                       K=K, H=H, W=W, C=C, P=P)

    out = out_pack.reshape(NP, C, P, HW)
    if P > 1:
        out = jnp.transpose(out, (0, 2, 1, 3))           # -> (NP, P, C, HW)
    return out.reshape(N, C, H, W)


# ----------------------------------------------------------------------------
# Pure-JAX reference + self-test
# ----------------------------------------------------------------------------
def _reference_nchw(x_nchw, w1_oihw, bn1, w2_oihw, bn2, eps=1e-5):
    """Pure-JAX reference of identity_block2.forward (NCHW in/out)."""
    x = jnp.transpose(x_nchw, (0, 2, 3, 1))
    w1 = jnp.transpose(w1_oihw, (2, 3, 1, 0))
    w2 = jnp.transpose(w2_oihw, (2, 3, 1, 0))
    dn = lax.conv_dimension_numbers(x.shape, w1.shape, ("NHWC", "HWIO", "NHWC"))

    def fbn(y, bn):
        s = bn["weight"] / jnp.sqrt(bn["running_var"] + eps)
        b = bn["bias"] - bn["running_mean"] * s
        return y * s.reshape(1, 1, 1, -1) + b.reshape(1, 1, 1, -1)

    y = lax.conv_general_dilated(x, w1, (1, 1), "SAME", dimension_numbers=dn,
                                 precision=lax.Precision.HIGHEST)
    y = jnp.maximum(fbn(y, bn1), 0.0)
    z = lax.conv_general_dilated(y, w2, (1, 1), "SAME", dimension_numbers=dn,
                                 precision=lax.Precision.HIGHEST)
    z = jnp.maximum(fbn(z, bn2) + x, 0.0)
    return jnp.transpose(z, (0, 3, 1, 2))


if __name__ == "__main__":
    # Shapes consistent with the module: inplanes = outplanes = 4,
    # kernel_size = 3, batch = 2, spatial = 16.
    N, C, H, W, K = 2, 4, 16, 16, 3

    key = jax.random.PRNGKey(0)
    ks = jax.random.split(key, 11)

    x = jax.random.normal(ks[0], (N, C, H, W), jnp.float32)

    conv1_w = jax.random.normal(ks[1], (C, C, K, K), jnp.float32) * 0.3  # OIHW
    conv2_w = jax.random.normal(ks[2], (C, C, K, K), jnp.float32) * 0.3

    bn1 = {
        "weight": jax.random.uniform(ks[3], (C,), jnp.float32, 0.5, 1.5),
        "bias": jax.random.normal(ks[4], (C,), jnp.float32) * 0.1,
        "running_mean": jax.random.normal(ks[5], (C,), jnp.float32) * 0.1,
        "running_var": jax.random.uniform(ks[6], (C,), jnp.float32, 0.5, 1.5),
    }
    bn2 = {
        "weight": jax.random.uniform(ks[7], (C,), jnp.float32, 0.5, 1.5),
        "bias": jax.random.normal(ks[8], (C,), jnp.float32) * 0.1,
        "running_mean": jax.random.normal(ks[9], (C,), jnp.float32) * 0.1,
        "running_var": jax.random.uniform(ks[10], (C,), jnp.float32, 0.5, 1.5),
    }

    fwd = jax.jit(identity_block2_forward)
    out = jax.block_until_ready(fwd(x, conv1_w, bn1, conv2_w, bn2))

    ref = _reference_nchw(x, conv1_w, bn1, conv2_w, bn2)
    assert out.shape == (N, C, H, W), out.shape
    max_err = float(jnp.max(jnp.abs(out - ref)))
    assert jnp.allclose(out, ref, atol=1e-4, rtol=1e-4), (
        "max abs diff = %e" % max_err)

    print("KERNEL_OK")
</pallas_src>

<mosaic_0001>
module attributes {stable_mosaic.version = 11 : i64} {
  func.func @_identity_block2_kernel(%arg0: i32, %arg1: memref<1x8x256xf32, #tpu.memory_space<vmem>>, %arg2: memref<9x1x256xf32, #tpu.memory_space<vmem>>, %arg3: memref<36x8x1xf32, #tpu.memory_space<vmem>>, %arg4: memref<8x1xf32, #tpu.memory_space<vmem>>, %arg5: memref<36x8x1xf32, #tpu.memory_space<vmem>>, %arg6: memref<8x1xf32, #tpu.memory_space<vmem>>, %arg7: memref<1x8x256xf32, #tpu.memory_space<vmem>>) attributes {dimension_semantics = [#tpu.dimension_semantics<parallel>], iteration_bounds = array<i64: 1>, scalar_prefetch = 0 : i64, scratch_operands = 0 : i64, tpu.core_type = #tpu.core_type<tc>, window_params = [{transform_indices = @transform_0, window_bounds = array<i64: 1, 8, 256>}, {pipeline_mode = #tpu.pipeline_mode<synchronous>, transform_indices = @transform_1, window_bounds = array<i64: 9, 1, 256>}, {pipeline_mode = #tpu.pipeline_mode<synchronous>, transform_indices = @transform_2, window_bounds = array<i64: 36, 8, 1>}, {pipeline_mode = #tpu.pipeline_mode<synchronous>, transform_indices = @transform_3, window_bounds = array<i64: 8, 1>}, {pipeline_mode = #tpu.pipeline_mode<synchronous>, transform_indices = @transform_4, window_bounds = array<i64: 36, 8, 1>}, {pipeline_mode = #tpu.pipeline_mode<synchronous>, transform_indices = @transform_5, window_bounds = array<i64: 8, 1>}, {transform_indices = @transform_6, window_bounds = array<i64: 1, 8, 256>}]} {
    %c0 = arith.constant 0 : index
    %c0_0 = arith.constant 0 : index
    %c0_1 = arith.constant 0 : index
    %0 = vector.load %arg1[%c0, %c0_0, %c0_1] : memref<1x8x256xf32, #tpu.memory_space<vmem>>, vector<1x8x256xf32>
    %1 = vector.shape_cast %0 : vector<1x8x256xf32> to vector<8x256xf32>
    %c17_i32 = arith.constant 17 : i32
    %2 = tpu.dynamic_rotate %1 by %c17_i32 dim 1 : vector<8x256xf32>, i32 -> vector<8x256xf32>
    %c0_2 = arith.constant 0 : index
    %c0_3 = arith.constant 0 : index
    %c0_4 = arith.constant 0 : index
    %3 = vector.load %arg2[%c0_2, %c0_3, %c0_4] : memref<9x1x256xf32, #tpu.memory_space<vmem>>, vector<1x1x256xf32>
    %4 = vector.shape_cast %3 : vector<1x1x256xf32> to vector<1x256xf32>
    %5 = vector.broadcast %4 : vector<1x256xf32> to vector<8x256xf32>
    %6 = arith.mulf %2, %5 : vector<8x256xf32>
    %7 = vector.extract_strided_slice %6 {offsets = [0, 0], sizes = [2, 256], strides = [1, 1]} : vector<8x256xf32> to vector<2x256xf32>
    %8 = tpu.concatenate %7, %7, %7, %7 in 0 : vector<2x256xf32>, vector<2x256xf32>, vector<2x256xf32>, vector<2x256xf32> -> vector<8x256xf32>
    %c0_5 = arith.constant 0 : index
    %c0_6 = arith.constant 0 : index
    %c0_7 = arith.constant 0 : index
    %9 = vector.load %arg3[%c0_5, %c0_6, %c0_7] : memref<36x8x1xf32, #tpu.memory_space<vmem>>, vector<1x8x1xf32>
    %10 = vector.shape_cast %9 : vector<1x8x1xf32> to vector<8x1xf32>
    %11 = vector.broadcast %10 : vector<8x1xf32> to vector<8x256xf32>
    %12 = arith.mulf %11, %8 : vector<8x256xf32>
    %13 = vector.extract_strided_slice %6 {offsets = [2, 0], sizes = [2, 256], strides = [1, 1]} : vector<8x256xf32> to vector<2x256xf32>
    %14 = tpu.concatenate %13, %13, %13, %13 in 0 : vector<2x256xf32>, vector<2x256xf32>, vector<2x256xf32>, vector<2x256xf32> -> vector<8x256xf32>
    %c1 = arith.constant 1 : index
    %c0_8 = arith.constant 0 : index
    %c0_9 = arith.constant 0 : index
    %15 = vector.load %arg3[%c1, %c0_8, %c0_9] : memref<36x8x1xf32, #tpu.memory_space<vmem>>, vector<1x8x1xf32>
    %16 = vector.shape_cast %15 : vector<1x8x1xf32> to vector<8x1xf32>
    %17 = vector.broadcast %16 : vector<8x1xf32> to vector<8x256xf32>
    %18 = arith.mulf %17, %14 : vector<8x256xf32>
    %19 = vector.extract_strided_slice %6 {offsets = [4, 0], sizes = [2, 256], strides = [1, 1]} : vector<8x256xf32> to vector<2x256xf32>
    %20 = tpu.concatenate %19, %19, %19, %19 in 0 : vector<2x256xf32>, vector<2x256xf32>, vector<2x256xf32>, vector<2x256xf32> -> vector<8x256xf32>
    %c2 = arith.constant 2 : index
    %c0_10 = arith.constant 0 : index
    %c0_11 = arith.constant 0 : index
    %21 = vector.load %arg3[%c2, %c0_10, %c0_11] : memref<36x8x1xf32, #tpu.memory_space<vmem>>, vector<1x8x1xf32>
    %22 = vector.shape_cast %21 : vector<1x8x1xf32> to vector<8x1xf32>
    %23 = vector.broadcast %22 : vector<8x1xf32> to vector<8x256xf32>
    %24 = arith.mulf %23, %20 : vector<8x256xf32>
    %25 = vector.extract_strided_slice %6 {offsets = [6, 0], sizes = [2, 256], strides = [1, 1]} : vector<8x256xf32> to vector<2x256xf32>
    %26 = tpu.concatenate %25, %25, %25, %25 in 0 : vector<2x256xf32>, vector<2x256xf32>, vector<2x256xf32>, vector<2x256xf32> -> vector<8x256xf32>
    %c3 = arith.constant 3 : index
    %c0_12 = arith.constant 0 : index
    %c0_13 = arith.constant 0 : index
    %27 = vector.load %arg3[%c3, %c0_12, %c0_13] : memref<36x8x1xf32, #tpu.memory_space<vmem>>, vector<1x8x1xf32>
    %28 = vector.shape_cast %27 : vector<1x8x1xf32> to vector<8x1xf32>
    %29 = vector.broadcast %28 : vector<8x1xf32> to vector<8x256xf32>
    %30 = arith.mulf %29, %26 : vector<8x256xf32>
    %c16_i32 = arith.constant 16 : i32
    %31 = tpu.dynamic_rotate %1 by %c16_i32 dim 1 : vector<8x256xf32>, i32 -> vector<8x256xf32>
    %c1_14 = arith.constant 1 : index
    %c0_15 = arith.constant 0 : index
    %c0_16 = arith.constant 0 : index
    %32 = vector.load %arg2[%c1_14, %c0_15, %c0_16] : memref<9x1x256xf32, #tpu.memory_space<vmem>>, vector<1x1x256xf32>
    %33 = vector.shape_cast %32 : vector<1x1x256xf32> to vector<1x256xf32>
    %34 = vector.broadcast %33 : vector<1x256xf32> to vector<8x256xf32>
    %35 = arith.mulf %31, %34 : vector<8x256xf32>
    %36 = vector.extract_strided_slice %35 {offsets = [0, 0], sizes = [2, 256], strides = [1, 1]} : vector<8x256xf32> to vector<2x256xf32>
    %37 = tpu.concatenate %36, %36, %36, %36 in 0 : vector<2x256xf32>, vector<2x256xf32>, vector<2x256xf32>, vector<2x256xf32> -> vector<8x256xf32>
    %c4 = arith.constant 4 : index
    %c0_17 = arith.constant 0 : index
    %c0_18 = arith.constant 0 : index
    %38 = vector.load %arg3[%c4, %c0_17, %c0_18] : memref<36x8x1xf32, #tpu.memory_space<vmem>>, vector<1x8x1xf32>
    %39 = vector.shape_cast %38 : vector<1x8x1xf32> to vector<8x1xf32>
    %40 = vector.broadcast %39 : vector<8x1xf32> to vector<8x256xf32>
    %41 = arith.mulf %40, %37 : vector<8x256xf32>
    %42 = arith.addf %12, %41 : vector<8x256xf32>
    %43 = vector.extract_strided_slice %35 {offsets = [2, 0], sizes = [2, 256], strides = [1, 1]} : vector<8x256xf32> to vector<2x256xf32>
    %44 = tpu.concatenate %43, %43, %43, %43 in 0 : vector<2x256xf32>, vector<2x256xf32>, vector<2x256xf32>, vector<2x256xf32> -> vector<8x256xf32>
    %c5 = arith.constant 5 : index
    %c0_19 = arith.constant 0 : index
    %c0_20 = arith.constant 0 : index
    %45 = vector.load %arg3[%c5, %c0_19, %c0_20] : memref<36x8x1xf32, #tpu.memory_space<vmem>>, vector<1x8x1xf32>
    %46 = vector.shape_cast %45 : vector<1x8x1xf32> to vector<8x1xf32>
    %47 = vector.broadcast %46 : vector<8x1xf32> to vector<8x256xf32>
    %48 = arith.mulf %47, %44 : vector<8x256xf32>
    %49 = arith.addf %18, %48 : vector<8x256xf32>
    %50 = vector.extract_strided_slice %35 {offsets = [4, 0], sizes = [2, 256], strides = [1, 1]} : vector<8x256xf32> to vector<2x256xf32>
    %51 = tpu.concatenate %50, %50, %50, %50 in 0 : vector<2x256xf32>, vector<2x256xf32>, vector<2x256xf32>, vector<2x256xf32> -> vector<8x256xf32>
    %c6 = arith.constant 6 : index
    %c0_21 = arith.constant 0 : index
    %c0_22 = arith.constant 0 : index
    %52 = vector.load %arg3[%c6, %c0_21, %c0_22] : memref<36x8x1xf32, #tpu.memory_space<vmem>>, vector<1x8x1xf32>
    %53 = vector.shape_cast %52 : vector<1x8x1xf32> to vector<8x1xf32>
    %54 = vector.broadcast %53 : vector<8x1xf32> to vector<8x256xf32>
    %55 = arith.mulf %54, %51 : vector<8x256xf32>
    %56 = arith.addf %24, %55 : vector<8x256xf32>
    %57 = vector.extract_strided_slice %35 {offsets = [6, 0], sizes = [2, 256], strides = [1, 1]} : vector<8x256xf32> to vector<2x256xf32>
    %58 = tpu.concatenate %57, %57, %57, %57 in 0 : vector<2x256xf32>, vector<2x256xf32>, vector<2x256xf32>, vector<2x256xf32> -> vector<8x256xf32>
    %c7 = arith.constant 7 : index
    %c0_23 = arith.constant 0 : index
    %c0_24 = arith.constant 0 : index
    %59 = vector.load %arg3[%c7, %c0_23, %c0_24] : memref<36x8x1xf32, #tpu.memory_space<vmem>>, vector<1x8x1xf32>
    %60 = vector.shape_cast %59 : vector<1x8x1xf32> to vector<8x1xf32>
    %61 = vector.broadcast %60 : vector<8x1xf32> to vector<8x256xf32>
    %62 = arith.mulf %61, %58 : vector<8x256xf32>
    %63 = arith.addf %30, %62 : vector<8x256xf32>
    %c15_i32 = arith.constant 15 : i32
    %64 = tpu.dynamic_rotate %1 by %c15_i32 dim 1 : vector<8x256xf32>, i32 -> vector<8x256xf32>
    %c2_25 = arith.constant 2 : index
    %c0_26 = arith.constant 0 : index
    %c0_27 = arith.constant 0 : index
    %65 = vector.load %arg2[%c2_25, %c0_26, %c0_27] : memref<9x1x256xf32, #tpu.memory_space<vmem>>, vector<1x1x256xf32>
    %66 = vector.shape_cast %65 : vector<1x1x256xf32> to vector<1x256xf32>
    %67 = vector.broadcast %66 : vector<1x256xf32> to vector<8x256xf32>
    %68 = arith.mulf %64, %67 : vector<8x256xf32>
    %69 = vector.extract_strided_slice %68 {offsets = [0, 0], sizes = [2, 256], strides = [1, 1]} : vector<8x256xf32> to vector<2x256xf32>
    %70 = tpu.concatenate %69, %69, %69, %69 in 0 : vector<2x256xf32>, vector<2x256xf32>, vector<2x256xf32>, vector<2x256xf32> -> vector<8x256xf32>
    %c8 = arith.constant 8 : index
    %c0_28 = arith.constant 0 : index
    %c0_29 = arith.constant 0 : index
    %71 = vector.load %arg3[%c8, %c0_28, %c0_29] : memref<36x8x1xf32, #tpu.memory_space<vmem>>, vector<1x8x1xf32>
    %72 = vector.shape_cast %71 : vector<1x8x1xf32> to vector<8x1xf32>
    %73 = vector.broadcast %72 : vector<8x1xf32> to vector<8x256xf32>
    %74 = arith.mulf %73, %70 : vector<8x256xf32>
    %75 = arith.addf %42, %74 : vector<8x256xf32>
    %76 = vector.extract_strided_slice %68 {offsets = [2, 0], sizes = [2, 256], strides = [1, 1]} : vector<8x256xf32> to vector<2x256xf32>
    %77 = tpu.concatenate %76, %76, %76, %76 in 0 : vector<2x256xf32>, vector<2x256xf32>, vector<2x256xf32>, vector<2x256xf32> -> vector<8x256xf32>
    %c9 = arith.constant 9 : index
    %c0_30 = arith.constant 0 : index
    %c0_31 = arith.constant 0 : index
    %78 = vector.load %arg3[%c9, %c0_30, %c0_31] : memref<36x8x1xf32, #tpu.memory_space<vmem>>, vector<1x8x1xf32>
    %79 = vector.shape_cast %78 : vector<1x8x1xf32> to vector<8x1xf32>
    %80 = vector.broadcast %79 : vector<8x1xf32> to vector<8x256xf32>
    %81 = arith.mulf %80, %77 : vector<8x256xf32>
    %82 = arith.addf %49, %81 : vector<8x256xf32>
    %83 = vector.extract_strided_slice %68 {offsets = [4, 0], sizes = [2, 256], strides = [1, 1]} : vector<8x256xf32> to vector<2x256xf32>
    %84 = tpu.concatenate %83, %83, %83, %83 in 0 : vector<2x256xf32>, vector<2x256xf32>, vector<2x256xf32>, vector<2x256xf32> -> vector<8x256xf32>
    %c10 = arith.constant 10 : index
    %c0_32 = arith.constant 0 : index
    %c0_33 = arith.constant 0 : index
    %85 = vector.load %arg3[%c10, %c0_32, %c0_33] : memref<36x8x1xf32, #tpu.memory_space<vmem>>, vector<1x8x1xf32>
    %86 = vector.shape_cast %85 : vector<1x8x1xf32> to vector<8x1xf32>
    %87 = vector.broadcast %86 : vector<8x1xf32> to vector<8x256xf32>
    %88 = arith.mulf %87, %84 : vector<8x256xf32>
    %89 = arith.addf %56, %88 : vector<8x256xf32>
    %90 = vector.extract_strided_slice %68 {offsets = [6, 0], sizes = [2, 256], strides = [1, 1]} : vector<8x256xf32> to vector<2x256xf32>
    %91 = tpu.concatenate %90, %90, %90, %90 in 0 : vector<2x256xf32>, vector<2x256xf32>, vector<2x256xf32>, vector<2x256xf32> -> vector<8x256xf32>
    %c11 = arith.constant 11 : index
    %c0_34 = arith.constant 0 : index
    %c0_35 = arith.constant 0 : index
    %92 = vector.load %arg3[%c11, %c0_34, %c0_35] : memref<36x8x1xf32, #tpu.memory_space<vmem>>, vector<1x8x1xf32>
    %93 = vector.shape_cast %92 : vector<1x8x1xf32> to vector<8x1xf32>
    %94 = vector.broadcast %93 : vector<8x1xf32> to vector<8x256xf32>
    %95 = arith.mulf %94, %91 : vector<8x256xf32>
    %96 = arith.addf %63, %95 : vector<8x256xf32>
    %c1_i32 = arith.constant 1 : i32
    %97 = tpu.dynamic_rotate %1 by %c1_i32 dim 1 : vector<8x256xf32>, i32 -> vector<8x256xf32>
    %c3_36 = arith.constant 3 : index
    %c0_37 = arith.constant 0 : index
    %c0_38 = arith.constant 0 : index
    %98 = vector.load %arg2[%c3_36, %c0_37, %c0_38] : memref<9x1x256xf32, #tpu.memory_space<vmem>>, vector<1x1x256xf32>
    %99 = vector.shape_cast %98 : vector<1x1x256xf32> to vector<1x256xf32>
    %100 = vector.broadcast %99 : vector<1x256xf32> to vector<8x256xf32>
    %101 = arith.mulf %97, %100 : vector<8x256xf32>
    %102 = vector.extract_strided_slice %101 {offsets = [0, 0], sizes = [2, 256], strides = [1, 1]} : vector<8x256xf32> to vector<2x256xf32>
    %103 = tpu.concatenate %102, %102, %102, %102 in 0 : vector<2x256xf32>, vector<2x256xf32>, vector<2x256xf32>, vector<2x256xf32> -> vector<8x256xf32>
    %c12 = arith.constant 12 : index
    %c0_39 = arith.constant 0 : index
    %c0_40 = arith.constant 0 : index
    %104 = vector.load %arg3[%c12, %c0_39, %c0_40] : memref<36x8x1xf32, #tpu.memory_space<vmem>>, vector<1x8x1xf32>
    %105 = vector.shape_cast %104 : vector<1x8x1xf32> to vector<8x1xf32>
    %106 = vector.broadcast %105 : vector<8x1xf32> to vector<8x256xf32>
    %107 = arith.mulf %106, %103 : vector<8x256xf32>
    %108 = arith.addf %75, %107 : vector<8x256xf32>
    %109 = vector.extract_strided_slice %101 {offsets = [2, 0], sizes = [2, 256], strides = [1, 1]} : vector<8x256xf32> to vector<2x256xf32>
    %110 = tpu.concatenate %109, %109, %109, %109 in 0 : vector<2x256xf32>, vector<2x256xf32>, vector<2x256xf32>, vector<2x256xf32> -> vector<8x256xf32>
    %c13 = arith.constant 13 : index
    %c0_41 = arith.constant 0 : index
    %c0_42 = arith.constant 0 : index
    %111 = vector.load %arg3[%c13, %c0_41, %c0_42] : memref<36x8x1xf32, #tpu.memory_space<vmem>>, vector<1x8x1xf32>
    %112 = vector.shape_cast %111 : vector<1x8x1xf32> to vector<8x1xf32>
    %113 = vector.broadcast %112 : vector<8x1xf32> to vector<8x256xf32>
    %114 = arith.mulf %113, %110 : vector<8x256xf32>
    %115 = arith.addf %82, %114 : vector<8x256xf32>
    %116 = vector.extract_strided_slice %101 {offsets = [4, 0], sizes = [2, 256], strides = [1, 1]} : vector<8x256xf32> to vector<2x256xf32>
    %117 = tpu.concatenate %116, %116, %116, %116 in 0 : vector<2x256xf32>, vector<2x256xf32>, vector<2x256xf32>, vector<2x256xf32> -> vector<8x256xf32>
    %c14 = arith.constant 14 : index
    %c0_43 = arith.constant 0 : index
    %c0_44 = arith.constant 0 : index
    %118 = vector.load %arg3[%c14, %c0_43, %c0_44] : memref<36x8x1xf32, #tpu.memory_space<vmem>>, vector<1x8x1xf32>
    %119 = vector.shape_cast %118 : vector<1x8x1xf32> to vector<8x1xf32>
    %120 = vector.broadcast %119 : vector<8x1xf32> to vector<8x256xf32>
    %121 = arith.mulf %120, %117 : vector<8x256xf32>
    %122 = arith.addf %89, %121 : vector<8x256xf32>
    %123 = vector.extract_strided_slice %101 {offsets = [6, 0], sizes = [2, 256], strides = [1, 1]} : vector<8x256xf32> to vector<2x256xf32>
    %124 = tpu.concatenate %123, %123, %123, %123 in 0 : vector<2x256xf32>, vector<2x256xf32>, vector<2x256xf32>, vector<2x256xf32> -> vector<8x256xf32>
    %c15 = arith.constant 15 : index
    %c0_45 = arith.constant 0 : index
    %c0_46 = arith.constant 0 : index
    %125 = vector.load %arg3[%c15, %c0_45, %c0_46] : memref<36x8x1xf32, #tpu.memory_space<vmem>>, vector<1x8x1xf32>
    %126 = vector.shape_cast %125 : vector<1x8x1xf32> to vector<8x1xf32>
    %127 = vector.broadcast %126 : vector<8x1xf32> to vector<8x256xf32>
    %128 = arith.mulf %127, %124 : vector<8x256xf32>
    %129 = arith.addf %96, %128 : vector<8x256xf32>
    %130 = vector.extract_strided_slice %1 {offsets = [0, 0], sizes = [2, 256], strides = [1, 1]} : vector<8x256xf32> to vector<2x256xf32>
    %131 = tpu.concatenate %130, %130, %130, %130 in 0 : vector<2x256xf32>, vector<2x256xf32>, vector<2x256xf32>, vector<2x256xf32> -> vector<8x256xf32>
    %c16 = arith.constant 16 : index
    %c0_47 = arith.constant 0 : index
    %c0_48 = arith.constant 0 : index
    %132 = vector.load %arg3[%c16, %c0_47, %c0_48] : memref<36x8x1xf32, #tpu.memory_space<vmem>>, vector<1x8x1xf32>
    %133 = vector.shape_cast %132 : vector<1x8x1xf32> to vector<8x1xf32>
    %134 = vector.broadcast %133 : vector<8x1xf32> to vector<8x256xf32>
    %135 = arith.mulf %134, %131 : vector<8x256xf32>
    %136 = arith.addf %108, %135 : vector<8x256xf32>
    %137 = vector.extract_strided_slice %1 {offsets = [2, 0], sizes = [2, 256], strides = [1, 1]} : vector<8x256xf32> to vector<2x256xf32>
    %138 = tpu.concatenate %137, %137, %137, %137 in 0 : vector<2x256xf32>, vector<2x256xf32>, vector<2x256xf32>, vector<2x256xf32> -> vector<8x256xf32>
    %c17 = arith.constant 17 : index
    %c0_49 = arith.constant 0 : index
    %c0_50 = arith.constant 0 : index
    %139 = vector.load %arg3[%c17, %c0_49, %c0_50] : memref<36x8x1xf32, #tpu.memory_space<vmem>>, vector<1x8x1xf32>
    %140 = vector.shape_cast %139 : vector<1x8x1xf32> to vector<8x1xf32>
    %141 = vector.broadcast %140 : vector<8x1xf32> to vector<8x256xf32>
    %142 = arith.mulf %141, %138 : vector<8x256xf32>
    %143 = arith.addf %115, %142 : vector<8x256xf32>
    %144 = vector.extract_strided_slice %1 {offsets = [4, 0], sizes = [2, 256], strides = [1, 1]} : vector<8x256xf32> to vector<2x256xf32>
    %145 = tpu.concatenate %144, %144, %144, %144 in 0 : vector<2x256xf32>, vector<2x256xf32>, vector<2x256xf32>, vector<2x256xf32> -> vector<8x256xf32>
    %c18 = arith.constant 18 : index
    %c0_51 = arith.constant 0 : index
    %c0_52 = arith.constant 0 : index
    %146 = vector.load %arg3[%c18, %c0_51, %c0_52] : memref<36x8x1xf32, #tpu.memory_space<vmem>>, vector<1x8x1xf32>
    %147 = vector.shape_cast %146 : vector<1x8x1xf32> to vector<8x1xf32>
    %148 = vector.broadcast %147 : vector<8x1xf32> to vector<8x256xf32>
    %149 = arith.mulf %148, %145 : vector<8x256xf32>
    %150 = arith.addf %122, %149 : vector<8x256xf32>
    %151 = vector.extract_strided_slice %1 {offsets = [6, 0], sizes = [2, 256], strides = [1, 1]} : vector<8x256xf32> to vector<2x256xf32>
    %152 = tpu.concatenate %151, %151, %151, %151 in 0 : vector<2x256xf32>, vector<2x256xf32>, vector<2x256xf32>, vector<2x256xf32> -> vector<8x256xf32>
    %c19 = arith.constant 19 : index
    %c0_53 = arith.constant 0 : index
    %c0_54 = arith.constant 0 : index
    %153 = vector.load %arg3[%c19, %c0_53, %c0_54] : memref<36x8x1xf32, #tpu.memory_space<vmem>>, vector<1x8x1xf32>
    %154 = vector.shape_cast %153 : vector<1x8x1xf32> to vector<8x1xf32>
    %155 = vector.broadcast %154 : vector<8x1xf32> to vector<8x256xf32>
    %156 = arith.mulf %155, %152 : vector<8x256xf32>
    %157 = arith.addf %129, %156 : vector<8x256xf32>
    %c255_i32 = arith.constant 255 : i32
    %158 = tpu.dynamic_rotate %1 by %c255_i32 dim 1 : vector<8x256xf32>, i32 -> vector<8x256xf32>
    %c5_55 = arith.constant 5 : index
    %c0_56 = arith.constant 0 : index
    %c0_57 = arith.constant 0 : index
    %159 = vector.load %arg2[%c5_55, %c0_56, %c0_57] : memref<9x1x256xf32, #tpu.memory_space<vmem>>, vector<1x1x256xf32>
    %160 = vector.shape_cast %159 : vector<1x1x256xf32> to vector<1x256xf32>
    %161 = vector.broadcast %160 : vector<1x256xf32> to vector<8x256xf32>
    %162 = arith.mulf %158, %161 : vector<8x256xf32>
    %163 = vector.extract_strided_slice %162 {offsets = [0, 0], sizes = [2, 256], strides = [1, 1]} : vector<8x256xf32> to vector<2x256xf32>
    %164 = tpu.concatenate %163, %163, %163, %163 in 0 : vector<2x256xf32>, vector<2x256xf32>, vector<2x256xf32>, vector<2x256xf32> -> vector<8x256xf32>
    %c20 = arith.constant 20 : index
    %c0_58 = arith.constant 0 : index
    %c0_59 = arith.constant 0 : index
    %165 = vector.load %arg3[%c20, %c0_58, %c0_59] : memref<36x8x1xf32, #tpu.memory_space<vmem>>, vector<1x8x1xf32>
    %166 = vector.shape_cast %165 : vector<1x8x1xf32> to vector<8x1xf32>
    %167 = vector.broadcast %166 : vector<8x1xf32> to vector<8x256xf32>
    %168 = arith.mulf %167, %164 : vector<8x256xf32>
    %169 = arith.addf %136, %168 : vector<8x256xf32>
    %170 = vector.extract_strided_slice %162 {offsets = [2, 0], sizes = [2, 256], strides = [1, 1]} : vector<8x256xf32> to vector<2x256xf32>
    %171 = tpu.concatenate %170, %170, %170, %170 in 0 : vector<2x256xf32>, vector<2x256xf32>, vector<2x256xf32>, vector<2x256xf32> -> vector<8x256xf32>
    %c21 = arith.constant 21 : index
    %c0_60 = arith.constant 0 : index
    %c0_61 = arith.constant 0 : index
    %172 = vector.load %arg3[%c21, %c0_60, %c0_61] : memref<36x8x1xf32, #tpu.memory_space<vmem>>, vector<1x8x1xf32>
    %173 = vector.shape_cast %172 : vector<1x8x1xf32> to vector<8x1xf32>
    %174 = vector.broadcast %173 : vector<8x1xf32> to vector<8x256xf32>
    %175 = arith.mulf %174, %171 : vector<8x256xf32>
    %176 = arith.addf %143, %175 : vector<8x256xf32>
    %177 = vector.extract_strided_slice %162 {offsets = [4, 0], sizes = [2, 256], strides = [1, 1]} : vector<8x256xf32> to vector<2x256xf32>
    %178 = tpu.concatenate %177, %177, %177, %177 in 0 : vector<2x256xf32>, vector<2x256xf32>, vector<2x256xf32>, vector<2x256xf32> -> vector<8x256xf32>
    %c22 = arith.constant 22 : index
    %c0_62 = arith.constant 0 : index
    %c0_63 = arith.constant 0 : index
    %179 = vector.load %arg3[%c22, %c0_62, %c0_63] : memref<36x8x1xf32, #tpu.memory_space<vmem>>, vector<1x8x1xf32>
    %180 = vector.shape_cast %179 : vector<1x8x1xf32> to vector<8x1xf32>
    %181 = vector.broadcast %180 : vector<8x1xf32> to vector<8x256xf32>
    %182 = arith.mulf %181, %178 : vector<8x256xf32>
    %183 = arith.addf %150, %182 : vector<8x256xf32>
    %184 = vector.extract_strided_slice %162 {offsets = [6, 0], sizes = [2, 256], strides = [1, 1]} : vector<8x256xf32> to vector<2x256xf32>
    %185 = tpu.concatenate %184, %184, %184, %184 in 0 : vector<2x256xf32>, vector<2x256xf32>, vector<2x256xf32>, vector<2x256xf32> -> vector<8x256xf32>
    %c23 = arith.constant 23 : index
    %c0_64 = arith.constant 0 : index
    %c0_65 = arith.constant 0 : index
    %186 = vector.load %arg3[%c23, %c0_64, %c0_65] : memref<36x8x1xf32, #tpu.memory_space<vmem>>, vector<1x8x1xf32>
    %187 = vector.shape_cast %186 : vector<1x8x1xf32> to vector<8x1xf32>
    %188 = vector.broadcast %187 : vector<8x1xf32> to vector<8x256xf32>
    %189 = arith.mulf %188, %185 : vector<8x256xf32>
    %190 = arith.addf %157, %189 : vector<8x256xf32>
    %c241_i32 = arith.constant 241 : i32
    %191 = tpu.dynamic_rotate %1 by %c241_i32 dim 1 : vector<8x256xf32>, i32 -> vector<8x256xf32>
    %c6_66 = arith.constant 6 : index
    %c0_67 = arith.constant 0 : index
    %c0_68 = arith.constant 0 : index
    %192 = vector.load %arg2[%c6_66, %c0_67, %c0_68] : memref<9x1x256xf32, #tpu.memory_space<vmem>>, vector<1x1x256xf32>
    %193 = vector.shape_cast %192 : vector<1x1x256xf32> to vector<1x256xf32>
    %194 = vector.broadcast %193 : vector<1x256xf32> to vector<8x256xf32>
    %195 = arith.mulf %191, %194 : vector<8x256xf32>
    %196 = vector.extract_strided_slice %195 {offsets = [0, 0], sizes = [2, 256], strides = [1, 1]} : vector<8x256xf32> to vector<2x256xf32>
    %197 = tpu.concatenate %196, %196, %196, %196 in 0 : vector<2x256xf32>, vector<2x256xf32>, vector<2x256xf32>, vector<2x256xf32> -> vector<8x256xf32>
    %c24 = arith.constant 24 : index
    %c0_69 = arith.constant 0 : index
    %c0_70 = arith.constant 0 : index
    %198 = vector.load %arg3[%c24, %c0_69, %c0_70] : memref<36x8x1xf32, #tpu.memory_space<vmem>>, vector<1x8x1xf32>
    %199 = vector.shape_cast %198 : vector<1x8x1xf32> to vector<8x1xf32>
    %200 = vector.broadcast %199 : vector<8x1xf32> to vector<8x256xf32>
    %201 = arith.mulf %200, %197 : vector<8x256xf32>
    %202 = arith.addf %169, %201 : vector<8x256xf32>
    %203 = vector.extract_strided_slice %195 {offsets = [2, 0], sizes = [2, 256], strides = [1, 1]} : vector<8x256xf32> to vector<2x256xf32>
    %204 = tpu.concatenate %203, %203, %203, %203 in 0 : vector<2x256xf32>, vector<2x256xf32>, vector<2x256xf32>, vector<2x256xf32> -> vector<8x256xf32>
    %c25 = arith.constant 25 : index
    %c0_71 = arith.constant 0 : index
    %c0_72 = arith.constant 0 : index
    %205 = vector.load %arg3[%c25, %c0_71, %c0_72] : memref<36x8x1xf32, #tpu.memory_space<vmem>>, vector<1x8x1xf32>
    %206 = vector.shape_cast %205 : vector<1x8x1xf32> to vector<8x1xf32>
    %207 = vector.broadcast %206 : vector<8x1xf32> to vector<8x256xf32>
    %208 = arith.mulf %207, %204 : vector<8x256xf32>
    %209 = arith.addf %176, %208 : vector<8x256xf32>
    %210 = vector.extract_strided_slice %195 {offsets = [4, 0], sizes = [2, 256], strides = [1, 1]} : vector<8x256xf32> to vector<2x256xf32>
    %211 = tpu.concatenate %210, %210, %210, %210 in 0 : vector<2x256xf32>, vector<2x256xf32>, vector<2x256xf32>, vector<2x256xf32> -> vector<8x256xf32>
    %c26 = arith.constant 26 : index
    %c0_73 = arith.constant 0 : index
    %c0_74 = arith.constant 0 : index
    %212 = vector.load %arg3[%c26, %c0_73, %c0_74] : memref<36x8x1xf32, #tpu.memory_space<vmem>>, vector<1x8x1xf32>
    %213 = vector.shape_cast %212 : vector<1x8x1xf32> to vector<8x1xf32>
    %214 = vector.broadcast %213 : vector<8x1xf32> to vector<8x256xf32>
    %215 = arith.mulf %214, %211 : vector<8x256xf32>
    %216 = arith.addf %183, %215 : vector<8x256xf32>
    %217 = vector.extract_strided_slice %195 {offsets = [6, 0], sizes = [2, 256], strides = [1, 1]} : vector<8x256xf32> to vector<2x256xf32>
    %218 = tpu.concatenate %217, %217, %217, %217 in 0 : vector<2x256xf32>, vector<2x256xf32>, vector<2x256xf32>, vector<2x256xf32> -> vector<8x256xf32>
    %c27 = arith.constant 27 : index
    %c0_75 = arith.constant 0 : index
    %c0_76 = arith.constant 0 : index
    %219 = vector.load %arg3[%c27, %c0_75, %c0_76] : memref<36x8x1xf32, #tpu.memory_space<vmem>>, vector<1x8x1xf32>
    %220 = vector.shape_cast %219 : vector<1x8x1xf32> to vector<8x1xf32>
    %221 = vector.broadcast %220 : vector<8x1xf32> to vector<8x256xf32>
    %222 = arith.mulf %221, %218 : vector<8x256xf32>
    %223 = arith.addf %190, %222 : vector<8x256xf32>
    %c240_i32 = arith.constant 240 : i32
    %224 = tpu.dynamic_rotate %1 by %c240_i32 dim 1 : vector<8x256xf32>, i32 -> vector<8x256xf32>
    %c7_77 = arith.constant 7 : index
    %c0_78 = arith.constant 0 : index
    %c0_79 = arith.constant 0 : index
    %225 = vector.load %arg2[%c7_77, %c0_78, %c0_79] : memref<9x1x256xf32, #tpu.memory_space<vmem>>, vector<1x1x256xf32>
    %226 = vector.shape_cast %225 : vector<1x1x256xf32> to vector<1x256xf32>
    %227 = vector.broadcast %226 : vector<1x256xf32> to vector<8x256xf32>
    %228 = arith.mulf %224, %227 : vector<8x256xf32>
    %229 = vector.extract_strided_slice %228 {offsets = [0, 0], sizes = [2, 256], strides = [1, 1]} : vector<8x256xf32> to vector<2x256xf32>
    %230 = tpu.concatenate %229, %229, %229, %229 in 0 : vector<2x256xf32>, vector<2x256xf32>, vector<2x256xf32>, vector<2x256xf32> -> vector<8x256xf32>
    %c28 = arith.constant 28 : index
    %c0_80 = arith.constant 0 : index
    %c0_81 = arith.constant 0 : index
    %231 = vector.load %arg3[%c28, %c0_80, %c0_81] : memref<36x8x1xf32, #tpu.memory_space<vmem>>, vector<1x8x1xf32>
    %232 = vector.shape_cast %231 : vector<1x8x1xf32> to vector<8x1xf32>
    %233 = vector.broadcast %232 : vector<8x1xf32> to vector<8x256xf32>
    %234 = arith.mulf %233, %230 : vector<8x256xf32>
    %235 = arith.addf %202, %234 : vector<8x256xf32>
    %236 = vector.extract_strided_slice %228 {offsets = [2, 0], sizes = [2, 256], strides = [1, 1]} : vector<8x256xf32> to vector<2x256xf32>
    %237 = tpu.concatenate %236, %236, %236, %236 in 0 : vector<2x256xf32>, vector<2x256xf32>, vector<2x256xf32>, vector<2x256xf32> -> vector<8x256xf32>
    %c29 = arith.constant 29 : index
    %c0_82 = arith.constant 0 : index
    %c0_83 = arith.constant 0 : index
    %238 = vector.load %arg3[%c29, %c0_82, %c0_83] : memref<36x8x1xf32, #tpu.memory_space<vmem>>, vector<1x8x1xf32>
    %239 = vector.shape_cast %238 : vector<1x8x1xf32> to vector<8x1xf32>
    %240 = vector.broadcast %239 : vector<8x1xf32> to vector<8x256xf32>
    %241 = arith.mulf %240, %237 : vector<8x256xf32>
    %242 = arith.addf %209, %241 : vector<8x256xf32>
    %243 = vector.extract_strided_slice %228 {offsets = [4, 0], sizes = [2, 256], strides = [1, 1]} : vector<8x256xf32> to vector<2x256xf32>
    %244 = tpu.concatenate %243, %243, %243, %243 in 0 : vector<2x256xf32>, vector<2x256xf32>, vector<2x256xf32>, vector<2x256xf32> -> vector<8x256xf32>
    %c30 = arith.constant 30 : index
    %c0_84 = arith.constant 0 : index
    %c0_85 = arith.constant 0 : index
    %245 = vector.load %arg3[%c30, %c0_84, %c0_85] : memref<36x8x1xf32, #tpu.memory_space<vmem>>, vector<1x8x1xf32>
    %246 = vector.shape_cast %245 : vector<1x8x1xf32> to vector<8x1xf32>
    %247 = vector.broadcast %246 : vector<8x1xf32> to vector<8x256xf32>
    %248 = arith.mulf %247, %244 : vector<8x256xf32>
    %249 = arith.addf %216, %248 : vector<8x256xf32>
    %250 = vector.extract_strided_slice %228 {offsets = [6, 0], sizes = [2, 256], strides = [1, 1]} : vector<8x256xf32> to vector<2x256xf32>
    %251 = tpu.concatenate %250, %250, %250, %250 in 0 : vector<2x256xf32>, vector<2x256xf32>, vector<2x256xf32>, vector<2x256xf32> -> vector<8x256xf32>
    %c31 = arith.constant 31 : index
    %c0_86 = arith.constant 0 : index
    %c0_87 = arith.constant 0 : index
    %252 = vector.load %arg3[%c31, %c0_86, %c0_87] : memref<36x8x1xf32, #tpu.memory_space<vmem>>, vector<1x8x1xf32>
    %253 = vector.shape_cast %252 : vector<1x8x1xf32> to vector<8x1xf32>
    %254 = vector.broadcast %253 : vector<8x1xf32> to vector<8x256xf32>
    %255 = arith.mulf %254, %251 : vector<8x256xf32>
    %256 = arith.addf %223, %255 : vector<8x256xf32>
    %c239_i32 = arith.constant 239 : i32
    %257 = tpu.dynamic_rotate %1 by %c239_i32 dim 1 : vector<8x256xf32>, i32 -> vector<8x256xf32>
    %c8_88 = arith.constant 8 : index
    %c0_89 = arith.constant 0 : index
    %c0_90 = arith.constant 0 : index
    %258 = vector.load %arg2[%c8_88, %c0_89, %c0_90] : memref<9x1x256xf32, #tpu.memory_space<vmem>>, vector<1x1x256xf32>
    %259 = vector.shape_cast %258 : vector<1x1x256xf32> to vector<1x256xf32>
    %260 = vector.broadcast %259 : vector<1x256xf32> to vector<8x256xf32>
    %261 = arith.mulf %257, %260 : vector<8x256xf32>
    %262 = vector.extract_strided_slice %261 {offsets = [0, 0], sizes = [2, 256], strides = [1, 1]} : vector<8x256xf32> to vector<2x256xf32>
    %263 = tpu.concatenate %262, %262, %262, %262 in 0 : vector<2x256xf32>, vector<2x256xf32>, vector<2x256xf32>, vector<2x256xf32> -> vector<8x256xf32>
    %c32 = arith.constant 32 : index
    %c0_91 = arith.constant 0 : index
    %c0_92 = arith.constant 0 : index
    %264 = vector.load %arg3[%c32, %c0_91, %c0_92] : memref<36x8x1xf32, #tpu.memory_space<vmem>>, vector<1x8x1xf32>
    %265 = vector.shape_cast %264 : vector<1x8x1xf32> to vector<8x1xf32>
    %266 = vector.broadcast %265 : vector<8x1xf32> to vector<8x256xf32>
    %267 = arith.mulf %266, %263 : vector<8x256xf32>
    %268 = arith.addf %235, %267 : vector<8x256xf32>
    %269 = vector.extract_strided_slice %261 {offsets = [2, 0], sizes = [2, 256], strides = [1, 1]} : vector<8x256xf32> to vector<2x256xf32>
    %270 = tpu.concatenate %269, %269, %269, %269 in 0 : vector<2x256xf32>, vector<2x256xf32>, vector<2x256xf32>, vector<2x256xf32> -> vector<8x256xf32>
    %c33 = arith.constant 33 : index
    %c0_93 = arith.constant 0 : index
    %c0_94 = arith.constant 0 : index
    %271 = vector.load %arg3[%c33, %c0_93, %c0_94] : memref<36x8x1xf32, #tpu.memory_space<vmem>>, vector<1x8x1xf32>
    %272 = vector.shape_cast %271 : vector<1x8x1xf32> to vector<8x1xf32>
    %273 = vector.broadcast %272 : vector<8x1xf32> to vector<8x256xf32>
    %274 = arith.mulf %273, %270 : vector<8x256xf32>
    %275 = arith.addf %242, %274 : vector<8x256xf32>
    %276 = vector.extract_strided_slice %261 {offsets = [4, 0], sizes = [2, 256], strides = [1, 1]} : vector<8x256xf32> to vector<2x256xf32>
    %277 = tpu.concatenate %276, %276, %276, %276 in 0 : vector<2x256xf32>, vector<2x256xf32>, vector<2x256xf32>, vector<2x256xf32> -> vector<8x256xf32>
    %c34 = arith.constant 34 : index
    %c0_95 = arith.constant 0 : index
    %c0_96 = arith.constant 0 : index
    %278 = vector.load %arg3[%c34, %c0_95, %c0_96] : memref<36x8x1xf32, #tpu.memory_space<vmem>>, vector<1x8x1xf32>
    %279 = vector.shape_cast %278 : vector<1x8x1xf32> to vector<8x1xf32>
    %280 = vector.broadcast %279 : vector<8x1xf32> to vector<8x256xf32>
    %281 = arith.mulf %280, %277 : vector<8x256xf32>
    %282 = arith.addf %249, %281 : vector<8x256xf32>
    %283 = vector.extract_strided_slice %261 {offsets = [6, 0], sizes = [2, 256], strides = [1, 1]} : vector<8x256xf32> to vector<2x256xf32>
    %284 = tpu.concatenate %283, %283, %283, %283 in 0 : vector<2x256xf32>, vector<2x256xf32>, vector<2x256xf32>, vector<2x256xf32> -> vector<8x256xf32>
    %c35 = arith.constant 35 : index
    %c0_97 = arith.constant 0 : index
    %c0_98 = arith.constant 0 : index
    %285 = vector.load %arg3[%c35, %c0_97, %c0_98] : memref<36x8x1xf32, #tpu.memory_space<vmem>>, vector<1x8x1xf32>
    %286 = vector.shape_cast %285 : vector<1x8x1xf32> to vector<8x1xf32>
    %287 = vector.broadcast %286 : vector<8x1xf32> to vector<8x256xf32>
    %288 = arith.mulf %287, %284 : vector<8x256xf32>
    %289 = arith.addf %256, %288 : vector<8x256xf32>
    %290 = arith.addf %268, %275 : vector<8x256xf32>
    %291 = arith.addf %290, %282 : vector<8x256xf32>
    %292 = arith.addf %291, %289 : vector<8x256xf32>
    %c0_99 = arith.constant 0 : index
    %c0_100 = arith.constant 0 : index
    %293 = vector.load %arg4[%c0_99, %c0_100] : memref<8x1xf32, #tpu.memory_space<vmem>>, vector<8x1xf32>
    %294 = vector.broadcast %293 : vector<8x1xf32> to vector<8x256xf32>
    %295 = arith.addf %292, %294 : vector<8x256xf32>
    %cst = arith.constant 0.000000e+00 : f32
    %296 = vector.broadcast %cst : f32 to vector<8x256xf32>
    %297 = arith.maximumf %295, %296 : vector<8x256xf32>
    %c17_i32_101 = arith.constant 17 : i32
    %298 = tpu.dynamic_rotate %297 by %c17_i32_101 dim 1 : vector<8x256xf32>, i32 -> vector<8x256xf32>
    %c0_102 = arith.constant 0 : index
    %c0_103 = arith.constant 0 : index
    %c0_104 = arith.constant 0 : index
    %299 = vector.load %arg2[%c0_102, %c0_103, %c0_104] : memref<9x1x256xf32, #tpu.memory_space<vmem>>, vector<1x1x256xf32>
    %300 = vector.shape_cast %299 : vector<1x1x256xf32> to vector<1x256xf32>
    %301 = vector.broadcast %300 : vector<1x256xf32> to vector<8x256xf32>
    %302 = arith.mulf %298, %301 : vector<8x256xf32>
    %303 = vector.extract_strided_slice %302 {offsets = [0, 0], sizes = [2, 256], strides = [1, 1]} : vector<8x256xf32> to vector<2x256xf32>
    %304 = tpu.concatenate %303, %303, %303, %303 in 0 : vector<2x256xf32>, vector<2x256xf32>, vector<2x256xf32>, vector<2x256xf32> -> vector<8x256xf32>
    %c0_105 = arith.constant 0 : index
    %c0_106 = arith.constant 0 : index
    %c0_107 = arith.constant 0 : index
    %305 = vector.load %arg5[%c0_105, %c0_106, %c0_107] : memref<36x8x1xf32, #tpu.memory_space<vmem>>, vector<1x8x1xf32>
    %306 = vector.shape_cast %305 : vector<1x8x1xf32> to vector<8x1xf32>
    %307 = vector.broadcast %306 : vector<8x1xf32> to vector<8x256xf32>
    %308 = arith.mulf %307, %304 : vector<8x256xf32>
    %309 = vector.extract_strided_slice %302 {offsets = [2, 0], sizes = [2, 256], strides = [1, 1]} : vector<8x256xf32> to vector<2x256xf32>
    %310 = tpu.concatenate %309, %309, %309, %309 in 0 : vector<2x256xf32>, vector<2x256xf32>, vector<2x256xf32>, vector<2x256xf32> -> vector<8x256xf32>
    %c1_108 = arith.constant 1 : index
    %c0_109 = arith.constant 0 : index
    %c0_110 = arith.constant 0 : index
    %311 = vector.load %arg5[%c1_108, %c0_109, %c0_110] : memref<36x8x1xf32, #tpu.memory_space<vmem>>, vector<1x8x1xf32>
    %312 = vector.shape_cast %311 : vector<1x8x1xf32> to vector<8x1xf32>
    %313 = vector.broadcast %312 : vector<8x1xf32> to vector<8x256xf32>
    %314 = arith.mulf %313, %310 : vector<8x256xf32>
    %315 = vector.extract_strided_slice %302 {offsets = [4, 0], sizes = [2, 256], strides = [1, 1]} : vector<8x256xf32> to vector<2x256xf32>
    %316 = tpu.concatenate %315, %315, %315, %315 in 0 : vector<2x256xf32>, vector<2x256xf32>, vector<2x256xf32>, vector<2x256xf32> -> vector<8x256xf32>
    %c2_111 = arith.constant 2 : index
    %c0_112 = arith.constant 0 : index
    %c0_113 = arith.constant 0 : index
    %317 = vector.load %arg5[%c2_111, %c0_112, %c0_113] : memref<36x8x1xf32, #tpu.memory_space<vmem>>, vector<1x8x1xf32>
    %318 = vector.shape_cast %317 : vector<1x8x1xf32> to vector<8x1xf32>
    %319 = vector.broadcast %318 : vector<8x1xf32> to vector<8x256xf32>
    %320 = arith.mulf %319, %316 : vector<8x256xf32>
    %321 = vector.extract_strided_slice %302 {offsets = [6, 0], sizes = [2, 256], strides = [1, 1]} : vector<8x256xf32> to vector<2x256xf32>
    %322 = tpu.concatenate %321, %321, %321, %321 in 0 : vector<2x256xf32>, vector<2x256xf32>, vector<2x256xf32>, vector<2x256xf32> -> vector<8x256xf32>
    %c3_114 = arith.constant 3 : index
    %c0_115 = arith.constant 0 : index
    %c0_116 = arith.constant 0 : index
    %323 = vector.load %arg5[%c3_114, %c0_115, %c0_116] : memref<36x8x1xf32, #tpu.memory_space<vmem>>, vector<1x8x1xf32>
    %324 = vector.shape_cast %323 : vector<1x8x1xf32> to vector<8x1xf32>
    %325 = vector.broadcast %324 : vector<8x1xf32> to vector<8x256xf32>
    %326 = arith.mulf %325, %322 : vector<8x256xf32>
    %c16_i32_117 = arith.constant 16 : i32
    %327 = tpu.dynamic_rotate %297 by %c16_i32_117 dim 1 : vector<8x256xf32>, i32 -> vector<8x256xf32>
    %c1_118 = arith.constant 1 : index
    %c0_119 = arith.constant 0 : index
    %c0_120 = arith.constant 0 : index
    %328 = vector.load %arg2[%c1_118, %c0_119, %c0_120] : memref<9x1x256xf32, #tpu.memory_space<vmem>>, vector<1x1x256xf32>
    %329 = vector.shape_cast %328 : vector<1x1x256xf32> to vector<1x256xf32>
    %330 = vector.broadcast %329 : vector<1x256xf32> to vector<8x256xf32>
    %331 = arith.mulf %327, %330 : vector<8x256xf32>
    %332 = vector.extract_strided_slice %331 {offsets = [0, 0], sizes = [2, 256], strides = [1, 1]} : vector<8x256xf32> to vector<2x256xf32>
    %333 = tpu.concatenate %332, %332, %332, %332 in 0 : vector<2x256xf32>, vector<2x256xf32>, vector<2x256xf32>, vector<2x256xf32> -> vector<8x256xf32>
    %c4_121 = arith.constant 4 : index
    %c0_122 = arith.constant 0 : index
    %c0_123 = arith.constant 0 : index
    %334 = vector.load %arg5[%c4_121, %c0_122, %c0_123] : memref<36x8x1xf32, #tpu.memory_space<vmem>>, vector<1x8x1xf32>
    %335 = vector.shape_cast %334 : vector<1x8x1xf32> to vector<8x1xf32>
    %336 = vector.broadcast %335 : vector<8x1xf32> to vector<8x256xf32>
    %337 = arith.mulf %336, %333 : vector<8x256xf32>
    %338 = arith.addf %308, %337 : vector<8x256xf32>
    %339 = vector.extract_strided_slice %331 {offsets = [2, 0], sizes = [2, 256], strides = [1, 1]} : vector<8x256xf32> to vector<2x256xf32>
    %340 = tpu.concatenate %339, %339, %339, %339 in 0 : vector<2x256xf32>, vector<2x256xf32>, vector<2x256xf32>, vector<2x256xf32> -> vector<8x256xf32>
    %c5_124 = arith.constant 5 : index
    %c0_125 = arith.constant 0 : index
    %c0_126 = arith.constant 0 : index
    %341 = vector.load %arg5[%c5_124, %c0_125, %c0_126] : memref<36x8x1xf32, #tpu.memory_space<vmem>>, vector<1x8x1xf32>
    %342 = vector.shape_cast %341 : vector<1x8x1xf32> to vector<8x1xf32>
    %343 = vector.broadcast %342 : vector<8x1xf32> to vector<8x256xf32>
    %344 = arith.mulf %343, %340 : vector<8x256xf32>
    %345 = arith.addf %314, %344 : vector<8x256xf32>
    %346 = vector.extract_strided_slice %331 {offsets = [4, 0], sizes = [2, 256], strides = [1, 1]} : vector<8x256xf32> to vector<2x256xf32>
    %347 = tpu.concatenate %346, %346, %346, %346 in 0 : vector<2x256xf32>, vector<2x256xf32>, vector<2x256xf32>, vector<2x256xf32> -> vector<8x256xf32>
    %c6_127 = arith.constant 6 : index
    %c0_128 = arith.constant 0 : index
    %c0_129 = arith.constant 0 : index
    %348 = vector.load %arg5[%c6_127, %c0_128, %c0_129] : memref<36x8x1xf32, #tpu.memory_space<vmem>>, vector<1x8x1xf32>
    %349 = vector.shape_cast %348 : vector<1x8x1xf32> to vector<8x1xf32>
    %350 = vector.broadcast %349 : vector<8x1xf32> to vector<8x256xf32>
    %351 = arith.mulf %350, %347 : vector<8x256xf32>
    %352 = arith.addf %320, %351 : vector<8x256xf32>
    %353 = vector.extract_strided_slice %331 {offsets = [6, 0], sizes = [2, 256], strides = [1, 1]} : vector<8x256xf32> to vector<2x256xf32>
    %354 = tpu.concatenate %353, %353, %353, %353 in 0 : vector<2x256xf32>, vector<2x256xf32>, vector<2x256xf32>, vector<2x256xf32> -> vector<8x256xf32>
    %c7_130 = arith.constant 7 : index
    %c0_131 = arith.constant 0 : index
    %c0_132 = arith.constant 0 : index
    %355 = vector.load %arg5[%c7_130, %c0_131, %c0_132] : memref<36x8x1xf32, #tpu.memory_space<vmem>>, vector<1x8x1xf32>
    %356 = vector.shape_cast %355 : vector<1x8x1xf32> to vector<8x1xf32>
    %357 = vector.broadcast %356 : vector<8x1xf32> to vector<8x256xf32>
    %358 = arith.mulf %357, %354 : vector<8x256xf32>
    %359 = arith.addf %326, %358 : vector<8x256xf32>
    %c15_i32_133 = arith.constant 15 : i32
    %360 = tpu.dynamic_rotate %297 by %c15_i32_133 dim 1 : vector<8x256xf32>, i32 -> vector<8x256xf32>
    %c2_134 = arith.constant 2 : index
    %c0_135 = arith.constant 0 : index
    %c0_136 = arith.constant 0 : index
    %361 = vector.load %arg2[%c2_134, %c0_135, %c0_136] : memref<9x1x256xf32, #tpu.memory_space<vmem>>, vector<1x1x256xf32>
    %362 = vector.shape_cast %361 : vector<1x1x256xf32> to vector<1x256xf32>
    %363 = vector.broadcast %362 : vector<1x256xf32> to vector<8x256xf32>
    %364 = arith.mulf %360, %363 : vector<8x256xf32>
    %365 = vector.extract_strided_slice %364 {offsets = [0, 0], sizes = [2, 256], strides = [1, 1]} : vector<8x256xf32> to vector<2x256xf32>
    %366 = tpu.concatenate %365, %365, %365, %365 in 0 : vector<2x256xf32>, vector<2x256xf32>, vector<2x256xf32>, vector<2x256xf32> -> vector<8x256xf32>
    %c8_137 = arith.constant 8 : index
    %c0_138 = arith.constant 0 : index
    %c0_139 = arith.constant 0 : index
    %367 = vector.load %arg5[%c8_137, %c0_138, %c0_139] : memref<36x8x1xf32, #tpu.memory_space<vmem>>, vector<1x8x1xf32>
    %368 = vector.shape_cast %367 : vector<1x8x1xf32> to vector<8x1xf32>
    %369 = vector.broadcast %368 : vector<8x1xf32> to vector<8x256xf32>
    %370 = arith.mulf %369, %366 : vector<8x256xf32>
    %371 = arith.addf %338, %370 : vector<8x256xf32>
    %372 = vector.extract_strided_slice %364 {offsets = [2, 0], sizes = [2, 256], strides = [1, 1]} : vector<8x256xf32> to vector<2x256xf32>
    %373 = tpu.concatenate %372, %372, %372, %372 in 0 : vector<2x256xf32>, vector<2x256xf32>, vector<2x256xf32>, vector<2x256xf32> -> vector<8x256xf32>
    %c9_140 = arith.constant 9 : index
    %c0_141 = arith.constant 0 : index
    %c0_142 = arith.constant 0 : index
    %374 = vector.load %arg5[%c9_140, %c0_141, %c0_142] : memref<36x8x1xf32, #tpu.memory_space<vmem>>, vector<1x8x1xf32>
    %375 = vector.shape_cast %374 : vector<1x8x1xf32> to vector<8x1xf32>
    %376 = vector.broadcast %375 : vector<8x1xf32> to vector<8x256xf32>
    %377 = arith.mulf %376, %373 : vector<8x256xf32>
    %378 = arith.addf %345, %377 : vector<8x256xf32>
    %379 = vector.extract_strided_slice %364 {offsets = [4, 0], sizes = [2, 256], strides = [1, 1]} : vector<8x256xf32> to vector<2x256xf32>
    %380 = tpu.concatenate %379, %379, %379, %379 in 0 : vector<2x256xf32>, vector<2x256xf32>, vector<2x256xf32>, vector<2x256xf32> -> vector<8x256xf32>
    %c10_143 = arith.constant 10 : index
    %c0_144 = arith.constant 0 : index
    %c0_145 = arith.constant 0 : index
    %381 = vector.load %arg5[%c10_143, %c0_144, %c0_145] : memref<36x8x1xf32, #tpu.memory_space<vmem>>, vector<1x8x1xf32>
    %382 = vector.shape_cast %381 : vector<1x8x1xf32> to vector<8x1xf32>
    %383 = vector.broadcast %382 : vector<8x1xf32> to vector<8x256xf32>
    %384 = arith.mulf %383, %380 : vector<8x256xf32>
    %385 = arith.addf %352, %384 : vector<8x256xf32>
    %386 = vector.extract_strided_slice %364 {offsets = [6, 0], sizes = [2, 256], strides = [1, 1]} : vector<8x256xf32> to vector<2x256xf32>
    %387 = tpu.concatenate %386, %386, %386, %386 in 0 : vector<2x256xf32>, vector<2x256xf32>, vector<2x256xf32>, vector<2x256xf32> -> vector<8x256xf32>
    %c11_146 = arith.constant 11 : index
    %c0_147 = arith.constant 0 : index
    %c0_148 = arith.constant 0 : index
    %388 = vector.load %arg5[%c11_146, %c0_147, %c0_148] : memref<36x8x1xf32, #tpu.memory_space<vmem>>, vector<1x8x1xf32>
    %389 = vector.shape_cast %388 : vector<1x8x1xf32> to vector<8x1xf32>
    %390 = vector.broadcast %389 : vector<8x1xf32> to vector<8x256xf32>
    %391 = arith.mulf %390, %387 : vector<8x256xf32>
    %392 = arith.addf %359, %391 : vector<8x256xf32>
    %c1_i32_149 = arith.constant 1 : i32
    %393 = tpu.dynamic_rotate %297 by %c1_i32_149 dim 1 : vector<8x256xf32>, i32 -> vector<8x256xf32>
    %c3_150 = arith.constant 3 : index
    %c0_151 = arith.constant 0 : index
    %c0_152 = arith.constant 0 : index
    %394 = vector.load %arg2[%c3_150, %c0_151, %c0_152] : memref<9x1x256xf32, #tpu.memory_space<vmem>>, vector<1x1x256xf32>
    %395 = vector.shape_cast %394 : vector<1x1x256xf32> to vector<1x256xf32>
    %396 = vector.broadcast %395 : vector<1x256xf32> to vector<8x256xf32>
    %397 = arith.mulf %393, %396 : vector<8x256xf32>
    %398 = vector.extract_strided_slice %397 {offsets = [0, 0], sizes = [2, 256], strides = [1, 1]} : vector<8x256xf32> to vector<2x256xf32>
    %399 = tpu.concatenate %398, %398, %398, %398 in 0 : vector<2x256xf32>, vector<2x256xf32>, vector<2x256xf32>, vector<2x256xf32> -> vector<8x256xf32>
    %c12_153 = arith.constant 12 : index
    %c0_154 = arith.constant 0 : index
    %c0_155 = arith.constant 0 : index
    %400 = vector.load %arg5[%c12_153, %c0_154, %c0_155] : memref<36x8x1xf32, #tpu.memory_space<vmem>>, vector<1x8x1xf32>
    %401 = vector.shape_cast %400 : vector<1x8x1xf32> to vector<8x1xf32>
    %402 = vector.broadcast %401 : vector<8x1xf32> to vector<8x256xf32>
    %403 = arith.mulf %402, %399 : vector<8x256xf32>
    %404 = arith.addf %371, %403 : vector<8x256xf32>
    %405 = vector.extract_strided_slice %397 {offsets = [2, 0], sizes = [2, 256], strides = [1, 1]} : vector<8x256xf32> to vector<2x256xf32>
    %406 = tpu.concatenate %405, %405, %405, %405 in 0 : vector<2x256xf32>, vector<2x256xf32>, vector<2x256xf32>, vector<2x256xf32> -> vector<8x256xf32>
    %c13_156 = arith.constant 13 : index
    %c0_157 = arith.constant 0 : index
    %c0_158 = arith.constant 0 : index
    %407 = vector.load %arg5[%c13_156, %c0_157, %c0_158] : memref<36x8x1xf32, #tpu.memory_space<vmem>>, vector<1x8x1xf32>
    %408 = vector.shape_cast %407 : vector<1x8x1xf32> to vector<8x1xf32>
    %409 = vector.broadcast %408 : vector<8x1xf32> to vector<8x256xf32>
    %410 = arith.mulf %409, %406 : vector<8x256xf32>
    %411 = arith.addf %378, %410 : vector<8x256xf32>
    %412 = vector.extract_strided_slice %397 {offsets = [4, 0], sizes = [2, 256], strides = [1, 1]} : vector<8x256xf32> to vector<2x256xf32>
    %413 = tpu.concatenate %412, %412, %412, %412 in 0 : vector<2x256xf32>, vector<2x256xf32>, vector<2x256xf32>, vector<2x256xf32> -> vector<8x256xf32>
    %c14_159 = arith.constant 14 : index
    %c0_160 = arith.constant 0 : index
    %c0_161 = arith.constant 0 : index
    %414 = vector.load %arg5[%c14_159, %c0_160, %c0_161] : memref<36x8x1xf32, #tpu.memory_space<vmem>>, vector<1x8x1xf32>
    %415 = vector.shape_cast %414 : vector<1x8x1xf32> to vector<8x1xf32>
    %416 = vector.broadcast %415 : vector<8x1xf32> to vector<8x256xf32>
    %417 = arith.mulf %416, %413 : vector<8x256xf32>
    %418 = arith.addf %385, %417 : vector<8x256xf32>
    %419 = vector.extract_strided_slice %397 {offsets = [6, 0], sizes = [2, 256], strides = [1, 1]} : vector<8x256xf32> to vector<2x256xf32>
    %420 = tpu.concatenate %419, %419, %419, %419 in 0 : vector<2x256xf32>, vector<2x256xf32>, vector<2x256xf32>, vector<2x256xf32> -> vector<8x256xf32>
    %c15_162 = arith.constant 15 : index
    %c0_163 = arith.constant 0 : index
    %c0_164 = arith.constant 0 : index
    %421 = vector.load %arg5[%c15_162, %c0_163, %c0_164] : memref<36x8x1xf32, #tpu.memory_space<vmem>>, vector<1x8x1xf32>
    %422 = vector.shape_cast %421 : vector<1x8x1xf32> to vector<8x1xf32>
    %423 = vector.broadcast %422 : vector<8x1xf32> to vector<8x256xf32>
    %424 = arith.mulf %423, %420 : vector<8x256xf32>
    %425 = arith.addf %392, %424 : vector<8x256xf32>
    %426 = vector.extract_strided_slice %297 {offsets = [0, 0], sizes = [2, 256], strides = [1, 1]} : vector<8x256xf32> to vector<2x256xf32>
    %427 = tpu.concatenate %426, %426, %426, %426 in 0 : vector<2x256xf32>, vector<2x256xf32>, vector<2x256xf32>, vector<2x256xf32> -> vector<8x256xf32>
    %c16_165 = arith.constant 16 : index
    %c0_166 = arith.constant 0 : index
    %c0_167 = arith.constant 0 : index
    %428 = vector.load %arg5[%c16_165, %c0_166, %c0_167] : memref<36x8x1xf32, #tpu.memory_space<vmem>>, vector<1x8x1xf32>
    %429 = vector.shape_cast %428 : vector<1x8x1xf32> to vector<8x1xf32>
    %430 = vector.broadcast %429 : vector<8x1xf32> to vector<8x256xf32>
    %431 = arith.mulf %430, %427 : vector<8x256xf32>
    %432 = arith.addf %404, %431 : vector<8x256xf32>
    %433 = vector.extract_strided_slice %297 {offsets = [2, 0], sizes = [2, 256], strides = [1, 1]} : vector<8x256xf32> to vector<2x256xf32>
    %434 = tpu.concatenate %433, %433, %433, %433 in 0 : vector<2x256xf32>, vector<2x256xf32>, vector<2x256xf32>, vector<2x256xf32> -> vector<8x256xf32>
    %c17_168 = arith.constant 17 : index
    %c0_169 = arith.constant 0 : index
    %c0_170 = arith.constant 0 : index
    %435 = vector.load %arg5[%c17_168, %c0_169, %c0_170] : memref<36x8x1xf32, #tpu.memory_space<vmem>>, vector<1x8x1xf32>
    %436 = vector.shape_cast %435 : vector<1x8x1xf32> to vector<8x1xf32>
    %437 = vector.broadcast %436 : vector<8x1xf32> to vector<8x256xf32>
    %438 = arith.mulf %437, %434 : vector<8x256xf32>
    %439 = arith.addf %411, %438 : vector<8x256xf32>
    %440 = vector.extract_strided_slice %297 {offsets = [4, 0], sizes = [2, 256], strides = [1, 1]} : vector<8x256xf32> to vector<2x256xf32>
    %441 = tpu.concatenate %440, %440, %440, %440 in 0 : vector<2x256xf32>, vector<2x256xf32>, vector<2x256xf32>, vector<2x256xf32> -> vector<8x256xf32>
    %c18_171 = arith.constant 18 : index
    %c0_172 = arith.constant 0 : index
    %c0_173 = arith.constant 0 : index
    %442 = vector.load %arg5[%c18_171, %c0_172, %c0_173] : memref<36x8x1xf32, #tpu.memory_space<vmem>>, vector<1x8x1xf32>
    %443 = vector.shape_cast %442 : vector<1x8x1xf32> to vector<8x1xf32>
    %444 = vector.broadcast %443 : vector<8x1xf32> to vector<8x256xf32>
    %445 = arith.mulf %444, %441 : vector<8x256xf32>
    %446 = arith.addf %418, %445 : vector<8x256xf32>
    %447 = vector.extract_strided_slice %297 {offsets = [6, 0], sizes = [2, 256], strides = [1, 1]} : vector<8x256xf32> to vector<2x256xf32>
    %448 = tpu.concatenate %447, %447, %447, %447 in 0 : vector<2x256xf32>, vector<2x256xf32>, vector<2x256xf32>, vector<2x256xf32> -> vector<8x256xf32>
    %c19_174 = arith.constant 19 : index
    %c0_175 = arith.constant 0 : index
    %c0_176 = arith.constant 0 : index
    %449 = vector.load %arg5[%c19_174, %c0_175, %c0_176] : memref<36x8x1xf32, #tpu.memory_space<vmem>>, vector<1x8x1xf32>
    %450 = vector.shape_cast %449 : vector<1x8x1xf32> to vector<8x1xf32>
    %451 = vector.broadcast %450 : vector<8x1xf32> to vector<8x256xf32>
    %452 = arith.mulf %451, %448 : vector<8x256xf32>
    %453 = arith.addf %425, %452 : vector<8x256xf32>
    %c255_i32_177 = arith.constant 255 : i32
    %454 = tpu.dynamic_rotate %297 by %c255_i32_177 dim 1 : vector<8x256xf32>, i32 -> vector<8x256xf32>
    %c5_178 = arith.constant 5 : index
    %c0_179 = arith.constant 0 : index
    %c0_180 = arith.constant 0 : index
    %455 = vector.load %arg2[%c5_178, %c0_179, %c0_180] : memref<9x1x256xf32, #tpu.memory_space<vmem>>, vector<1x1x256xf32>
    %456 = vector.shape_cast %455 : vector<1x1x256xf32> to vector<1x256xf32>
    %457 = vector.broadcast %456 : vector<1x256xf32> to vector<8x256xf32>
    %458 = arith.mulf %454, %457 : vector<8x256xf32>
    %459 = vector.extract_strided_slice %458 {offsets = [0, 0], sizes = [2, 256], strides = [1, 1]} : vector<8x256xf32> to vector<2x256xf32>
    %460 = tpu.concatenate %459, %459, %459, %459 in 0 : vector<2x256xf32>, vector<2x256xf32>, vector<2x256xf32>, vector<2x256xf32> -> vector<8x256xf32>
    %c20_181 = arith.constant 20 : index
    %c0_182 = arith.constant 0 : index
    %c0_183 = arith.constant 0 : index
    %461 = vector.load %arg5[%c20_181, %c0_182, %c0_183] : memref<36x8x1xf32, #tpu.memory_space<vmem>>, vector<1x8x1xf32>
    %462 = vector.shape_cast %461 : vector<1x8x1xf32> to vector<8x1xf32>
    %463 = vector.broadcast %462 : vector<8x1xf32> to vector<8x256xf32>
    %464 = arith.mulf %463, %460 : vector<8x256xf32>
    %465 = arith.addf %432, %464 : vector<8x256xf32>
    %466 = vector.extract_strided_slice %458 {offsets = [2, 0], sizes = [2, 256], strides = [1, 1]} : vector<8x256xf32> to vector<2x256xf32>
    %467 = tpu.concatenate %466, %466, %466, %466 in 0 : vector<2x256xf32>, vector<2x256xf32>, vector<2x256xf32>, vector<2x256xf32> -> vector<8x256xf32>
    %c21_184 = arith.constant 21 : index
    %c0_185 = arith.constant 0 : index
    %c0_186 = arith.constant 0 : index
    %468 = vector.load %arg5[%c21_184, %c0_185, %c0_186] : memref<36x8x1xf32, #tpu.memory_space<vmem>>, vector<1x8x1xf32>
    %469 = vector.shape_cast %468 : vector<1x8x1xf32> to vector<8x1xf32>
    %470 = vector.broadcast %469 : vector<8x1xf32> to vector<8x256xf32>
    %471 = arith.mulf %470, %467 : vector<8x256xf32>
    %472 = arith.addf %439, %471 : vector<8x256xf32>
    %473 = vector.extract_strided_slice %458 {offsets = [4, 0], sizes = [2, 256], strides = [1, 1]} : vector<8x256xf32> to vector<2x256xf32>
    %474 = tpu.concatenate %473, %473, %473, %473 in 0 : vector<2x256xf32>, vector<2x256xf32>, vector<2x256xf32>, vector<2x256xf32> -> vector<8x256xf32>
    %c22_187 = arith.constant 22 : index
    %c0_188 = arith.constant 0 : index
    %c0_189 = arith.constant 0 : index
    %475 = vector.load %arg5[%c22_187, %c0_188, %c0_189] : memref<36x8x1xf32, #tpu.memory_space<vmem>>, vector<1x8x1xf32>
    %476 = vector.shape_cast %475 : vector<1x8x1xf32> to vector<8x1xf32>
    %477 = vector.broadcast %476 : vector<8x1xf32> to vector<8x256xf32>
    %478 = arith.mulf %477, %474 : vector<8x256xf32>
    %479 = arith.addf %446, %478 : vector<8x256xf32>
    %480 = vector.extract_strided_slice %458 {offsets = [6, 0], sizes = [2, 256], strides = [1, 1]} : vector<8x256xf32> to vector<2x256xf32>
    %481 = tpu.concatenate %480, %480, %480, %480 in 0 : vector<2x256xf32>, vector<2x256xf32>, vector<2x256xf32>, vector<2x256xf32> -> vector<8x256xf32>
    %c23_190 = arith.constant 23 : index
    %c0_191 = arith.constant 0 : index
    %c0_192 = arith.constant 0 : index
    %482 = vector.load %arg5[%c23_190, %c0_191, %c0_192] : memref<36x8x1xf32, #tpu.memory_space<vmem>>, vector<1x8x1xf32>
    %483 = vector.shape_cast %482 : vector<1x8x1xf32> to vector<8x1xf32>
    %484 = vector.broadcast %483 : vector<8x1xf32> to vector<8x256xf32>
    %485 = arith.mulf %484, %481 : vector<8x256xf32>
    %486 = arith.addf %453, %485 : vector<8x256xf32>
    %c241_i32_193 = arith.constant 241 : i32
    %487 = tpu.dynamic_rotate %297 by %c241_i32_193 dim 1 : vector<8x256xf32>, i32 -> vector<8x256xf32>
    %c6_194 = arith.constant 6 : index
    %c0_195 = arith.constant 0 : index
    %c0_196 = arith.constant 0 : index
    %488 = vector.load %arg2[%c6_194, %c0_195, %c0_196] : memref<9x1x256xf32, #tpu.memory_space<vmem>>, vector<1x1x256xf32>
    %489 = vector.shape_cast %488 : vector<1x1x256xf32> to vector<1x256xf32>
    %490 = vector.broadcast %489 : vector<1x256xf32> to vector<8x256xf32>
    %491 = arith.mulf %487, %490 : vector<8x256xf32>
    %492 = vector.extract_strided_slice %491 {offsets = [0, 0], sizes = [2, 256], strides = [1, 1]} : vector<8x256xf32> to vector<2x256xf32>
    %493 = tpu.concatenate %492, %492, %492, %492 in 0 : vector<2x256xf32>, vector<2x256xf32>, vector<2x256xf32>, vector<2x256xf32> -> vector<8x256xf32>
    %c24_197 = arith.constant 24 : index
    %c0_198 = arith.constant 0 : index
    %c0_199 = arith.constant 0 : index
    %494 = vector.load %arg5[%c24_197, %c0_198, %c0_199] : memref<36x8x1xf32, #tpu.memory_space<vmem>>, vector<1x8x1xf32>
    %495 = vector.shape_cast %494 : vector<1x8x1xf32> to vector<8x1xf32>
    %496 = vector.broadcast %495 : vector<8x1xf32> to vector<8x256xf32>
    %497 = arith.mulf %496, %493 : vector<8x256xf32>
    %498 = arith.addf %465, %497 : vector<8x256xf32>
    %499 = vector.extract_strided_slice %491 {offsets = [2, 0], sizes = [2, 256], strides = [1, 1]} : vector<8x256xf32> to vector<2x256xf32>
    %500 = tpu.concatenate %499, %499, %499, %499 in 0 : vector<2x256xf32>, vector<2x256xf32>, vector<2x256xf32>, vector<2x256xf32> -> vector<8x256xf32>
    %c25_200 = arith.constant 25 : index
    %c0_201 = arith.constant 0 : index
    %c0_202 = arith.constant 0 : index
    %501 = vector.load %arg5[%c25_200, %c0_201, %c0_202] : memref<36x8x1xf32, #tpu.memory_space<vmem>>, vector<1x8x1xf32>
    %502 = vector.shape_cast %501 : vector<1x8x1xf32> to vector<8x1xf32>
    %503 = vector.broadcast %502 : vector<8x1xf32> to vector<8x256xf32>
    %504 = arith.mulf %503, %500 : vector<8x256xf32>
    %505 = arith.addf %472, %504 : vector<8x256xf32>
    %506 = vector.extract_strided_slice %491 {offsets = [4, 0], sizes = [2, 256], strides = [1, 1]} : vector<8x256xf32> to vector<2x256xf32>
    %507 = tpu.concatenate %506, %506, %506, %506 in 0 : vector<2x256xf32>, vector<2x256xf32>, vector<2x256xf32>, vector<2x256xf32> -> vector<8x256xf32>
    %c26_203 = arith.constant 26 : index
    %c0_204 = arith.constant 0 : index
    %c0_205 = arith.constant 0 : index
    %508 = vector.load %arg5[%c26_203, %c0_204, %c0_205] : memref<36x8x1xf32, #tpu.memory_space<vmem>>, vector<1x8x1xf32>
    %509 = vector.shape_cast %508 : vector<1x8x1xf32> to vector<8x1xf32>
    %510 = vector.broadcast %509 : vector<8x1xf32> to vector<8x256xf32>
    %511 = arith.mulf %510, %507 : vector<8x256xf32>
    %512 = arith.addf %479, %511 : vector<8x256xf32>
    %513 = vector.extract_strided_slice %491 {offsets = [6, 0], sizes = [2, 256], strides = [1, 1]} : vector<8x256xf32> to vector<2x256xf32>
    %514 = tpu.concatenate %513, %513, %513, %513 in 0 : vector<2x256xf32>, vector<2x256xf32>, vector<2x256xf32>, vector<2x256xf32> -> vector<8x256xf32>
    %c27_206 = arith.constant 27 : index
    %c0_207 = arith.constant 0 : index
    %c0_208 = arith.constant 0 : index
    %515 = vector.load %arg5[%c27_206, %c0_207, %c0_208] : memref<36x8x1xf32, #tpu.memory_space<vmem>>, vector<1x8x1xf32>
    %516 = vector.shape_cast %515 : vector<1x8x1xf32> to vector<8x1xf32>
    %517 = vector.broadcast %516 : vector<8x1xf32> to vector<8x256xf32>
    %518 = arith.mulf %517, %514 : vector<8x256xf32>
    %519 = arith.addf %486, %518 : vector<8x256xf32>
    %c240_i32_209 = arith.constant 240 : i32
    %520 = tpu.dynamic_rotate %297 by %c240_i32_209 dim 1 : vector<8x256xf32>, i32 -> vector<8x256xf32>
    %c7_210 = arith.constant 7 : index
    %c0_211 = arith.constant 0 : index
    %c0_212 = arith.constant 0 : index
    %521 = vector.load %arg2[%c7_210, %c0_211, %c0_212] : memref<9x1x256xf32, #tpu.memory_space<vmem>>, vector<1x1x256xf32>
    %522 = vector.shape_cast %521 : vector<1x1x256xf32> to vector<1x256xf32>
    %523 = vector.broadcast %522 : vector<1x256xf32> to vector<8x256xf32>
    %524 = arith.mulf %520, %523 : vector<8x256xf32>
    %525 = vector.extract_strided_slice %524 {offsets = [0, 0], sizes = [2, 256], strides = [1, 1]} : vector<8x256xf32> to vector<2x256xf32>
    %526 = tpu.concatenate %525, %525, %525, %525 in 0 : vector<2x256xf32>, vector<2x256xf32>, vector<2x256xf32>, vector<2x256xf32> -> vector<8x256xf32>
    %c28_213 = arith.constant 28 : index
    %c0_214 = arith.constant 0 : index
    %c0_215 = arith.constant 0 : index
    %527 = vector.load %arg5[%c28_213, %c0_214, %c0_215] : memref<36x8x1xf32, #tpu.memory_space<vmem>>, vector<1x8x1xf32>
    %528 = vector.shape_cast %527 : vector<1x8x1xf32> to vector<8x1xf32>
    %529 = vector.broadcast %528 : vector<8x1xf32> to vector<8x256xf32>
    %530 = arith.mulf %529, %526 : vector<8x256xf32>
    %531 = arith.addf %498, %530 : vector<8x256xf32>
    %532 = vector.extract_strided_slice %524 {offsets = [2, 0], sizes = [2, 256], strides = [1, 1]} : vector<8x256xf32> to vector<2x256xf32>
    %533 = tpu.concatenate %532, %532, %532, %532 in 0 : vector<2x256xf32>, vector<2x256xf32>, vector<2x256xf32>, vector<2x256xf32> -> vector<8x256xf32>
    %c29_216 = arith.constant 29 : index
    %c0_217 = arith.constant 0 : index
    %c0_218 = arith.constant 0 : index
    %534 = vector.load %arg5[%c29_216, %c0_217, %c0_218] : memref<36x8x1xf32, #tpu.memory_space<vmem>>, vector<1x8x1xf32>
    %535 = vector.shape_cast %534 : vector<1x8x1xf32> to vector<8x1xf32>
    %536 = vector.broadcast %535 : vector<8x1xf32> to vector<8x256xf32>
    %537 = arith.mulf %536, %533 : vector<8x256xf32>
    %538 = arith.addf %505, %537 : vector<8x256xf32>
    %539 = vector.extract_strided_slice %524 {offsets = [4, 0], sizes = [2, 256], strides = [1, 1]} : vector<8x256xf32> to vector<2x256xf32>
    %540 = tpu.concatenate %539, %539, %539, %539 in 0 : vector<2x256xf32>, vector<2x256xf32>, vector<2x256xf32>, vector<2x256xf32> -> vector<8x256xf32>
    %c30_219 = arith.constant 30 : index
    %c0_220 = arith.constant 0 : index
    %c0_221 = arith.constant 0 : index
    %541 = vector.load %arg5[%c30_219, %c0_220, %c0_221] : memref<36x8x1xf32, #tpu.memory_space<vmem>>, vector<1x8x1xf32>
    %542 = vector.shape_cast %541 : vector<1x8x1xf32> to vector<8x1xf32>
    %543 = vector.broadcast %542 : vector<8x1xf32> to vector<8x256xf32>
    %544 = arith.mulf %543, %540 : vector<8x256xf32>
    %545 = arith.addf %512, %544 : vector<8x256xf32>
    %546 = vector.extract_strided_slice %524 {offsets = [6, 0], sizes = [2, 256], strides = [1, 1]} : vector<8x256xf32> to vector<2x256xf32>
    %547 = tpu.concatenate %546, %546, %546, %546 in 0 : vector<2x256xf32>, vector<2x256xf32>, vector<2x256xf32>, vector<2x256xf32> -> vector<8x256xf32>
    %c31_222 = arith.constant 31 : index
    %c0_223 = arith.constant 0 : index
    %c0_224 = arith.constant 0 : index
    %548 = vector.load %arg5[%c31_222, %c0_223, %c0_224] : memref<36x8x1xf32, #tpu.memory_space<vmem>>, vector<1x8x1xf32>
    %549 = vector.shape_cast %548 : vector<1x8x1xf32> to vector<8x1xf32>
    %550 = vector.broadcast %549 : vector<8x1xf32> to vector<8x256xf32>
    %551 = arith.mulf %550, %547 : vector<8x256xf32>
    %552 = arith.addf %519, %551 : vector<8x256xf32>
    %c239_i32_225 = arith.constant 239 : i32
    %553 = tpu.dynamic_rotate %297 by %c239_i32_225 dim 1 : vector<8x256xf32>, i32 -> vector<8x256xf32>
    %c8_226 = arith.constant 8 : index
    %c0_227 = arith.constant 0 : index
    %c0_228 = arith.constant 0 : index
    %554 = vector.load %arg2[%c8_226, %c0_227, %c0_228] : memref<9x1x256xf32, #tpu.memory_space<vmem>>, vector<1x1x256xf32>
    %555 = vector.shape_cast %554 : vector<1x1x256xf32> to vector<1x256xf32>
    %556 = vector.broadcast %555 : vector<1x256xf32> to vector<8x256xf32>
    %557 = arith.mulf %553, %556 : vector<8x256xf32>
    %558 = vector.extract_strided_slice %557 {offsets = [0, 0], sizes = [2, 256], strides = [1, 1]} : vector<8x256xf32> to vector<2x256xf32>
    %559 = tpu.concatenate %558, %558, %558, %558 in 0 : vector<2x256xf32>, vector<2x256xf32>, vector<2x256xf32>, vector<2x256xf32> -> vector<8x256xf32>
    %c32_229 = arith.constant 32 : index
    %c0_230 = arith.constant 0 : index
    %c0_231 = arith.constant 0 : index
    %560 = vector.load %arg5[%c32_229, %c0_230, %c0_231] : memref<36x8x1xf32, #tpu.memory_space<vmem>>, vector<1x8x1xf32>
    %561 = vector.shape_cast %560 : vector<1x8x1xf32> to vector<8x1xf32>
    %562 = vector.broadcast %561 : vector<8x1xf32> to vector<8x256xf32>
    %563 = arith.mulf %562, %559 : vector<8x256xf32>
    %564 = arith.addf %531, %563 : vector<8x256xf32>
    %565 = vector.extract_strided_slice %557 {offsets = [2, 0], sizes = [2, 256], strides = [1, 1]} : vector<8x256xf32> to vector<2x256xf32>
    %566 = tpu.concatenate %565, %565, %565, %565 in 0 : vector<2x256xf32>, vector<2x256xf32>, vector<2x256xf32>, vector<2x256xf32> -> vector<8x256xf32>
    %c33_232 = arith.constant 33 : index
    %c0_233 = arith.constant 0 : index
    %c0_234 = arith.constant 0 : index
    %567 = vector.load %arg5[%c33_232, %c0_233, %c0_234] : memref<36x8x1xf32, #tpu.memory_space<vmem>>, vector<1x8x1xf32>
    %568 = vector.shape_cast %567 : vector<1x8x1xf32> to vector<8x1xf32>
    %569 = vector.broadcast %568 : vector<8x1xf32> to vector<8x256xf32>
    %570 = arith.mulf %569, %566 : vector<8x256xf32>
    %571 = arith.addf %538, %570 : vector<8x256xf32>
    %572 = vector.extract_strided_slice %557 {offsets = [4, 0], sizes = [2, 256], strides = [1, 1]} : vector<8x256xf32> to vector<2x256xf32>
    %573 = tpu.concatenate %572, %572, %572, %572 in 0 : vector<2x256xf32>, vector<2x256xf32>, vector<2x256xf32>, vector<2x256xf32> -> vector<8x256xf32>
    %c34_235 = arith.constant 34 : index
    %c0_236 = arith.constant 0 : index
    %c0_237 = arith.constant 0 : index
    %574 = vector.load %arg5[%c34_235, %c0_236, %c0_237] : memref<36x8x1xf32, #tpu.memory_space<vmem>>, vector<1x8x1xf32>
    %575 = vector.shape_cast %574 : vector<1x8x1xf32> to vector<8x1xf32>
    %576 = vector.broadcast %575 : vector<8x1xf32> to vector<8x256xf32>
    %577 = arith.mulf %576, %573 : vector<8x256xf32>
    %578 = arith.addf %545, %577 : vector<8x256xf32>
    %579 = vector.extract_strided_slice %557 {offsets = [6, 0], sizes = [2, 256], strides = [1, 1]} : vector<8x256xf32> to vector<2x256xf32>
    %580 = tpu.concatenate %579, %579, %579, %579 in 0 : vector<2x256xf32>, vector<2x256xf32>, vector<2x256xf32>, vector<2x256xf32> -> vector<8x256xf32>
    %c35_238 = arith.constant 35 : index
    %c0_239 = arith.constant 0 : index
    %c0_240 = arith.constant 0 : index
    %581 = vector.load %arg5[%c35_238, %c0_239, %c0_240] : memref<36x8x1xf32, #tpu.memory_space<vmem>>, vector<1x8x1xf32>
    %582 = vector.shape_cast %581 : vector<1x8x1xf32> to vector<8x1xf32>
    %583 = vector.broadcast %582 : vector<8x1xf32> to vector<8x256xf32>
    %584 = arith.mulf %583, %580 : vector<8x256xf32>
    %585 = arith.addf %552, %584 : vector<8x256xf32>
    %586 = arith.addf %564, %571 : vector<8x256xf32>
    %587 = arith.addf %586, %578 : vector<8x256xf32>
    %588 = arith.addf %587, %585 : vector<8x256xf32>
    %c0_241 = arith.constant 0 : index
    %c0_242 = arith.constant 0 : index
    %589 = vector.load %arg6[%c0_241, %c0_242] : memref<8x1xf32, #tpu.memory_space<vmem>>, vector<8x1xf32>
    %590 = vector.broadcast %589 : vector<8x1xf32> to vector<8x256xf32>
    %591 = arith.addf %588, %590 : vector<8x256xf32>
    %592 = arith.addf %591, %1 : vector<8x256xf32>
    %cst_243 = arith.constant 0.000000e+00 : f32
    %593 = vector.broadcast %cst_243 : f32 to vector<8x256xf32>
    %594 = arith.maximumf %592, %593 : vector<8x256xf32>
    %c0_244 = arith.constant 0 : index
    %c0_245 = arith.constant 0 : index
    %c0_246 = arith.constant 0 : index
    %595 = vector.load %arg7[%c0_244, %c0_245, %c0_246] : memref<1x8x256xf32, #tpu.memory_space<vmem>>, vector<1x8x256xf32>
    %596 = vector.shape_cast %595 : vector<1x8x256xf32> to vector<8x256xf32>
    %597 = vector.shape_cast %594 : vector<8x256xf32> to vector<1x8x256xf32>
    tpu.vector_store %arg7[%c0_244, %c0_245, %c0_246], %597 {strides = array<i32>} : memref<1x8x256xf32, #tpu.memory_space<vmem>>, vector<1x8x256xf32>,
    return
  }
  func.func @transform_0(%arg0: i32) -> (i32, i32, i32) {
    %c0_i32 = arith.constant 0 : i32
    %c0_i32_0 = arith.constant 0 : i32
    %c0_i32_1 = arith.constant 0 : i32
    return %arg0, %c0_i32, %c0_i32_0 : i32, i32, i32
  }
  func.func @transform_1(%arg0: i32) -> (i32, i32, i32) {
    %c0_i32 = arith.constant 0 : i32
    %c0_i32_0 = arith.constant 0 : i32
    %c0_i32_1 = arith.constant 0 : i32
    %c0_i32_2 = arith.constant 0 : i32
    return %c0_i32, %c0_i32_0, %c0_i32_1 : i32, i32, i32
  }
  func.func @transform_2(%arg0: i32) -> (i32, i32, i32) {
    %c0_i32 = arith.constant 0 : i32
    %c0_i32_0 = arith.constant 0 : i32
    %c0_i32_1 = arith.constant 0 : i32
    %c0_i32_2 = arith.constant 0 : i32
    return %c0_i32, %c0_i32_0, %c0_i32_1 : i32, i32, i32
  }
  func.func @transform_3(%arg0: i32) -> (i32, i32) {
    %c0_i32 = arith.constant 0 : i32
    %c0_i32_0 = arith.constant 0 : i32
    %c0_i32_1 = arith.constant 0 : i32
    return %c0_i32, %c0_i32_0 : i32, i32
  }
  func.func @transform_4(%arg0: i32) -> (i32, i32, i32) {
    %c0_i32 = arith.constant 0 : i32
    %c0_i32_0 = arith.constant 0 : i32
    %c0_i32_1 = arith.constant 0 : i32
    %c0_i32_2 = arith.constant 0 : i32
    return %c0_i32, %c0_i32_0, %c0_i32_1 : i32, i32, i32
  }
  func.func @transform_5(%arg0: i32) -> (i32, i32) {
    %c0_i32 = arith.constant 0 : i32
    %c0_i32_0 = arith.constant 0 : i32
    %c0_i32_1 = arith.constant 0 : i32
    return %c0_i32, %c0_i32_0 : i32, i32
  }
  func.func @transform_6(%arg0: i32) -> (i32, i32, i32) {
    %c0_i32 = arith.constant 0 : i32
    %c0_i32_0 = arith.constant 0 : i32
    %c0_i32_1 = arith.constant 0 : i32
    return %arg0, %c0_i32, %c0_i32_0 : i32, i32, i32
  }
}

</mosaic_0001>

<bundles_post_ra>
// kernel: identity_block2_forward.1
= control target key start
LH: loop header
LB: loop body
LE: loop exit
PB: predicated region body
PF: predicated region fallthrough
CT: control target
= control target key end

     0   :  { %v1857_v0 = vmov 0   ;;  %s1858_s25 = smov 17   ;;  %s1859_s10 = smov 16   ;;  %v29_v47 = vlaneseq  ;;  %vm62_vm1 = vcmask 1041408   ;;  %vm65_vm2 = vcmask 1043456   ;;  %s3735_s2 = inlined_call_operand.vmem [shape: f32[36,8,1], index: 2, kind: input, shape index: {}]   ;;  %s3736_s0 = inlined_call_operand.vmem [shape: f32[1,8,256], index: 0, kind: input, shape index: {}]   ;;  %s3737_s3 = inlined_call_operand.vmem [shape: f32[8,1], index: 3, kind: input, shape index: {}]   ;;  %s3738_s4 = inlined_call_operand.vmem [shape: f32[36,8,1], index: 4, kind: input, shape index: {}]   ;;  %s3739_s1 = inlined_call_operand.vmem [shape: f32[9,1,256], index: 1, kind: input, shape index: {}]   ;;  %s3740_s5 = inlined_call_operand.vmem [shape: f32[8,1], index: 5, kind: input, shape index: {}]   ;;  %s3741_s6 = inlined_call_operand.vmem [shape: f32[1,8,256], index: 6, kind: output, shape index: {}]  }
   0x1   :  { %1853 = vset.pattern.permute.xlu1 %v1857_v0  ;;  %v71_v1 = vld [vmem:[%s3735_s2] sm:$0xff]  ;;  %1854 = vset.pattern.permute.xlu0 %v1857_v0  ;;  %v1767_v3 = vld [vmem:[%s3735_s2 + $0x8] sm:$0xff]  ;;  %v1769_v5 = vld [vmem:[%s3735_s2 + $0x18] sm:$0xff]  ;;  %s1860_s19 = smov 15   ;;  %s1861_s29 = smov 1   ;;  %vm68_vm3 = vcmask 1045504  }
   0x2   :  { %v1907_v2 = vld [vmem:[%s3736_s0] sm:$0xff]  ;;  %74 = vperm.xlu1 %1853, %v71_v1   ;;  %v1917_v4 = vld [vmem:[%s3736_s0 + $0x8] sm:$0xff]  ;;  %v1768_v6 = vld [vmem:[%s3735_s2 + $0x10] sm:$0xff]  ;;  %s1862_s24 = smov 127   ;;  %s1863_s12 = smov 113   ;;  %v37_v51 = vshrl.u32 %v29_v47, 7 }
   0x3   :  { %25 = vrot.lane.b32.xlu0 %v1907_v2, %s1858_s25  ;;  %v1771_v7 = vld [vmem:[%s3735_s2 + $0x20] sm:$0xff]  ;;  %v1772_v8 = vld [vmem:[%s3735_s2 + $0x28] sm:$0xff]  ;;  %v1773_v9 = vld [vmem:[%s3735_s2 + $0x30] sm:$0xff]  ;;  %s1864_s22 = smov 112   ;;  %s1865_s11 = smov 111   ;;  %v2087_v54 = vand.u32 127, %v29_v47 }
   0x4   :  { %v1774_v10 = vld [vmem:[%s3735_s2 + $0x38] sm:$0xff]  ;;  %v1776_v11 = vld [vmem:[%s3735_s2 + $0x40] sm:$0xff]  ;;  %v1777_v12 = vld [vmem:[%s3735_s2 + $0x48] sm:$0xff]  ;;  %v2089_v55 = vsub.s32 0, %v37_v51  ;;  %v2091_v56 = vsub.s32 1, %v37_v51  ;;  %v2106_v62 = vrot.slane %v1917_v4, 6 }
   0x5   :  { %v1778_v13 = vld [vmem:[%s3735_s2 + $0x50] sm:$0xff]  ;;  %v1779_v14 = vld [vmem:[%s3735_s2 + $0x58] sm:$0xff]  ;;  %v1781_v15 = vld [vmem:[%s3735_s2 + $0x60] sm:$0xff]  ;;  %vm31_vm0 = vcmp.lt.s32.totalorder %v2087_v54, 17  ;;  %v2109_v63 = vrot.slane %v1907_v2, 6  ;;  %vm128_vm4 = vcmp.lt.s32.totalorder %v2087_v54, 16 }
   0x6   :  { %89 = vperm.xlu1 %1853, %v1767_v3   ;;  %v1782_v16 = vld [vmem:[%s3735_s2 + $0x68] sm:$0xff]  ;;  %v1783_v17 = vld [vmem:[%s3735_s2 + $0x70] sm:$0xff]  ;;  %v1784_v18 = vld [vmem:[%s3735_s2 + $0x78] sm:$0xff]  ;;  %vm232_vm5 = vcmp.lt.s32.totalorder %v2087_v54, 15  ;;  %vm336_vm6 = vcmp.lt.s32.totalorder %v2087_v54, 1  ;;  %vm522_vm7 = vcmp.lt.s32.totalorder %v2087_v54, 127 }
   0x7   :  { %27 = vrot.lane.b32.xlu0 %v1917_v4, %s1858_s25  ;;  %v1785_v19 = vld [vmem:[%s3735_s2 + $0x80] sm:$0xff]  ;;  %v1786_v20 = vld [vmem:[%s3735_s2 + $0x88] sm:$0xff]  ;;  %v1787_v21 = vld [vmem:[%s3735_s2 + $0x90] sm:$0xff]  ;;  %vm626_vm8 = vcmp.lt.s32.totalorder %v2087_v54, 113  ;;  %vm730_vm9 = vcmp.lt.s32.totalorder %v2087_v54, 112  ;;  %vm834_vm10 = vcmp.lt.s32.totalorder %v2087_v54, 111 }
   0x8   :  { %v1788_v22 = vld [vmem:[%s3735_s2 + $0x98] sm:$0xff]  ;;  %v1790_v23 = vld [vmem:[%s3735_s2 + $0xa0] sm:$0xff]  ;;  %v1791_v24 = vld [vmem:[%s3735_s2 + $0xa8] sm:$0xff] }
   0x9   :  { %v1792_v25 = vld [vmem:[%s3735_s2 + $0xb0] sm:$0xff]  ;;  %v1793_v26 = vld [vmem:[%s3735_s2 + $0xb8] sm:$0xff]  ;;  %v1795_v27 = vld [vmem:[%s3735_s2 + $0xc0] sm:$0xff] }
   0xa   :  { %119 = vperm.xlu1 %1853, %v1769_v5   ;;  %v1796_v28 = vld [vmem:[%s3735_s2 + $0xc8] sm:$0xff]  ;;  %v1797_v29 = vld [vmem:[%s3735_s2 + $0xd0] sm:$0xff]  ;;  %v1798_v30 = vld [vmem:[%s3735_s2 + $0xd8] sm:$0xff] }
   0xb   :  { %104 = vperm.xlu0 %1854, %v1768_v6   ;;  %v1800_v31 = vld [vmem:[%s3735_s2 + $0xe0] sm:$0xff]  ;;  %v1801_v32 = vld [vmem:[%s3735_s2 + $0xe8] sm:$0xff]  ;;  %v1802_v33 = vld [vmem:[%s3735_s2 + $0xf0] sm:$0xff] }
   0xc   :  { %v1803_v34 = vld [vmem:[%s3735_s2 + $0xf8] sm:$0xff]  ;;  %v1805_v35 = vld [vmem:[%s3735_s2 + $0x100] sm:$0xff]  ;;  %v1806_v36 = vld [vmem:[%s3735_s2 + $0x108] sm:$0xff] }
   0xd   :  { %v1807_v37 = vld [vmem:[%s3735_s2 + $0x110] sm:$0xff]  ;;  %v1808_v38 = vld [vmem:[%s3735_s2 + $0x118] sm:$0xff]  ;;  %v940_v39 = vld [vmem:[%s3737_s3] sm:$0xff] }
   0xe   :  { %124 = vrot.lane.b32.xlu1 %v1907_v2, %s1859_s10  ;;  %v978_v40 = vld [vmem:[%s3738_s4] sm:$0xff]  ;;  %v1809_v41 = vld [vmem:[%s3738_s4 + $0x8] sm:$0xff]  ;;  %v1810_v42 = vld [vmem:[%s3738_s4 + $0x10] sm:$0xff] }
   0xf   :  { %126 = vrot.lane.b32.xlu0 %v1917_v4, %s1859_s10  ;;  %v1811_v43 = vld [vmem:[%s3738_s4 + $0x18] sm:$0xff]  ;;  %v1812_v44 = vld [vmem:[%s3738_s4 + $0x20] sm:$0xff]  ;;  %v1813_v45 = vld [vmem:[%s3738_s4 + $0x28] sm:$0xff] }
  0x10   :  { %v1814_v46 = vld [vmem:[%s3738_s4 + $0x30] sm:$0xff]  ;;  %v1815_v48 = vld [vmem:[%s3738_s4 + $0x38] sm:$0xff]  ;;  %v1816_v49 = vld [vmem:[%s3738_s4 + $0x40] sm:$0xff] }
  0x11   :  { %v1817_v52 = vld [vmem:[%s3738_s4 + $0x48] sm:$0xff]  ;;  %v1818_v53 = vld [vmem:[%s3738_s4 + $0x50] sm:$0xff]  ;;  %v34_v57 = vld [vmem:[%s3739_s1] sm:$0x3] }
  0x12   :  { %170 = vperm.xlu1 %1853, %v1771_v7   ;;  %v1819_v58 = vld [vmem:[%s3738_s4 + $0x58] sm:$0xff]  ;;  %v1820_v59 = vld [vmem:[%s3738_s4 + $0x60] sm:$0xff]  ;;  %v2112_v0 = vrot.slane %v34_v57, %v2089_v55  ;;  %v2115_v1 = vrot.slane %v34_v57, %v2091_v56  ;;  %v1821_v6 = vld [vmem:[%s3738_s4 + $0x68] sm:$0xff] }
  0x13   :  { %187 = vperm.xlu0 %1854, %v1772_v8   ;;  %v1822_v7 = vld [vmem:[%s3738_s4 + $0x70] sm:$0xff]  ;;  %v1770_v8 = vld [vmem:[%s3739_s1 + $0x2] sm:$0x3] }
  0x14   :  { %3771 = vst [vmem:[#allocation2_spill] sm:$0xff] %v2112_v0  ;;  %3772 = vst [vmem:[#allocation3_spill] sm:$0xff] %v2115_v1 }
  0x16   :  { %204 = vperm.xlu1 %1853, %v1773_v9   ;;  %v1775_v9 = vld [vmem:[%s3739_s1 + $0x4] sm:$0x3] }
  0x17   :  { %221 = vperm.xlu0 %1854, %v1774_v10   ;;  %v443_v10 = vrot.slane %v1917_v4, 4 }
  0x1a   :  { %228 = vrot.lane.b32.xlu1 %v1907_v2, %s1860_s19 }
  0x1b   :  { %230 = vrot.lane.b32.xlu0 %v1917_v4, %s1860_s19 }
  0x1e   :  { %274 = vperm.xlu1 %1853, %v1776_v11   ;;  %v447_v11 = vrot.slane %v1917_v4, 2 }
  0x1f   :  { %291 = vperm.xlu0 %1854, %v1777_v12   ;;  %v442_v12 = vrot.slane %v1907_v2, 4 }
  0x22   :  { %308 = vperm.xlu1 %1853, %v1778_v13   ;;  %v446_v13 = vrot.slane %v1907_v2, 2 }
  0x23   :  { %325 = vperm.xlu0 %1854, %v1779_v14  }
  0x26   :  { %332 = vrot.lane.b32.xlu1 %v1907_v2, %s1861_s29 }
  0x27   :  { %334 = vrot.lane.b32.xlu0 %v1917_v4, %s1861_s29 }
  0x2a   :  { %378 = vperm.xlu1 %1853, %v1781_v15   ;;  %v451_v15 = vsel %vm62_vm1, %v1917_v4, %v2106_v62 }
  0x2b   :  { %395 = vperm.xlu0 %1854, %v1782_v16   ;;  %v450_v16 = vsel %vm62_vm1, %v1907_v2, %v2109_v63 }
  0x2e   :  { %412 = vperm.xlu1 %1853, %v1783_v17  }
  0x2f   :  { %429 = vperm.xlu0 %1854, %v1784_v18  }
  0x32   :  { %460 = vperm.xlu1 %1853, %v1785_v19   ;;  %v1823_v19 = vld [vmem:[%s3738_s4 + $0x78] sm:$0xff] }
  0x33   :  { %477 = vperm.xlu0 %1854, %v1786_v20   ;;  %v2156_v20 = vrot.slane %v1770_v8, %v2089_v55 }
  0x35   :  { %3773 = vst [vmem:[#allocation4_spill] sm:$0xff] %v2156_v20 }
  0x36   :  { %494 = vperm.xlu1 %1853, %v1787_v21   ;;  %v2159_v21 = vrot.slane %v1770_v8, %v2091_v56 }
  0x37   :  { %511 = vperm.xlu0 %1854, %v1788_v22   ;;  %v2162_v22 = vrot.slane %v1775_v9, %v2089_v55 }
  0x38   :  { %3774 = vst [vmem:[#allocation5_spill] sm:$0xff] %v2159_v21 }
  0x39   :  { %3775 = vst [vmem:[#allocation6_spill] sm:$0xff] %v2162_v22 }
  0x3a   :  { %518 = vrot.lane.b32.xlu1 %v1907_v2, %s1862_s24 }
  0x3b   :  { %520 = vrot.lane.b32.xlu0 %v1917_v4, %s1862_s24 }
  0x3e   :  { %564 = vperm.xlu1 %1853, %v1790_v23   ;;  %v2165_v23 = vrot.slane %v1775_v9, %v2091_v56 }
  0x3f   :  { %581 = vperm.xlu0 %1854, %v1791_v24   ;;  %v1780_v24 = vld [vmem:[%s3739_s1 + $0x6] sm:$0x3] }
  0x40   :  { %3776 = vst [vmem:[#allocation7_spill] sm:$0xff] %v2165_v23 }
  0x42   :  { %598 = vperm.xlu1 %1853, %v1792_v25   ;;  %v1824_v25 = vld [vmem:[%s3738_s4 + $0x80] sm:$0xff] }
  0x43   :  { %615 = vperm.xlu0 %1854, %v1793_v26   ;;  %v453_v26 = vsel %vm65_vm2, %v451_v15, %v443_v10 }
  0x46   :  { %622 = vrot.lane.b32.xlu1 %v1907_v2, %s1863_s12 }
  0x47   :  { %624 = vrot.lane.b32.xlu0 %v1917_v4, %s1863_s12 }
  0x4a   :  { %668 = vperm.xlu1 %1853, %v1795_v27   ;;  %v452_v27 = vsel %vm65_vm2, %v450_v16, %v442_v12 }
  0x4b   :  { %685 = vperm.xlu0 %1854, %v1796_v28   ;;  %v468_v28 = vsel %vm62_vm1, %v447_v11, %v1917_v4 }
  0x4e   :  { %702 = vperm.xlu1 %1853, %v1797_v29   ;;  %v467_v29 = vsel %vm62_vm1, %v446_v13, %v1907_v2 }
  0x4f   :  { %719 = vperm.xlu0 %1854, %v1798_v30  }
  0x52   :  { %726 = vrot.lane.b32.xlu1 %v1907_v2, %s1864_s22 }
  0x53   :  { %728 = vrot.lane.b32.xlu0 %v1917_v4, %s1864_s22 }
  0x56   :  { %772 = vperm.xlu1 %1853, %v1800_v31  }
  0x57   :  { %789 = vperm.xlu0 %1854, %v1801_v32   ;;  %v485_v32 = vsel %vm62_vm1, %v443_v10, %v447_v11 }
  0x5a   :  { %806 = vperm.xlu1 %1853, %v1802_v33   ;;  %v484_v33 = vsel %vm62_vm1, %v442_v12, %v446_v13 }
  0x5b   :  { %823 = vperm.xlu0 %1854, %v1803_v34   ;;  %v502_v34 = vsel %vm62_vm1, %v2106_v62, %v443_v10 }
  0x5c   :  { %v504_v47 = vsel %vm65_vm2, %v502_v34, %v447_v11 }
  0x5e   :  { %830 = vrot.lane.b32.xlu1 %v1907_v2, %s1865_s11 }
  0x5f   :  { %832 = vrot.lane.b32.xlu0 %v1917_v4, %s1865_s11 }
  0x62   :  { %876 = vperm.xlu1 %1853, %v1805_v35   ;;  %v501_v35 = vsel %vm62_vm1, %v2109_v63, %v442_v12 }
  0x63   :  { %893 = vperm.xlu0 %1854, %v1806_v36  }
  0x66   :  { %910 = vperm.xlu1 %1853, %v1807_v37  }
  0x67   :  { %927 = vperm.xlu0 %1854, %v1808_v38   ;;  %v2196_v38 = vrot.slane %v1780_v24, %v2089_v55 }
  0x69   :  { %3777 = vst [vmem:[#allocation8_spill] sm:$0xff] %v2196_v38 }
  0x6a   :  { %943 = vperm.xlu1 %1853, %v940_v39   ;;  %v2199_v39 = vrot.slane %v1780_v24, %v2091_v56 }
  0x6b   :  { %981 = vperm.xlu0 %1854, %v978_v40   ;;  %v1825_v40 = vld [vmem:[%s3738_s4 + $0x88] sm:$0xff] }
  0x6c   :  { %3778 = vst [vmem:[#allocation9_spill] sm:$0xff] %v2199_v39 }
  0x6e   :  { %996 = vperm.xlu1 %1853, %v1809_v41   ;;  %v2205_v41 = vsel %vm68_vm3, %v453_v26, %v447_v11  ;;  %v1794_v11 = vld [vmem:[%s3739_s1 + $0xc] sm:$0x3] }
  0x6f   :  { %1011 = vperm.xlu0 %1854, %v1810_v42   ;;  %v2208_v42 = vsel %vm68_vm3, %v452_v27, %v446_v13 }
  0x72   :  { %1026 = vperm.xlu1 %1853, %v1811_v43   ;;  %v470_v43 = vsel %vm65_vm2, %v468_v28, %v2106_v62  ;;  %v2292_v28 = vrot.slane %v1794_v11, %v2089_v55 }
  0x73   :  { %1063 = vperm.xlu0 %1854, %v1812_v44   ;;  %v469_v44 = vsel %vm65_vm2, %v467_v29, %v2109_v63  ;;  %v2295_v29 = vrot.slane %v1794_v11, %v2091_v56 }
  0x74   :  { %3779 = vst [vmem:[#allocation10_spill] sm:$0xff] %v2292_v28 }
  0x75   :  { %v26_v50 = vpop.permute.xlu0 %25  ;;  %3780 = vst [vmem:[#allocation11_spill] sm:$0xff] %v2295_v29 }
  0x76   :  { %1080 = vperm.xlu1 %1853, %v1813_v45   ;;  %v487_v45 = vsel %vm65_vm2, %v485_v32, %v1917_v4 }
  0x77   :  { %1097 = vperm.xlu0 %1854, %v1814_v46   ;;  %v486_v46 = vsel %vm65_vm2, %v484_v33, %v1907_v2  ;;  %v2245_v8 = vsel %vm68_vm3, %v487_v45, %v2106_v62 }
  0x78   :  { %v2249_v9 = vsel %vm68_vm3, %v486_v46, %v2109_v63 }
  0x79   :  { %v28_v60 = vpop.permute.xlu0 %27 }
  0x7a   :  { %1114 = vperm.xlu1 %1853, %v1815_v48   ;;  %v32_v3 = vsel %vm31_vm0, %v26_v50, %v28_v60  ;;  %v33_v5 = vsel %vm31_vm0, %v28_v60, %v26_v50  ;;  %v503_v48 = vsel %vm65_vm2, %v501_v35, %v446_v13  ;;  %v1799_v13 = vld [vmem:[%s3739_s1 + $0xe] sm:$0x3] }
  0x7b   :  { %1153 = vperm.xlu0 %1854, %v1816_v49   ;;  %v2146_v17 = vmul.f32 %v2112_v0, %v33_v5  ;;  %v2149_v18 = vmul.f32 %v2115_v1, %v32_v3  ;;  %v2302_v34 = vrot.slane %v1799_v13, %v2089_v55  ;;  %v2305_v35 = vrot.slane %v1799_v13, %v2091_v56 }
  0x7d   :  { %v2190_v36 = vrot.slane %v2146_v17, 6  ;;  %v2193_v37 = vrot.slane %v2149_v18, 6  ;;  %v54_v49 = vrot.slane %v2146_v17, 4  ;;  %v55_v50 = vrot.slane %v2149_v18, 4  ;;  %3781 = vst [vmem:[#allocation12_spill] sm:$0xff] %v2302_v34  ;;  %3782 = vst [vmem:[#allocation13_spill] sm:$0xff] %v2305_v35 }
  0x7e   :  { %1170 = vperm.xlu1 %1853, %v1817_v52   ;;  %v58_v51 = vrot.slane %v2146_v17, 2  ;;  %v59_v52 = vrot.slane %v2149_v18, 2 }
  0x7f   :  { %1187 = vperm.xlu0 %1854, %v1818_v53   ;;  %v64_v60 = vsel %vm62_vm1, %v2149_v18, %v2193_v37  ;;  %v109_v32 = vsel %vm62_vm1, %v2190_v36, %v54_v49  ;;  %v110_v33 = vsel %vm62_vm1, %v2193_v37, %v55_v50 }
  0x80   :  { %v67_v16 = vsel %vm65_vm2, %v64_v60, %v55_v50  ;;  %v79_v26 = vsel %vm62_vm1, %v58_v51, %v2146_v17  ;;  %v80_v27 = vsel %vm62_vm1, %v59_v52, %v2149_v18 }
  0x81   :  { %v2103_v61 = vpop.permute.xlu1 %74  ;;  %v81_v46 = vsel %vm65_vm2, %v79_v26, %v2190_v36 }
  0x82   :  { %1204 = vperm.xlu1 %1853, %v1819_v58   ;;  %v1789_v58 = vld [vmem:[%s3739_s1 + $0xa] sm:$0x3] }
  0x83   :  { %1243 = vperm.xlu0 %1854, %v1820_v59   ;;  %v63_v59 = vsel %vm62_vm1, %v2146_v17, %v2190_v36  ;;  %v2264_v62 = vrot.slane %v1789_v58, %v2089_v55  ;;  %v2267_v63 = vrot.slane %v1789_v58, %v2091_v56 }
  0x84   :  { %v66_v15 = vsel %vm65_vm2, %v63_v59, %v54_v49  ;;  %v112_v59 = vsel %vm65_vm2, %v110_v33, %v59_v52 }
  0x85   :  { %v2137_v14 = vpop.permute.xlu1 %89 }
  0x86   :  { %1260 = vperm.xlu1 %1853, %v1821_v6   ;;  %v2238_v6 = vsel %vm68_vm3, %v470_v43, %v443_v10  ;;  %v2257_v10 = vsel %vm68_vm3, %v504_v47, %v1917_v4  ;;  %v70_v43 = vsel %vm68_vm3, %v67_v16, %v59_v52  ;;  %v82_v47 = vsel %vm65_vm2, %v80_v27, %v2193_v37 }
  0x87   :  { %1277 = vperm.xlu0 %1854, %v1822_v7   ;;  %v2241_v7 = vsel %vm68_vm3, %v469_v44, %v442_v12  ;;  %v2261_v12 = vsel %vm68_vm3, %v503_v48, %v1907_v2  ;;  %v2337_v16 = vmul.f32 %v2103_v61, %v70_v43  ;;  %v84_v26 = vsel %vm68_vm3, %v82_v47, %v55_v50 }
  0x89   :  { %v2179_v30 = vpop.permute.xlu1 %119 }
  0x8a   :  { %v2181_v31 = vpop.permute.xlu0 %104  ;;  %1294 = vperm.xlu1 %1853, %v1823_v19  }
  0x8b   :  { %1325 = vperm.xlu0 %1854, %v1824_v25   ;;  %v1804_v25 = vld [vmem:[%s3739_s1 + $0x10] sm:$0x3] }
  0x8c   :  { %v2310_v44 = vrot.slane %v1804_v25, %v2089_v55  ;;  %v2313_v45 = vrot.slane %v1804_v25, %v2091_v56  ;;  %v111_v55 = vsel %vm65_vm2, %v109_v32, %v58_v51  ;;  %v83_v25 = vsel %vm68_vm3, %v81_v46, %v54_v49 }
  0x8d   :  { %v125_v53 = vpop.permute.xlu1 %124  ;;  %v113_v27 = vsel %vm68_vm3, %v111_v55, %v2146_v17 }
  0x8e   :  { %v127_v57 = vpop.permute.xlu0 %126  ;;  %1342 = vperm.xlu1 %1853, %v1825_v40   ;;  %v69_v40 = vsel %vm68_vm3, %v66_v15, %v58_v51  ;;  %3783 = vst [vmem:[#allocation14_spill] sm:$0xff] %v2310_v44  ;;  %3784 = vst [vmem:[#allocation15_spill] sm:$0xff] %v2313_v45 }
  0x8f   :  { %v129_v3 = vsel %vm128_vm4, %v125_v53, %v127_v57  ;;  %v130_v5 = vsel %vm128_vm4, %v127_v57, %v125_v53  ;;  %v2334_v15 = vmul.f32 %v2103_v61, %v69_v40 }
  0x90   :  { %v2275_v4 = vmul.f32 %v2156_v20, %v130_v5  ;;  %v2278_v2 = vmul.f32 %v2159_v21, %v129_v3  ;;  %v94_v3 = vsel %vm62_vm1, %v54_v49, %v58_v51  ;;  %v95_v5 = vsel %vm62_vm1, %v55_v50, %v59_v52 }
  0x91   :  { %v2280_v19 = vpop.permute.xlu1 %170  ;;  %v114_v51 = vsel %vm68_vm3, %v112_v59, %v2149_v18  ;;  %v96_v61 = vsel %vm65_vm2, %v94_v3, %v2146_v17  ;;  %v97_v49 = vsel %vm65_vm2, %v95_v5, %v2149_v18 }
  0x92   :  { %v2282_v24 = vpop.permute.xlu0 %187  ;;  %v148_v48 = vrot.slane %v2275_v4, 6  ;;  %v149_v53 = vrot.slane %v2278_v2, 6  ;;  %v156_v56 = vrot.slane %v2275_v4, 2  ;;  %v157_v60 = vrot.slane %v2278_v2, 2 }
  0x93   :  { %v152_v11 = vrot.slane %v2275_v4, 4  ;;  %v153_v13 = vrot.slane %v2278_v2, 4 }
  0x94   :  { %v160_v52 = vsel %vm62_vm1, %v2275_v4, %v148_v48  ;;  %v161_v32 = vsel %vm62_vm1, %v2278_v2, %v149_v53  ;;  %v177_v50 = vsel %vm62_vm1, %v156_v56, %v2275_v4  ;;  %v178_v43 = vsel %vm62_vm1, %v157_v60, %v2278_v2 }
  0x95   :  { %v2321_v57 = vpop.permute.xlu1 %204  ;;  %v194_v46 = vsel %vm62_vm1, %v152_v11, %v156_v56  ;;  %v195_v47 = vsel %vm62_vm1, %v153_v13, %v157_v60  ;;  %v162_v17 = vsel %vm65_vm2, %v160_v52, %v152_v11  ;;  %v163_v18 = vsel %vm65_vm2, %v161_v32, %v153_v13 }
  0x96   :  { %v2323_v58 = vpop.permute.xlu0 %221  ;;  %v211_v3 = vsel %vm62_vm1, %v148_v48, %v152_v11  ;;  %v212_v5 = vsel %vm62_vm1, %v149_v53, %v153_v13  ;;  %v179_v21 = vsel %vm65_vm2, %v177_v50, %v148_v48  ;;  %v180_v20 = vsel %vm65_vm2, %v178_v43, %v149_v53 }
  0x97   :  { %v98_v52 = vsel %vm68_vm3, %v96_v61, %v2190_v36  ;;  %v99_v32 = vsel %vm68_vm3, %v97_v49, %v2193_v37  ;;  %v197_v50 = vsel %vm65_vm2, %v195_v47, %v2278_v2  ;;  %v92_v43 = vmul.f32 %v2137_v14, %v83_v25 }
  0x98   :  { %v181_v36 = vsel %vm68_vm3, %v179_v21, %v152_v11  ;;  %v182_v37 = vsel %vm68_vm3, %v180_v20, %v153_v13  ;;  %v213_v61 = vsel %vm65_vm2, %v211_v3, %v156_v56  ;;  %v214_v49 = vsel %vm65_vm2, %v212_v5, %v157_v60 }
  0x99   :  { %v229_v33 = vpop.permute.xlu1 %228  ;;  %v199_v47 = vsel %vm68_vm3, %v197_v50, %v149_v53  ;;  %v122_v20 = vmul.f32 %v2179_v30, %v113_v27  ;;  %v123_v21 = vmul.f32 %v2179_v30, %v114_v51  ;;  %v190_v53 = vmul.f32 %v2282_v24, %v181_v36 }
  0x9a   :  { %v231_v40 = vpop.permute.xlu0 %230  ;;  %v215_v11 = vsel %vm68_vm3, %v213_v61, %v2275_v4  ;;  %v216_v13 = vsel %vm68_vm3, %v214_v49, %v2278_v2  ;;  %v208_v27 = vmul.f32 %v2321_v57, %v199_v47  ;;  %v108_v5 = vmul.f32 %v2181_v31, %v99_v32 }
  0x9b   :  { %v233_v55 = vsel %vm232_vm5, %v229_v33, %v231_v40  ;;  %v234_v59 = vsel %vm232_vm5, %v231_v40, %v229_v33  ;;  %v196_v40 = vsel %vm65_vm2, %v194_v46, %v2275_v4  ;;  %v225_v50 = vmul.f32 %v2323_v58, %v216_v13 }
  0x9c   :  { %v2370_v1 = vmul.f32 %v2162_v22, %v234_v59  ;;  %v2373_v0 = vmul.f32 %v2165_v23, %v233_v55  ;;  %v93_v55 = vmul.f32 %v2137_v14, %v84_v26  ;;  %v164_v59 = vsel %vm68_vm3, %v162_v17, %v156_v56 }
  0x9d   :  { %v2375_v45 = vpop.permute.xlu1 %274  ;;  %v165_v23 = vsel %vm68_vm3, %v163_v18, %v157_v60  ;;  %v198_v46 = vsel %vm68_vm3, %v196_v40, %v148_v48  ;;  %v173_v56 = vmul.f32 %v2280_v19, %v164_v59  ;;  %v191_v60 = vmul.f32 %v2282_v24, %v182_v37 }
  0x9e   :  { %v2377_v33 = vpop.permute.xlu0 %291  ;;  %v2399_v25 = vrot.slane %v2370_v1, 6  ;;  %v2402_v14 = vrot.slane %v2373_v0, 6  ;;  %v174_v48 = vmul.f32 %v2280_v19, %v165_v23  ;;  %v207_v18 = vmul.f32 %v2321_v57, %v198_v46 }
  0x9f   :  { %v256_v30 = vrot.slane %v2370_v1, 4  ;;  %v257_v51 = vrot.slane %v2373_v0, 4  ;;  %v260_v23 = vrot.slane %v2370_v1, 2  ;;  %v261_v19 = vrot.slane %v2373_v0, 2 }
  0xa0   :  { %v264_v24 = vsel %vm62_vm1, %v2370_v1, %v2399_v25  ;;  %v265_v4 = vsel %vm62_vm1, %v2373_v0, %v2402_v14  ;;  %v107_v57 = vmul.f32 %v2181_v31, %v98_v52  ;;  %v224_v40 = vmul.f32 %v2323_v58, %v215_v11 }
  0xa1   :  { %v2404_v26 = vpop.permute.xlu1 %308  ;;  %v2435_v59 = vadd.f32 %v173_v56, %v2334_v15  ;;  %v2438_v36 = vadd.f32 %v174_v48, %v2337_v16  ;;  %v2440_v37 = vadd.f32 %v190_v53, %v92_v43  ;;  %v2442_v61 = vadd.f32 %v191_v60, %v93_v55 }
  0xa2   :  { %v2406_v17 = vpop.permute.xlu0 %325  ;;  %v2444_v49 = vadd.f32 %v207_v18, %v107_v57  ;;  %v2446_v46 = vadd.f32 %v208_v27, %v108_v5  ;;  %v266_v31 = vsel %vm65_vm2, %v264_v24, %v256_v30  ;;  %v267_v52 = vsel %vm65_vm2, %v265_v4, %v257_v51 }
  0xa3   :  { %v281_v58 = vsel %vm62_vm1, %v260_v23, %v2370_v1  ;;  %v282_v15 = vsel %vm62_vm1, %v261_v19, %v2373_v0  ;;  %v2462_v47 = vadd.f32 %v224_v40, %v122_v20  ;;  %v2464_v56 = vadd.f32 %v225_v50, %v123_v21 }
  0xa4   :  { %v315_v48 = vsel %vm62_vm1, %v2399_v25, %v256_v30  ;;  %v316_v53 = vsel %vm62_vm1, %v2402_v14, %v257_v51  ;;  %v298_v60 = vsel %vm62_vm1, %v256_v30, %v260_v23  ;;  %v299_v11 = vsel %vm62_vm1, %v257_v51, %v261_v19 }
  0xa5   :  { %v333_v2 = vpop.permute.xlu1 %332  ;;  %v268_v20 = vsel %vm68_vm3, %v266_v31, %v260_v23  ;;  %v269_v21 = vsel %vm68_vm3, %v267_v52, %v261_v19  ;;  %v283_v27 = vsel %vm65_vm2, %v281_v58, %v2399_v25  ;;  %v284_v24 = vsel %vm65_vm2, %v282_v15, %v2402_v14 }
  0xa6   :  { %v335_v3 = vpop.permute.xlu0 %334  ;;  %v300_v50 = vsel %vm65_vm2, %v298_v60, %v2370_v1  ;;  %v301_v31 = vsel %vm65_vm2, %v299_v11, %v2373_v0  ;;  %v317_v15 = vsel %vm65_vm2, %v315_v48, %v260_v23  ;;  %v278_v60 = vmul.f32 %v2375_v45, %v269_v21 }
  0xa7   :  { %v337_v16 = vsel %vm336_vm6, %v333_v2, %v335_v3  ;;  %v338_v32 = vsel %vm336_vm6, %v335_v3, %v333_v2  ;;  %v285_v23 = vsel %vm68_vm3, %v283_v27, %v256_v30  ;;  %v319_v30 = vsel %vm68_vm3, %v317_v15, %v2370_v1 }
  0xa8   :  { %v2473_v13 = vmul.f32 %v2196_v38, %v338_v32  ;;  %v2476_v18 = vmul.f32 %v2199_v39, %v337_v16  ;;  %v318_v16 = vsel %vm65_vm2, %v316_v53, %v261_v19  ;;  %v277_v38 = vmul.f32 %v2375_v45, %v268_v20 }
  0xa9   :  { %v2458_v43 = vpop.permute.xlu1 %378  ;;  %v286_v19 = vsel %vm68_vm3, %v284_v24, %v257_v51  ;;  %v302_v45 = vsel %vm68_vm3, %v300_v50, %v2399_v25  ;;  %v303_v20 = vsel %vm68_vm3, %v301_v31, %v2402_v14  ;;  %v320_v51 = vsel %vm68_vm3, %v318_v16, %v2373_v0 }
  0xaa   :  { %v2460_v55 = vpop.permute.xlu0 %395  ;;  %v356_v4 = vrot.slane %v2473_v13, 6  ;;  %v357_v2 = vrot.slane %v2476_v18, 6  ;;  %v360_v3 = vrot.slane %v2473_v13, 4  ;;  %v361_v57 = vrot.slane %v2476_v18, 4 }
  0xab   :  { %v364_v52 = vrot.slane %v2473_v13, 2  ;;  %v365_v58 = vrot.slane %v2476_v18, 2  ;;  %v295_v25 = vmul.f32 %v2377_v33, %v286_v19  ;;  %v311_v1 = vmul.f32 %v2404_v26, %v302_v45 }
  0xac   :  { %v368_v32 = vsel %vm62_vm1, %v2473_v13, %v356_v4  ;;  %v369_v39 = vsel %vm62_vm1, %v2476_v18, %v357_v2  ;;  %v312_v0 = vmul.f32 %v2404_v26, %v303_v20  ;;  %v328_v31 = vmul.f32 %v2406_v17, %v319_v30 }
  0xad   :  { %v2488_v5 = vpop.permute.xlu1 %412  ;;  %v385_v11 = vsel %vm62_vm1, %v364_v52, %v2473_v13  ;;  %v386_v22 = vsel %vm62_vm1, %v365_v58, %v2476_v18  ;;  %v370_v48 = vsel %vm65_vm2, %v368_v32, %v360_v3  ;;  %v371_v53 = vsel %vm65_vm2, %v369_v39, %v361_v57 }
  0xae   :  { %v2490_v40 = vpop.permute.xlu0 %429  ;;  %v387_v21 = vsel %vm65_vm2, %v385_v11, %v356_v4  ;;  %v388_v39 = vsel %vm65_vm2, %v386_v22, %v357_v2  ;;  %v402_v27 = vsel %vm62_vm1, %v360_v3, %v364_v52  ;;  %v403_v24 = vsel %vm62_vm1, %v361_v57, %v365_v58 }
  0xaf   :  { %v294_v32 = vmul.f32 %v2377_v33, %v285_v23  ;;  %v372_v14 = vsel %vm68_vm3, %v370_v48, %v364_v52  ;;  %v373_v50 = vsel %vm68_vm3, %v371_v53, %v365_v58  ;;  %v329_v22 = vmul.f32 %v2406_v17, %v320_v51 }
  0xb0   :  { %v389_v11 = vsel %vm68_vm3, %v387_v21, %v360_v3  ;;  %v390_v33 = vsel %vm68_vm3, %v388_v39, %v361_v57  ;;  %v404_v23 = vsel %vm65_vm2, %v402_v27, %v2473_v13  ;;  %v405_v19 = vsel %vm65_vm2, %v403_v24, %v2476_v18 }
  0xb1   :  { %v461_v44 = vpop.permute.xlu1 %460  ;;  %v279_v26 = vadd.f32 %v277_v38, %v2435_v59  ;;  %v280_v48 = vadd.f32 %v278_v60, %v2438_v36  ;;  %v381_v17 = vmul.f32 %v2458_v43, %v372_v14  ;;  %v382_v53 = vmul.f32 %v2458_v43, %v373_v50 }
  0xb2   :  { %v2514_v35 = vpop.permute.xlu0 %477  ;;  %v296_v45 = vadd.f32 %v294_v32, %v2440_v37  ;;  %v297_v20 = vadd.f32 %v295_v25, %v2442_v61  ;;  %v419_v30 = vsel %vm62_vm1, %v356_v4, %v360_v3  ;;  %v420_v51 = vsel %vm62_vm1, %v357_v2, %v361_v57 }
  0xb3   :  { %v398_v21 = vmul.f32 %v2460_v55, %v389_v11  ;;  %v399_v39 = vmul.f32 %v2460_v55, %v390_v33  ;;  %v406_v38 = vsel %vm68_vm3, %v404_v23, %v356_v4  ;;  %v407_v59 = vsel %vm68_vm3, %v405_v19, %v357_v2 }
  0xb4   :  { %v313_v43 = vadd.f32 %v311_v1, %v2444_v49  ;;  %v314_v37 = vadd.f32 %v312_v0, %v2446_v46  ;;  %v330_v61 = vadd.f32 %v328_v31, %v2462_v47  ;;  %v331_v3 = vadd.f32 %v329_v22, %v2464_v56 }
  0xb5   :  { %v2537_v15 = vpop.permute.xlu1 %494  ;;  %v383_v27 = vadd.f32 %v381_v17, %v279_v26  ;;  %v384_v57 = vadd.f32 %v382_v53, %v280_v48  ;;  %v421_v24 = vsel %vm65_vm2, %v419_v30, %v364_v52  ;;  %v422_v55 = vsel %vm65_vm2, %v420_v51, %v365_v58 }
  0xb6   :  { %v2539_v16 = vpop.permute.xlu0 %511  ;;  %v415_v4 = vmul.f32 %v2488_v5, %v406_v38  ;;  %v416_v2 = vmul.f32 %v2488_v5, %v407_v59  ;;  %v400_v46 = vadd.f32 %v398_v21, %v296_v45  ;;  %v401_v47 = vadd.f32 %v399_v39, %v297_v20 }
  0xb7   :  { %v423_v14 = vsel %vm68_vm3, %v421_v24, %v2473_v13  ;;  %v424_v5 = vsel %vm68_vm3, %v422_v55, %v2476_v18  ;;  %v463_v50 = vmul.f32 %v461_v44, %v2208_v42  ;;  %v464_v1 = vmul.f32 %v461_v44, %v2205_v41 }
  0xb8   :  { %v417_v13 = vadd.f32 %v415_v4, %v313_v43  ;;  %v418_v33 = vadd.f32 %v416_v2, %v314_v37  ;;  %v432_v41 = vmul.f32 %v2490_v40, %v423_v14  ;;  %v433_v44 = vmul.f32 %v2490_v40, %v424_v5 }
  0xb9   :  { %v519_v36 = vpop.permute.xlu1 %518  ;;  %v480_v20 = vmul.f32 %v2514_v35, %v2241_v7  ;;  %v481_v30 = vmul.f32 %v2514_v35, %v2238_v6  ;;  %v497_v39 = vmul.f32 %v2537_v15, %v2249_v9  ;;  %v498_v38 = vmul.f32 %v2537_v15, %v2245_v8 }
  0xba   :  { %v521_v60 = vpop.permute.xlu0 %520  ;;  %v466_v6 = vadd.f32 %v464_v1, %v384_v57  ;;  %v434_v24 = vadd.f32 %v432_v41, %v330_v61  ;;  %v435_v55 = vadd.f32 %v433_v44, %v331_v3  ;;  %v514_v9 = vmul.f32 %v2539_v16, %v2261_v12 }
  0xbb   :  { %v523_v32 = vsel %vm522_vm7, %v519_v36, %v521_v60  ;;  %v524_v49 = vsel %vm522_vm7, %v521_v60, %v519_v36  ;;  %v465_v36 = vadd.f32 %v463_v50, %v383_v27  ;;  %v515_v8 = vmul.f32 %v2539_v16, %v2257_v10 }
  0xbc   :  { %v2572_v56 = vmul.f32 %v2264_v62, %v523_v32  ;;  %v2575_v25 = vmul.f32 %v2267_v63, %v524_v49  ;;  %v482_v15 = vadd.f32 %v480_v20, %v400_v46  ;;  %v483_v4 = vadd.f32 %v481_v30, %v401_v47 }
  0xbd   :  { %v565_v52 = vpop.permute.xlu1 %564  ;;  %v2640_v27 = vadd.f32 %v497_v39, %v417_v13  ;;  %v2642_v57 = vadd.f32 %v498_v38, %v418_v33  ;;  %v2652_v47 = vadd.f32 %v514_v9, %v434_v24 }
  0xbe   :  { %v582_v58 = vpop.permute.xlu0 %581  ;;  %v2585_v0 = vrot.slane %v2572_v56, 6  ;;  %v2588_v31 = vrot.slane %v2575_v25, 6  ;;  %v546_v22 = vrot.slane %v2572_v56, 4  ;;  %v547_v11 = vrot.slane %v2575_v25, 4 }
  0xbf   :  { %v2593_v18 = vrot.slane %v2572_v56, 2  ;;  %v2596_v42 = vrot.slane %v2575_v25, 2 }
  0xc0   :  { %v554_v23 = vsel %vm62_vm1, %v2572_v56, %v2585_v0  ;;  %v555_v19 = vsel %vm62_vm1, %v2575_v25, %v2588_v31  ;;  %v606_v5 = vsel %vm62_vm1, %v2588_v31, %v547_v11 }
  0xc1   :  { %v2606_v26 = vpop.permute.xlu1 %598  ;;  %v556_v17 = vsel %vm65_vm2, %v554_v23, %v546_v22  ;;  %v557_v53 = vsel %vm65_vm2, %v555_v19, %v547_v11  ;;  %v571_v40 = vsel %vm62_vm1, %v2593_v18, %v2572_v56  ;;  %v572_v45 = vsel %vm62_vm1, %v2596_v42, %v2575_v25 }
  0xc2   :  { %v2608_v48 = vpop.permute.xlu0 %615  ;;  %v573_v51 = vsel %vm65_vm2, %v571_v40, %v2585_v0  ;;  %v574_v21 = vsel %vm65_vm2, %v572_v45, %v2588_v31  ;;  %v558_v59 = vsel %vm68_vm3, %v556_v17, %v2593_v18  ;;  %v559_v7 = vsel %vm68_vm3, %v557_v53, %v2596_v42 }
  0xc3   :  { %v575_v35 = vsel %vm68_vm3, %v573_v51, %v546_v22  ;;  %v576_v60 = vsel %vm68_vm3, %v574_v21, %v547_v11  ;;  %v567_v2 = vmul.f32 %v565_v52, %v558_v59  ;;  %v568_v32 = vmul.f32 %v565_v52, %v559_v7 }
  0xc4   :  { %v584_v49 = vmul.f32 %v582_v58, %v575_v35  ;;  %v585_v14 = vmul.f32 %v582_v58, %v576_v60  ;;  %v588_v61 = vsel %vm62_vm1, %v546_v22, %v2593_v18  ;;  %v589_v3 = vsel %vm62_vm1, %v547_v11, %v2596_v42 }
  0xc5   :  { %v623_v43 = vpop.permute.xlu1 %622  ;;  %v2654_v52 = vadd.f32 %v515_v8, %v435_v55  ;;  %v605_v58 = vsel %vm62_vm1, %v2585_v0, %v546_v22  ;;  %v2660_v50 = vadd.f32 %v567_v2, %v465_v36  ;;  %v2662_v1 = vadd.f32 %v568_v32, %v466_v6 }
  0xc6   :  { %v625_v37 = vpop.permute.xlu0 %624  ;;  %v2670_v41 = vadd.f32 %v584_v49, %v482_v15  ;;  %v2672_v44 = vadd.f32 %v585_v14, %v483_v4  ;;  %v590_v22 = vsel %vm65_vm2, %v588_v61, %v2572_v56  ;;  %v591_v11 = vsel %vm65_vm2, %v589_v3, %v2575_v25 }
  0xc7   :  { %v627_v12 = vsel %vm626_vm8, %v623_v43, %v625_v37  ;;  %v628_v10 = vsel %vm626_vm8, %v625_v37, %v623_v43  ;;  %v607_v20 = vsel %vm65_vm2, %v605_v58, %v2593_v18  ;;  %v608_v30 = vsel %vm65_vm2, %v606_v5, %v2596_v42 }
  0xc8   :  { %v2665_v13 = vmul.f32 %v2292_v28, %v627_v12  ;;  %v2668_v33 = vmul.f32 %v2295_v29, %v628_v10  ;;  %v592_v39 = vsel %vm68_vm3, %v590_v22, %v2585_v0  ;;  %v593_v38 = vsel %vm68_vm3, %v591_v11, %v2588_v31 }
  0xc9   :  { %v669_v16 = vpop.permute.xlu1 %668  ;;  %v609_v0 = vsel %vm68_vm3, %v607_v20, %v2572_v56  ;;  %v610_v31 = vsel %vm68_vm3, %v608_v30, %v2575_v25  ;;  %v601_v24 = vmul.f32 %v2606_v26, %v592_v39  ;;  %v602_v55 = vmul.f32 %v2606_v26, %v593_v38 }
  0xca   :  { %v686_v46 = vpop.permute.xlu0 %685  ;;  %v646_v23 = vrot.slane %v2665_v13, 6  ;;  %v647_v19 = vrot.slane %v2668_v33, 6  ;;  %v650_v17 = vrot.slane %v2665_v13, 4  ;;  %v651_v53 = vrot.slane %v2668_v33, 4 }
  0xcb   :  { %v654_v51 = vrot.slane %v2665_v13, 2  ;;  %v655_v21 = vrot.slane %v2668_v33, 2  ;;  %v618_v2 = vmul.f32 %v2608_v48, %v609_v0  ;;  %v619_v32 = vmul.f32 %v2608_v48, %v610_v31 }
  0xcc   :  { %v658_v59 = vsel %vm62_vm1, %v2665_v13, %v646_v23  ;;  %v659_v7 = vsel %vm62_vm1, %v2668_v33, %v647_v19  ;;  %v709_v3 = vsel %vm62_vm1, %v646_v23, %v650_v17  ;;  %v710_v12 = vsel %vm62_vm1, %v647_v19, %v651_v53 }
  0xcd   :  { %v703_v40 = vpop.permute.xlu1 %702  ;;  %v660_v18 = vsel %vm65_vm2, %v658_v59, %v650_v17  ;;  %v661_v42 = vsel %vm65_vm2, %v659_v7, %v651_v53  ;;  %v675_v36 = vsel %vm62_vm1, %v654_v51, %v2665_v13  ;;  %v676_v6 = vsel %vm62_vm1, %v655_v21, %v2668_v33  ;;  %v3785_v59 = vld [vmem:[#allocation13_spill] sm:$0xff] }
  0xce   :  { %v2683_v45 = vpop.permute.xlu0 %719  ;;  %v677_v35 = vsel %vm65_vm2, %v675_v36, %v646_v23  ;;  %v678_v60 = vsel %vm65_vm2, %v676_v6, %v647_v19  ;;  %v662_v9 = vsel %vm68_vm3, %v660_v18, %v654_v51  ;;  %v663_v8 = vsel %vm68_vm3, %v661_v42, %v655_v21 }
  0xcf   :  { %v679_v15 = vsel %vm68_vm3, %v677_v35, %v650_v17  ;;  %v680_v56 = vsel %vm68_vm3, %v678_v60, %v651_v53  ;;  %v692_v25 = vsel %vm62_vm1, %v650_v17, %v654_v51  ;;  %v693_v4 = vsel %vm62_vm1, %v651_v53, %v655_v21 }
  0xd0   :  { %v694_v49 = vsel %vm65_vm2, %v692_v25, %v2665_v13  ;;  %v695_v26 = vsel %vm65_vm2, %v693_v4, %v2668_v33  ;;  %v671_v10 = vmul.f32 %v669_v16, %v662_v9  ;;  %v672_v58 = vmul.f32 %v669_v16, %v663_v8 }
  0xd1   :  { %v727_v43 = vpop.permute.xlu1 %726  ;;  %v696_v14 = vsel %vm68_vm3, %v694_v49, %v646_v23  ;;  %v697_v61 = vsel %vm68_vm3, %v695_v26, %v647_v19  ;;  %v688_v5 = vmul.f32 %v686_v46, %v679_v15  ;;  %v689_v22 = vmul.f32 %v686_v46, %v680_v56 }
  0xd2   :  { %v729_v37 = vpop.permute.xlu0 %728  ;;  %v603_v20 = vadd.f32 %v601_v24, %v2640_v27  ;;  %v604_v30 = vadd.f32 %v602_v55, %v2642_v57  ;;  %v620_v23 = vadd.f32 %v618_v2, %v2652_v47  ;;  %v621_v19 = vadd.f32 %v619_v32, %v2654_v52 }
  0xd3   :  { %v731_v39 = vsel %vm730_vm9, %v727_v43, %v729_v37  ;;  %v732_v38 = vsel %vm730_vm9, %v729_v37, %v727_v43  ;;  %v705_v17 = vmul.f32 %v703_v40, %v696_v14  ;;  %v706_v16 = vmul.f32 %v703_v40, %v697_v61 }
  0xd4   :  { %v711_v46 = vsel %vm65_vm2, %v709_v3, %v654_v51  ;;  %v712_v53 = vsel %vm65_vm2, %v710_v12, %v655_v21  ;;  %v746_v27 = vmul.f32 %v2302_v34, %v731_v39  ;;  %v747_v57 = vmul.f32 %v3785_v59, %v732_v38  ;;  %v3812_v34 = vld [vmem:[#allocation9_spill] sm:$0xff] }
  0xd5   :  { %v773_v11 = vpop.permute.xlu1 %772  ;;  %v673_v7 = vadd.f32 %v671_v10, %v2660_v50  ;;  %v674_v18 = vadd.f32 %v672_v58, %v2662_v1  ;;  %v690_v42 = vadd.f32 %v688_v5, %v2670_v41  ;;  %v691_v47 = vadd.f32 %v689_v22, %v2672_v44 }
  0xd6   :  { %v790_v48 = vpop.permute.xlu0 %789  ;;  %v750_v52 = vrot.slane %v746_v27, 6  ;;  %v751_v40 = vrot.slane %v747_v57, 6  ;;  %v754_v36 = vrot.slane %v746_v27, 4  ;;  %v755_v51 = vrot.slane %v747_v57, 4 }
  0xd7   :  { %v713_v21 = vsel %vm68_vm3, %v711_v46, %v2665_v13  ;;  %v714_v6 = vsel %vm68_vm3, %v712_v53, %v2668_v33  ;;  %v758_v0 = vrot.slane %v746_v27, 2  ;;  %v759_v50 = vrot.slane %v747_v57, 2 }
  0xd8   :  { %v707_v35 = vadd.f32 %v705_v17, %v603_v20  ;;  %v708_v41 = vadd.f32 %v706_v16, %v604_v30  ;;  %v762_v44 = vsel %vm62_vm1, %v746_v27, %v750_v52  ;;  %v763_v60 = vsel %vm62_vm1, %v747_v57, %v751_v40 }
  0xd9   :  { %v807_v31 = vpop.permute.xlu1 %806  ;;  %v764_v43 = vsel %vm65_vm2, %v762_v44, %v754_v36  ;;  %v765_v37 = vsel %vm65_vm2, %v763_v60, %v755_v51  ;;  %v779_v24 = vsel %vm62_vm1, %v758_v0, %v746_v27  ;;  %v780_v13 = vsel %vm62_vm1, %v759_v50, %v747_v57 }
  0xda   :  { %v824_v1 = vpop.permute.xlu0 %823  ;;  %v766_v33 = vsel %vm68_vm3, %v764_v43, %v758_v0  ;;  %v767_v55 = vsel %vm68_vm3, %v765_v37, %v759_v50  ;;  %v781_v9 = vsel %vm65_vm2, %v779_v24, %v750_v52  ;;  %v782_v8 = vsel %vm65_vm2, %v780_v13, %v751_v40 }
  0xdb   :  { %v722_v15 = vmul.f32 %v2683_v45, %v713_v21  ;;  %v723_v56 = vmul.f32 %v2683_v45, %v714_v6  ;;  %v783_v25 = vsel %vm68_vm3, %v781_v9, %v754_v36  ;;  %v784_v4 = vsel %vm68_vm3, %v782_v8, %v755_v51  ;;  %v3786_v6 = vld [vmem:[#allocation14_spill] sm:$0xff] }
  0xdc   :  { %v796_v2 = vsel %vm62_vm1, %v754_v36, %v758_v0  ;;  %v797_v32 = vsel %vm62_vm1, %v755_v51, %v759_v50  ;;  %v813_v49 = vsel %vm62_vm1, %v750_v52, %v754_v36  ;;  %v814_v26 = vsel %vm62_vm1, %v751_v40, %v755_v51 }
  0xdd   :  { %v775_v14 = vmul.f32 %v773_v11, %v766_v33  ;;  %v776_v61 = vmul.f32 %v773_v11, %v767_v55  ;;  %v798_v3 = vsel %vm65_vm2, %v796_v2, %v746_v27  ;;  %v799_v12 = vsel %vm65_vm2, %v797_v32, %v747_v57  ;;  %v831_v10 = vpop.permute.xlu1 %830 }
  0xde   :  { %v833_v45 = vpop.permute.xlu0 %832  ;;  %v792_v58 = vmul.f32 %v790_v48, %v783_v25  ;;  %v793_v5 = vmul.f32 %v790_v48, %v784_v4  ;;  %v800_v22 = vsel %vm68_vm3, %v798_v3, %v750_v52  ;;  %v801_v20 = vsel %vm68_vm3, %v799_v12, %v751_v40 }
  0xdf   :  { %v809_v30 = vmul.f32 %v807_v31, %v800_v22  ;;  %v810_v39 = vmul.f32 %v807_v31, %v801_v20  ;;  %v815_v38 = vsel %vm65_vm2, %v813_v49, %v758_v0  ;;  %v816_v17 = vsel %vm65_vm2, %v814_v26, %v759_v50  ;;  %v3787_v31 = vld [vmem:[#allocation15_spill] sm:$0xff] }
  0xe0   :  { %v817_v11 = vsel %vm68_vm3, %v815_v38, %v746_v27  ;;  %v818_v16 = vsel %vm68_vm3, %v816_v17, %v747_v57  ;;  %v835_v46 = vsel %vm834_vm10, %v831_v10, %v833_v45  ;;  %v836_v48 = vsel %vm834_vm10, %v833_v45, %v831_v10 }
  0xe1   :  { %v724_v53 = vadd.f32 %v722_v15, %v620_v23  ;;  %v725_v52 = vadd.f32 %v723_v56, %v621_v19  ;;  %v826_v36 = vmul.f32 %v824_v1, %v817_v11  ;;  %v827_v40 = vmul.f32 %v824_v1, %v818_v16  ;;  %v877_v43 = vpop.permute.xlu1 %876 }
  0xe2   :  { %v777_v51 = vadd.f32 %v775_v14, %v673_v7  ;;  %v778_v21 = vadd.f32 %v776_v61, %v674_v18  ;;  %v850_v0 = vmul.f32 %v3786_v6, %v835_v46  ;;  %v851_v50 = vmul.f32 %v3787_v31, %v836_v48  ;;  %v894_v1 = vpop.permute.xlu0 %893 }
  0xe3   :  { %v794_v44 = vadd.f32 %v792_v58, %v690_v42  ;;  %v795_v27 = vadd.f32 %v793_v5, %v691_v47  ;;  %v811_v60 = vadd.f32 %v809_v30, %v707_v35  ;;  %v812_v57 = vadd.f32 %v810_v39, %v708_v41 }
  0xe4   :  { %v854_v37 = vrot.slane %v850_v0, 6  ;;  %v855_v24 = vrot.slane %v851_v50, 6  ;;  %v858_v13 = vrot.slane %v850_v0, 4  ;;  %v859_v33 = vrot.slane %v851_v50, 4 }
  0xe5   :  { %v828_v55 = vadd.f32 %v826_v36, %v724_v53  ;;  %v829_v23 = vadd.f32 %v827_v40, %v725_v52  ;;  %v862_v19 = vrot.slane %v850_v0, 2  ;;  %v863_v9 = vrot.slane %v851_v50, 2  ;;  %v911_v12 = vpop.permute.xlu1 %910 }
  0xe6   :  { %v866_v7 = vsel %vm62_vm1, %v850_v0, %v854_v37  ;;  %v867_v18 = vsel %vm62_vm1, %v851_v50, %v855_v24  ;;  %v917_v8 = vsel %vm62_vm1, %v854_v37, %v858_v13  ;;  %v918_v42 = vsel %vm62_vm1, %v855_v24, %v859_v33  ;;  %v928_v11 = vpop.permute.xlu0 %927 }
  0xe7   :  { %v868_v47 = vsel %vm65_vm2, %v866_v7, %v858_v13  ;;  %v869_v35 = vsel %vm65_vm2, %v867_v18, %v859_v33  ;;  %v883_v41 = vsel %vm62_vm1, %v862_v19, %v850_v0  ;;  %v884_v15 = vsel %vm62_vm1, %v863_v9, %v851_v50 }
  0xe8   :  { %v870_v56 = vsel %vm68_vm3, %v868_v47, %v862_v19  ;;  %v871_v25 = vsel %vm68_vm3, %v869_v35, %v863_v9  ;;  %v885_v4 = vsel %vm65_vm2, %v883_v41, %v854_v37  ;;  %v886_v2 = vsel %vm65_vm2, %v884_v15, %v855_v24  ;;  %v1833_v47 = vld [vmem:[%s3738_s4 + $0xc8] sm:$0xff]  ;;  %v1831_v35 = vld [vmem:[%s3738_s4 + $0xb8] sm:$0xff]  ;;  %v1836_v41 = vld [vmem:[%s3738_s4 + $0xe0] sm:$0xff] }
  0xe9   :  { %v879_v32 = vmul.f32 %v877_v43, %v870_v56  ;;  %v880_v49 = vmul.f32 %v877_v43, %v871_v25  ;;  %v887_v26 = vsel %vm68_vm3, %v885_v4, %v858_v13  ;;  %v888_v14 = vsel %vm68_vm3, %v886_v2, %v859_v33  ;;  %v1834_v15 = vld [vmem:[%s3738_s4 + $0xd0] sm:$0xff]  ;;  %v1837_v56 = vld [vmem:[%s3738_s4 + $0xe8] sm:$0xff]  ;;  %v1835_v25 = vld [vmem:[%s3738_s4 + $0xd8] sm:$0xff] }
  0xea   :  { %v896_v61 = vmul.f32 %v894_v1, %v887_v26  ;;  %v897_v3 = vmul.f32 %v894_v1, %v888_v14  ;;  %v900_v10 = vsel %vm62_vm1, %v858_v13, %v862_v19  ;;  %v901_v45 = vsel %vm62_vm1, %v859_v33, %v863_v9  ;;  %v944_v1 = vpop.permute.xlu1 %943  ;;  %v1840_v4 = vld [vmem:[%s3738_s4 + $0x100] sm:$0xff]  ;;  %v1838_v2 = vld [vmem:[%s3738_s4 + $0xf0] sm:$0xff]  ;;  %v1843_v26 = vld [vmem:[%s3738_s4 + $0x118] sm:$0xff] }
  0xeb   :  { %v881_v58 = vadd.f32 %v879_v32, %v777_v51  ;;  %v882_v5 = vadd.f32 %v880_v49, %v778_v21  ;;  %v902_v22 = vsel %vm65_vm2, %v900_v10, %v850_v0  ;;  %v903_v20 = vsel %vm65_vm2, %v901_v45, %v851_v50  ;;  %v1839_v32 = vld [vmem:[%s3738_s4 + $0xf8] sm:$0xff]  ;;  %v1841_v49 = vld [vmem:[%s3738_s4 + $0x108] sm:$0xff]  ;;  %v1842_v14 = vld [vmem:[%s3738_s4 + $0x110] sm:$0xff] }
  0xec   :  { %v898_v30 = vadd.f32 %v896_v61, %v794_v44  ;;  %v899_v39 = vadd.f32 %v897_v3, %v795_v27  ;;  %v904_v38 = vsel %vm68_vm3, %v902_v22, %v854_v37  ;;  %v905_v17 = vsel %vm68_vm3, %v903_v20, %v855_v24  ;;  %v2896_v61 = vpop.permute.xlu0 %981 }
  0xed   :  { %v913_v16 = vmul.f32 %v911_v12, %v904_v38  ;;  %v914_v46 = vmul.f32 %v911_v12, %v905_v17  ;;  %v919_v48 = vsel %vm65_vm2, %v917_v8, %v862_v19  ;;  %v920_v53 = vsel %vm65_vm2, %v918_v42, %v863_v9  ;;  %3788 = vst [vmem:[#allocation16_spill] sm:$0xff] %v2896_v61  ;;  %v1749_v12 = vld [vmem:[%s3740_s5] sm:$0xff] }
  0xee   :  { %v934_v52 = vadd.f32 %v898_v30, %v881_v58  ;;  %v935_v36 = vadd.f32 %v899_v39, %v882_v5  ;;  %v921_v40 = vsel %vm68_vm3, %v919_v48, %v850_v0  ;;  %v922_v51 = vsel %vm68_vm3, %v920_v53, %v851_v50  ;;  %v1826_v0 = vld [vmem:[%s3738_s4 + $0x90] sm:$0xff]  ;;  %v1828_v50 = vld [vmem:[%s3738_s4 + $0xa0] sm:$0xff]  ;;  %v2898_v3 = vpop.permute.xlu1 %996 }
  0xef   :  { %v915_v21 = vadd.f32 %v913_v16, %v811_v60  ;;  %v916_v44 = vadd.f32 %v914_v46, %v812_v57  ;;  %v930_v27 = vmul.f32 %v928_v11, %v921_v40  ;;  %v931_v43 = vmul.f32 %v928_v11, %v922_v51  ;;  %v1829_v60 = vld [vmem:[%s3738_s4 + $0xa8] sm:$0xff]  ;;  %v1827_v57 = vld [vmem:[%s3738_s4 + $0x98] sm:$0xff] }
  0xf0   :  { %v2903_v10 = vpop.permute.xlu0 %1011 }
  0xf1   :  { %v932_v37 = vadd.f32 %v930_v27, %v828_v55  ;;  %v933_v13 = vadd.f32 %v931_v43, %v829_v23  ;;  %v936_v24 = vadd.f32 %v934_v52, %v915_v21  ;;  %v937_v33 = vadd.f32 %v935_v36, %v916_v44  ;;  %v1832_v55 = vld [vmem:[%s3738_s4 + $0xc0] sm:$0xff]  ;;  %v1830_v23 = vld [vmem:[%s3738_s4 + $0xb0] sm:$0xff] }
  0xf2   :  { %v2905_v45 = vpop.permute.xlu1 %1026 }
  0xf3   :  { %v938_v7 = vadd.f32 %v936_v24, %v932_v37  ;;  %v939_v18 = vadd.f32 %v937_v33, %v933_v13  ;;  %3789 = vst [vmem:[#allocation17_spill] sm:$0xff] %v2905_v45 }
  0xf4   :  { %v2907_v58 = vpop.permute.xlu0 %1063 }
  0xf5   :  { %v946_v19 = vadd.f32 %v944_v1, %v938_v7  ;;  %v947_v8 = vadd.f32 %v944_v1, %v939_v18  ;;  %3790 = vst [vmem:[#allocation18_spill] sm:$0xff] %v2907_v58 }
  0xf6   :  { %v2909_v5 = vpop.permute.xlu1 %1080 }
  0xf7   :  { %v2806_v9 = vmax.f32 %v946_v19, 0.0  ;;  %v2808_v42 = vmax.f32 %v947_v8, 0.0 }
  0xf8   :  { %v2911_v22 = vpop.permute.xlu0 %1097 }
  0xf9   :  { %952 = vrot.lane.b32.xlu1 %v2808_v42, %s1858_s25  ;;  %950 = vrot.lane.b32.xlu0 %v2806_v9, %s1858_s25  ;;  %v1304_v53 = vrot.slane %v2808_v42, 6  ;;  %v1303_v52 = vrot.slane %v2806_v9, 6  ;;  %v1312_v36 = vrot.slane %v2808_v42, 2  ;;  %v1311_v40 = vrot.slane %v2806_v9, 2 }
  0xfa   :  { %v2913_v20 = vpop.permute.xlu1 %1114  ;;  %v1308_v51 = vrot.slane %v2808_v42, 4  ;;  %v1307_v21 = vrot.slane %v2806_v9, 4 }
  0xfb   :  { %3791 = vst [vmem:[#allocation19_spill] sm:$0xff] %v2913_v20  ;;  %v1316_v44 = vsel %vm62_vm1, %v2808_v42, %v1304_v53  ;;  %v1315_v27 = vsel %vm62_vm1, %v2806_v9, %v1303_v52  ;;  %v1332_v13 = vsel %vm62_vm1, %v1311_v40, %v2806_v9  ;;  %v1333_v24 = vsel %vm62_vm1, %v1312_v36, %v2808_v42 }
  0xfc   :  { %v2915_v30 = vpop.permute.xlu0 %1153  ;;  %v1350_v33 = vsel %vm62_vm1, %v1308_v51, %v1312_v36  ;;  %v1349_v7 = vsel %vm62_vm1, %v1307_v21, %v1311_v40  ;;  %v1367_v18 = vsel %vm62_vm1, %v1304_v53, %v1308_v51  ;;  %v1366_v1 = vsel %vm62_vm1, %v1303_v52, %v1307_v21 }
  0xfd   :  { %1033 = vrot.lane.b32.xlu1 %v2808_v42, %s1859_s10  ;;  %1031 = vrot.lane.b32.xlu0 %v2806_v9, %s1859_s10  ;;  %3792 = vst [vmem:[#allocation20_spill] sm:$0xff] %v2915_v30  ;;  %v1318_v19 = vsel %vm65_vm2, %v1316_v44, %v1308_v51  ;;  %v1317_v8 = vsel %vm65_vm2, %v1315_v27, %v1307_v21 }
  0xfe   :  { %v2917_v39 = vpop.permute.xlu1 %1170 }
 0x100   :  { %v2919_v38 = vpop.permute.xlu0 %1187 }
 0x101   :  { %1123 = vrot.lane.b32.xlu1 %v2808_v42, %s1860_s19  ;;  %1121 = vrot.lane.b32.xlu0 %v2806_v9, %s1860_s19 }
 0x102   :  { %v2921_v17 = vpop.permute.xlu1 %1204 }
 0x103   :  { %3793 = vst [vmem:[#allocation21_spill] sm:$0xff] %v2921_v17 }
 0x104   :  { %v2923_v11 = vpop.permute.xlu0 %1243 }
 0x105   :  { %1213 = vrot.lane.b32.xlu1 %v2808_v42, %s1861_s29  ;;  %1211 = vrot.lane.b32.xlu0 %v2806_v9, %s1861_s29  ;;  %3794 = vst [vmem:[#allocation22_spill] sm:$0xff] %v2923_v11 }
 0x106   :  { %v2925_v16 = vpop.permute.xlu1 %1260 }
 0x108   :  { %v2927_v46 = vpop.permute.xlu0 %1277 }
 0x109   :  { %1383 = vrot.lane.b32.xlu1 %v2806_v9, %s1862_s24  ;;  %1359 = vperm.xlu0 %1854, %v1826_v0   ;;  %v1334_v0 = vsel %vm65_vm2, %v1332_v13, %v1303_v52 }
 0x10a   :  { %v2929_v48 = vpop.permute.xlu1 %1294 }
 0x10b   :  { %3795 = vst [vmem:[#allocation23_spill] sm:$0xff] %v2929_v48 }
 0x10c   :  { %v1326_v43 = vpop.permute.xlu0 %1325 }
 0x10d   :  { %1415 = vperm.xlu1 %1853, %v1828_v50   ;;  %1385 = vrot.lane.b32.xlu0 %v2808_v42, %s1862_s24  ;;  %v1335_v50 = vsel %vm65_vm2, %v1333_v24, %v1304_v53 }
 0x10e   :  { %v1343_v37 = vpop.permute.xlu1 %1342 }
 0x111   :  { %1473 = vrot.lane.b32.xlu1 %v2806_v9, %s1863_s12  ;;  %1432 = vperm.xlu0 %1854, %v1829_v60  }
 0x115   :  { %1376 = vperm.xlu1 %1853, %v1827_v57   ;;  %1475 = vrot.lane.b32.xlu0 %v2808_v42, %s1863_s12 }
 0x119   :  { %1505 = vperm.xlu1 %1853, %v1832_v55   ;;  %1449 = vperm.xlu0 %1854, %v1830_v23   ;;  %v1352_v55 = vsel %vm65_vm2, %v1350_v33, %v2808_v42  ;;  %v1351_v23 = vsel %vm65_vm2, %v1349_v7, %v2806_v9 }
 0x11d   :  { %1563 = vrot.lane.b32.xlu1 %v2806_v9, %s1864_s22  ;;  %1522 = vperm.xlu0 %1854, %v1833_v47   ;;  %v1369_v47 = vsel %vm65_vm2, %v1367_v18, %v1312_v36 }
 0x121   :  { %1466 = vperm.xlu1 %1853, %v1831_v35   ;;  %1565 = vrot.lane.b32.xlu0 %v2808_v42, %s1864_s22  ;;  %v1368_v35 = vsel %vm65_vm2, %v1366_v1, %v1311_v40  ;;  %v3806_v1 = vld [vmem:[#allocation4_spill] sm:$0xff] }
 0x125   :  { %1595 = vperm.xlu1 %1853, %v1836_v41   ;;  %1539 = vperm.xlu0 %1854, %v1834_v15   ;;  %v1320_v41 = vsel %vm68_vm3, %v1318_v19, %v1312_v36  ;;  %v1319_v15 = vsel %vm68_vm3, %v1317_v8, %v1311_v40  ;;  %v2977_v36 = vsel %vm68_vm3, %v1351_v23, %v1303_v52  ;;  %v3807_v8 = vld [vmem:[#allocation5_spill] sm:$0xff] }
 0x126   :  { %v2981_v40 = vsel %vm68_vm3, %v1369_v47, %v2808_v42  ;;  %v3009_v7 = vmul.f32 %v1326_v43, %v1319_v15  ;;  %v3011_v18 = vmul.f32 %v1326_v43, %v1320_v41 }
 0x128   :  { %3804 = vst [vmem:[#allocation28_spill] sm:$0xff] %v3009_v7  ;;  %3805 = vst [vmem:[#allocation29_spill] sm:$0xff] %v3011_v18 }
 0x129   :  { %1653 = vrot.lane.b32.xlu1 %v2806_v9, %s1865_s11  ;;  %1612 = vperm.xlu0 %1854, %v1837_v56  }
 0x12d   :  { %1556 = vperm.xlu1 %1853, %v1835_v25   ;;  %1655 = vrot.lane.b32.xlu0 %v2808_v42, %s1865_s11 }
 0x131   :  { %1685 = vperm.xlu1 %1853, %v1840_v4   ;;  %1629 = vperm.xlu0 %1854, %v1838_v2   ;;  %v1336_v4 = vsel %vm68_vm3, %v1334_v0, %v1307_v21  ;;  %v1337_v2 = vsel %vm68_vm3, %v1335_v50, %v1308_v51  ;;  %v2985_v21 = vsel %vm68_vm3, %v1368_v35, %v2806_v9 }
 0x132   :  { %v3019_v50 = vmul.f32 %v1343_v37, %v1336_v4 }
 0x135   :  { %1646 = vperm.xlu1 %1853, %v1839_v32   ;;  %1702 = vperm.xlu0 %1854, %v1841_v49   ;;  %v3796_v32 = vld [vmem:[#allocation2_spill] sm:$0xff] }
 0x136   :  { %3798 = vst [vmem:[#allocation2_spill] sm:$0xff] %v2981_v40 }
 0x139   :  { %1736 = vperm.xlu1 %1853, %v1843_v26   ;;  %1719 = vperm.xlu0 %1854, %v1842_v14   ;;  %v3797_v26 = vld [vmem:[#allocation3_spill] sm:$0xff] }
 0x13a   :  { %3799 = vst [vmem:[#allocation3_spill] sm:$0xff] %v2985_v21 }
 0x13d   :  { %1752 = vperm.xlu0 %1854, %v1749_v12   ;;  %v2974_v12 = vsel %vm68_vm3, %v1352_v55, %v1304_v53 }
 0x16b   :  { %v953_v60 = vpop.permute.xlu1 %952  ;;  %v951_v57 = vpop.permute.xlu0 %950 }
 0x16c   :  { %v954_v56 = vsel %vm31_vm0, %v951_v57, %v953_v60  ;;  %v955_v25 = vsel %vm31_vm0, %v953_v60, %v951_v57  ;;  %v3021_v60 = vmul.f32 %v1343_v37, %v1337_v2  ;;  %v3808_v2 = vld [vmem:[#allocation6_spill] sm:$0xff] }
 0x16d   :  { %v2968_v49 = vmul.f32 %v955_v25, %v3796_v32  ;;  %v2971_v14 = vmul.f32 %v954_v56, %v3797_v26  ;;  %v3809_v26 = vld [vmem:[#allocation7_spill] sm:$0xff] }
 0x16f   :  { %v1034_v51 = vpop.permute.xlu1 %1033  ;;  %v1032_v44 = vpop.permute.xlu0 %1031  ;;  %v2988_v27 = vrot.slane %v2968_v49, 6  ;;  %v2991_v13 = vrot.slane %v2971_v14, 6  ;;  %v2994_v53 = vrot.slane %v2968_v49, 4  ;;  %v2997_v52 = vrot.slane %v2971_v14, 4 }
 0x170   :  { %v1035_v42 = vsel %vm128_vm4, %v1032_v44, %v1034_v51  ;;  %v1036_v9 = vsel %vm128_vm4, %v1034_v51, %v1032_v44  ;;  %v3004_v24 = vrot.slane %v2968_v49, 2  ;;  %v3007_v33 = vrot.slane %v2971_v14, 2 }
 0x171   :  { %3800 = vst [vmem:[#allocation24_spill] sm:$0xff] %v2988_v27  ;;  %3801 = vst [vmem:[#allocation25_spill] sm:$0xff] %v2991_v13  ;;  %v3014_v19 = vmul.f32 %v1036_v9, %v3806_v1  ;;  %v3017_v0 = vmul.f32 %v1035_v42, %v3807_v8  ;;  %v3038_v37 = vsel %vm62_vm1, %v2988_v27, %v2994_v53 }
 0x172   :  { %3802 = vst [vmem:[#allocation26_spill] sm:$0xff] %v2994_v53  ;;  %3803 = vst [vmem:[#allocation27_spill] sm:$0xff] %v2997_v52  ;;  %v1001_v57 = vsel %vm62_vm1, %v2994_v53, %v3004_v24  ;;  %v1002_v55 = vsel %vm62_vm1, %v2997_v52, %v3007_v33  ;;  %v986_v47 = vsel %vm62_vm1, %v3004_v24, %v2968_v49 }
 0x173   :  { %v1124_v43 = vpop.permute.xlu1 %1123  ;;  %v1122_v23 = vpop.permute.xlu0 %1121  ;;  %v987_v35 = vsel %vm62_vm1, %v3007_v33, %v2971_v14  ;;  %v3043_v41 = vsel %vm62_vm1, %v2991_v13, %v2997_v52  ;;  %v1003_v25 = vsel %vm65_vm2, %v1001_v57, %v2968_v49  ;;  %v1004_v4 = vsel %vm65_vm2, %v1002_v55, %v2971_v14 }
 0x174   :  { %v1125_v15 = vsel %vm232_vm5, %v1122_v23, %v1124_v43  ;;  %v1126_v56 = vsel %vm232_vm5, %v1124_v43, %v1122_v23  ;;  %v3060_v44 = vrot.slane %v3014_v19, 6  ;;  %v3063_v42 = vrot.slane %v3017_v0, 6 }
 0x175   :  { %v3054_v32 = vmul.f32 %v1126_v56, %v3808_v2  ;;  %v3057_v51 = vmul.f32 %v1125_v15, %v3809_v26  ;;  %v3066_v9 = vrot.slane %v3014_v19, 4  ;;  %v3069_v1 = vrot.slane %v3017_v0, 4 }
 0x176   :  { %v3072_v8 = vrot.slane %v3014_v19, 2  ;;  %v3075_v57 = vrot.slane %v3017_v0, 2  ;;  %v1005_v23 = vsel %vm68_vm3, %v1003_v25, %v2988_v27  ;;  %v1006_v15 = vsel %vm68_vm3, %v1004_v4, %v2991_v13  ;;  %v3810_v4 = vld [vmem:[#allocation8_spill] sm:$0xff] }
 0x177   :  { %v1214_v55 = vpop.permute.xlu1 %1213  ;;  %v1212_v43 = vpop.permute.xlu0 %1211  ;;  %v3082_v56 = vrot.slane %v3054_v32, 4  ;;  %v3085_v2 = vrot.slane %v3057_v51, 4  ;;  %v3112_v30 = vrot.slane %v3054_v32, 2 }
 0x178   :  { %v1215_v26 = vsel %vm336_vm6, %v1212_v43, %v1214_v55  ;;  %v1216_v31 = vsel %vm336_vm6, %v1214_v55, %v1212_v43  ;;  %v1087_v6 = vsel %vm62_vm1, %v3066_v9, %v3072_v8  ;;  %v1088_v25 = vsel %vm62_vm1, %v3069_v1, %v3075_v57 }
 0x179   :  { %v3098_v59 = vmul.f32 %v1216_v31, %v3810_v4  ;;  %v3101_v18 = vmul.f32 %v1215_v26, %v3812_v34  ;;  %v1089_v7 = vsel %vm65_vm2, %v1087_v6, %v3014_v19  ;;  %v1090_v55 = vsel %vm65_vm2, %v1088_v25, %v3017_v0 }
 0x17a   :  { %v1091_v43 = vsel %vm68_vm3, %v1089_v7, %v3060_v44  ;;  %v1092_v11 = vsel %vm68_vm3, %v1090_v55, %v3063_v42  ;;  %v3115_v31 = vrot.slane %v3057_v51, 2  ;;  %v1014_v34 = vmul.f32 %v2903_v10, %v1005_v23 }
 0x17b   :  { %3811 = vst [vmem:[#allocation4_spill] sm:$0xff] %v3098_v59  ;;  %v1015_v26 = vmul.f32 %v2903_v10, %v1006_v15  ;;  %v3120_v6 = vrot.slane %v3054_v32, 6  ;;  %v3123_v25 = vrot.slane %v3057_v51, 6  ;;  %v1177_v7 = vsel %vm62_vm1, %v3082_v56, %v3112_v30 }
 0x17c   :  { %v1178_v4 = vsel %vm62_vm1, %v3085_v2, %v3115_v31  ;;  %v3132_v55 = vrot.slane %v3098_v59, 4  ;;  %v3135_v23 = vrot.slane %v3101_v18, 4  ;;  %v1100_v10 = vmul.f32 %v2911_v22, %v1091_v43 }
 0x17d   :  { %v1101_v15 = vmul.f32 %v2911_v22, %v1092_v11  ;;  %v1179_v58 = vsel %vm65_vm2, %v1177_v7, %v3054_v32  ;;  %v1180_v61 = vsel %vm65_vm2, %v1178_v4, %v3057_v51  ;;  %v3144_v29 = vrot.slane %v3098_v59, 6 }
 0x17e   :  { %v3147_v28 = vrot.slane %v3101_v18, 6  ;;  %v3150_v40 = vrot.slane %v3098_v59, 2  ;;  %v3153_v21 = vrot.slane %v3101_v18, 2  ;;  %v1181_v22 = vsel %vm68_vm3, %v1179_v58, %v3120_v6 }
 0x17f   :  { %v1182_v11 = vsel %vm68_vm3, %v1180_v61, %v3123_v25  ;;  %v988_v43 = vsel %vm65_vm2, %v986_v47, %v2988_v27  ;;  %v989_v7 = vsel %vm65_vm2, %v987_v35, %v2991_v13  ;;  %v1102_v17 = vadd.f32 %v1100_v10, %v1014_v34 }
 0x180   :  { %v1267_v4 = vsel %vm62_vm1, %v3132_v55, %v3150_v40  ;;  %v1268_v48 = vsel %vm62_vm1, %v3135_v23, %v3153_v21  ;;  %v990_v58 = vsel %vm68_vm3, %v988_v43, %v2994_v53  ;;  %v991_v61 = vsel %vm68_vm3, %v989_v7, %v2997_v52 }
 0x181   :  { %v1103_v45 = vadd.f32 %v1101_v15, %v1015_v26  ;;  %v1269_v47 = vsel %vm65_vm2, %v1267_v4, %v3098_v59  ;;  %v1270_v35 = vsel %vm65_vm2, %v1268_v48, %v3101_v18  ;;  %v1190_v13 = vmul.f32 %v2919_v38, %v1181_v22 }
 0x182   :  { %v1191_v27 = vmul.f32 %v2919_v38, %v1182_v11  ;;  %v1271_v20 = vsel %vm68_vm3, %v1269_v47, %v3144_v29  ;;  %v1272_v43 = vsel %vm68_vm3, %v1270_v35, %v3147_v28  ;;  %v999_v7 = vmul.f32 %v2898_v3, %v990_v58 }
 0x183   :  { %v1000_v34 = vmul.f32 %v2898_v3, %v991_v61  ;;  %v1070_v26 = vsel %vm62_vm1, %v3072_v8, %v3014_v19  ;;  %v1071_v48 = vsel %vm62_vm1, %v3075_v57, %v3017_v0  ;;  %v1160_v15 = vsel %vm62_vm1, %v3112_v30, %v3054_v32 }
 0x184   :  { %v1072_v38 = vsel %vm65_vm2, %v1070_v26, %v3060_v44  ;;  %v1073_v10 = vsel %vm65_vm2, %v1071_v48, %v3063_v42  ;;  %v1161_v3 = vsel %vm62_vm1, %v3115_v31, %v3057_v51  ;;  %v1280_v22 = vmul.f32 %v2927_v46, %v1271_v20  ;;  %v1384_v48 = vpop.permute.xlu1 %1383 }
 0x185   :  { %v1281_v11 = vmul.f32 %v2927_v46, %v1272_v43  ;;  %v1074_v4 = vsel %vm68_vm3, %v1072_v38, %v3066_v9  ;;  %v1075_v58 = vsel %vm68_vm3, %v1073_v10, %v3069_v1  ;;  %v1162_v35 = vsel %vm65_vm2, %v1160_v15, %v3120_v6 }
 0x186   :  { %v1083_v61 = vmul.f32 %v2909_v5, %v1074_v4  ;;  %v1084_v47 = vmul.f32 %v2909_v5, %v1075_v58  ;;  %v1163_v26 = vsel %vm65_vm2, %v1161_v3, %v3123_v25  ;;  %v1164_v20 = vsel %vm68_vm3, %v1162_v35, %v3082_v56 }
 0x187   :  { %v1165_v46 = vsel %vm68_vm3, %v1163_v26, %v3085_v2  ;;  %v1250_v43 = vsel %vm62_vm1, %v3150_v40, %v3098_v59  ;;  %v1251_v5 = vsel %vm62_vm1, %v3153_v21, %v3101_v18  ;;  %v1192_v38 = vadd.f32 %v1190_v13, %v1102_v17 }
 0x188   :  { %v1193_v10 = vadd.f32 %v1191_v27, %v1103_v45  ;;  %v1360_v15 = vpop.permute.xlu0 %1359  ;;  %v1173_v3 = vmul.f32 %v2917_v39, %v1164_v20  ;;  %v1174_v4 = vmul.f32 %v2917_v39, %v1165_v46  ;;  %v1085_v58 = vadd.f32 %v1083_v61, %v999_v7 }
 0x189   :  { %v1086_v35 = vadd.f32 %v1084_v47, %v1000_v34  ;;  %v1252_v26 = vsel %vm65_vm2, %v1250_v43, %v3144_v29  ;;  %v1253_v52 = vsel %vm65_vm2, %v1251_v5, %v3147_v28  ;;  %v3229_v53 = vadd.f32 %v1280_v22, %v1192_v38 }
 0x18a   :  { %v3231_v59 = vadd.f32 %v1281_v11, %v1193_v10  ;;  %v1254_v45 = vsel %vm68_vm3, %v1252_v26, %v3132_v55  ;;  %v1255_v17 = vsel %vm68_vm3, %v1253_v52, %v3135_v23  ;;  %v1175_v27 = vadd.f32 %v1173_v3, %v1085_v58 }
 0x18b   :  { %v1176_v39 = vadd.f32 %v1174_v4, %v1086_v35  ;;  %v1263_v13 = vmul.f32 %v2925_v16, %v1254_v45  ;;  %v1264_v7 = vmul.f32 %v2925_v16, %v1255_v17  ;;  %v1362_v34 = vmul.f32 %v1360_v15, %v2977_v36 }
 0x18c   :  { %v1363_v61 = vmul.f32 %v1360_v15, %v2974_v12  ;;  %v3241_v22 = vpop.permute.xlu1 %1415  ;;  %v1386_v11 = vpop.permute.xlu0 %1385  ;;  %v1018_v47 = vsel %vm65_vm2, %v3038_v37, %v3004_v24  ;;  %v1019_v52 = vsel %vm65_vm2, %v3043_v41, %v3007_v33  ;;  %v1104_v37 = vsel %vm62_vm1, %v3060_v44, %v3066_v9 }
 0x18d   :  { %3813 = vst [vmem:[#allocation5_spill] sm:$0xff] %v3241_v22  ;;  %v1387_v20 = vsel %vm522_vm7, %v1384_v48, %v1386_v11  ;;  %v1388_v16 = vsel %vm522_vm7, %v1386_v11, %v1384_v48  ;;  %v1265_v36 = vadd.f32 %v1263_v13, %v1175_v27  ;;  %v1266_v46 = vadd.f32 %v1264_v7, %v1176_v39  ;;  %v3814_v11 = vld [vmem:[#allocation19_spill] sm:$0xff] }
 0x18e   :  { %v3254_v12 = vmul.f32 %v1387_v20, %v2264_v62  ;;  %v3257_v43 = vmul.f32 %v1388_v16, %v2267_v63  ;;  %v1105_v41 = vsel %vm62_vm1, %v3063_v42, %v3069_v1  ;;  %v1020_v38 = vsel %vm68_vm3, %v1018_v47, %v2968_v49 }
 0x18f   :  { %v1348_v5 = vadd.f32 %v3021_v60, %v1266_v46  ;;  %v1347_v48 = vadd.f32 %v3019_v50, %v1265_v36  ;;  %v1021_v62 = vsel %vm68_vm3, %v1019_v52, %v2971_v14  ;;  %v1106_v4 = vsel %vm65_vm2, %v1104_v37, %v3072_v8 }
 0x190   :  { %v3272_v63 = vrot.slane %v3254_v12, 6  ;;  %v3275_v10 = vrot.slane %v3257_v43, 6  ;;  %v3278_v15 = vrot.slane %v3254_v12, 4  ;;  %v3281_v3 = vrot.slane %v3257_v43, 4  ;;  %v1474_v35 = vpop.permute.xlu1 %1473  ;;  %v1433_v26 = vpop.permute.xlu0 %1432 }
 0x191   :  { %v3284_v50 = vrot.slane %v3254_v12, 2  ;;  %v3287_v60 = vrot.slane %v3257_v43, 2  ;;  %v1107_v58 = vsel %vm65_vm2, %v1105_v41, %v3075_v57  ;;  %v1108_v45 = vsel %vm68_vm3, %v1106_v4, %v3014_v19  ;;  %v3815_v4 = vld [vmem:[#allocation17_spill] sm:$0xff] }
 0x192   :  { %v1109_v17 = vsel %vm68_vm3, %v1107_v58, %v3017_v0  ;;  %v1194_v27 = vsel %vm62_vm1, %v3120_v6, %v3082_v56  ;;  %v1195_v39 = vsel %vm62_vm1, %v3123_v25, %v3085_v2  ;;  %v1117_v47 = vmul.f32 %v3814_v11, %v1108_v45 }
 0x193   :  { %v1422_v13 = vsel %vm62_vm1, %v3284_v50, %v3254_v12  ;;  %v1423_v7 = vsel %vm62_vm1, %v3287_v60, %v3257_v43  ;;  %v1118_v52 = vmul.f32 %v3814_v11, %v1109_v17  ;;  %v1196_v36 = vsel %vm65_vm2, %v1194_v27, %v3112_v30  ;;  %v3816_v11 = vld [vmem:[#allocation21_spill] sm:$0xff] }
 0x194   :  { %v1424_v20 = vsel %vm65_vm2, %v1422_v13, %v3272_v63  ;;  %v1425_v16 = vsel %vm65_vm2, %v1423_v7, %v3275_v10  ;;  %v1197_v46 = vsel %vm65_vm2, %v1195_v39, %v3115_v31  ;;  %v1029_v58 = vmul.f32 %v3815_v4, %v1020_v38 }
 0x195   :  { %v1426_v37 = vsel %vm68_vm3, %v1424_v20, %v3278_v15  ;;  %v1427_v41 = vsel %vm68_vm3, %v1425_v16, %v3281_v3  ;;  %v1030_v45 = vmul.f32 %v3815_v4, %v1021_v62  ;;  %v1198_v7 = vsel %vm68_vm3, %v1196_v36, %v3054_v32  ;;  %v1377_v62 = vpop.permute.xlu1 %1376 }
 0x196   :  { %v1435_v17 = vmul.f32 %v1433_v26, %v1426_v37  ;;  %v1436_v13 = vmul.f32 %v1433_v26, %v1427_v41  ;;  %v1199_v27 = vsel %vm68_vm3, %v1197_v46, %v3057_v51  ;;  %v1207_v39 = vmul.f32 %v3816_v11, %v1198_v7  ;;  %v1476_v37 = vpop.permute.xlu0 %1475  ;;  %v3817_v7 = vld [vmem:[#allocation4_spill] sm:$0xff] }
 0x197   :  { %v1208_v22 = vmul.f32 %v3816_v11, %v1199_v27  ;;  %v1284_v20 = vsel %vm62_vm1, %v3144_v29, %v3132_v55  ;;  %v1285_v38 = vsel %vm62_vm1, %v3147_v28, %v3135_v23  ;;  %v1119_v26 = vadd.f32 %v1117_v47, %v1029_v58 }
 0x198   :  { %v1120_v16 = vadd.f32 %v1118_v52, %v1030_v45  ;;  %v1286_v36 = vsel %vm65_vm2, %v1284_v20, %v3150_v40  ;;  %v1287_v46 = vsel %vm65_vm2, %v1285_v38, %v3153_v21  ;;  %v3342_v41 = vadd.f32 %v1362_v34, %v3229_v53  ;;  %v3818_v34 = vld [vmem:[#allocation24_spill] sm:$0xff]  ;;  %v3819_v20 = vld [vmem:[#allocation25_spill] sm:$0xff]  ;;  %v3822_v38 = vld [vmem:[#allocation2_spill] sm:$0xff] }
 0x199   :  { %v3345_v4 = vadd.f32 %v1363_v61, %v3231_v59  ;;  %v1288_v27 = vsel %vm68_vm3, %v1286_v36, %v3817_v7  ;;  %v1289_v47 = vsel %vm68_vm3, %v1287_v46, %v3101_v18  ;;  %v3351_v52 = vadd.f32 %v1435_v17, %v1347_v48 }
 0x19a   :  { %v3353_v58 = vadd.f32 %v1436_v13, %v1348_v5  ;;  %v3355_v45 = vadd.f32 %v1207_v39, %v1119_v26  ;;  %v3357_v11 = vadd.f32 %v1208_v22, %v1120_v16  ;;  %v1477_v53 = vsel %vm626_vm8, %v1474_v35, %v1476_v37  ;;  %v3820_v5 = vld [vmem:[#allocation23_spill] sm:$0xff] }
 0x19b   :  { %v1478_v59 = vsel %vm626_vm8, %v1476_v37, %v1474_v35  ;;  %v972_v61 = vsel %vm62_vm1, %v2968_v49, %v3818_v34  ;;  %v973_v48 = vsel %vm62_vm1, %v2971_v14, %v3819_v20  ;;  %v3370_v17 = vmul.f32 %v3820_v5, %v1288_v27  ;;  %v3821_v13 = vld [vmem:[#allocation3_spill] sm:$0xff]  ;;  %v3823_v35 = vld [vmem:[#allocation26_spill] sm:$0xff]  ;;  %v3397_v34 = vpop.permute.xlu1 %1505 }
 0x19c   :  { %v3373_v22 = vmul.f32 %v3820_v5, %v1289_v47  ;;  %v3376_v39 = vmul.f32 %v1377_v62, %v3821_v13  ;;  %v3379_v26 = vmul.f32 %v1377_v62, %v3822_v38  ;;  %v974_v16 = vsel %vm65_vm2, %v972_v61, %v3823_v35  ;;  %v3824_v49 = vld [vmem:[#allocation27_spill] sm:$0xff]  ;;  %v3825_v37 = vld [vmem:[#allocation10_spill] sm:$0xff] }
 0x19d   :  { %v975_v36 = vsel %vm65_vm2, %v973_v48, %v3824_v49  ;;  %v1053_v14 = vsel %vm62_vm1, %v3014_v19, %v3060_v44  ;;  %v1054_v46 = vsel %vm62_vm1, %v3017_v0, %v3063_v42  ;;  %v3392_v27 = vmul.f32 %v1477_v53, %v3825_v37  ;;  %v3826_v47 = vld [vmem:[#allocation11_spill] sm:$0xff]  ;;  %v3403_v48 = vpop.permute.xlu0 %1449  ;;  %v3827_v19 = vld [vmem:[#allocation16_spill] sm:$0xff]  ;;  %v3828_v13 = vld [vmem:[#allocation18_spill] sm:$0xff] }
 0x19e   :  { %v3395_v62 = vmul.f32 %v1478_v59, %v3826_v47  ;;  %v976_v61 = vsel %vm68_vm3, %v974_v16, %v3004_v24  ;;  %v977_v20 = vsel %vm68_vm3, %v975_v36, %v3007_v33  ;;  %v1055_v42 = vsel %vm65_vm2, %v1053_v14, %v3066_v9  ;;  %v3830_v14 = vld [vmem:[#allocation22_spill] sm:$0xff] }
 0x19f   :  { %v984_v44 = vmul.f32 %v3827_v19, %v976_v61  ;;  %v985_v0 = vmul.f32 %v3827_v19, %v977_v20  ;;  %v1056_v53 = vsel %vm65_vm2, %v1054_v46, %v3069_v1  ;;  %v1057_v59 = vsel %vm68_vm3, %v1055_v42, %v3072_v8  ;;  %v3831_v42 = vld [vmem:[#allocation5_spill] sm:$0xff] }
 0x1a0   :  { %v1058_v24 = vsel %vm68_vm3, %v1056_v53, %v3075_v57  ;;  %v1143_v33 = vsel %vm62_vm1, %v3054_v32, %v3120_v6  ;;  %v1144_v5 = vsel %vm62_vm1, %v3057_v51, %v3123_v25  ;;  %v1066_v38 = vmul.f32 %v3828_v13, %v1057_v59 }
 0x1a1   :  { %v1067_v9 = vmul.f32 %v3828_v13, %v1058_v24  ;;  %v1145_v1 = vsel %vm65_vm2, %v1143_v33, %v3082_v56  ;;  %v1146_v8 = vsel %vm65_vm2, %v1144_v5, %v3085_v2  ;;  %v1233_v51 = vsel %vm62_vm1, %v3817_v7, %v3144_v29  ;;  %v3829_v56 = vld [vmem:[#allocation20_spill] sm:$0xff]  ;;  %v3451_v7 = vpop.permute.xlu0 %1522 }
 0x1a2   :  { %v1147_v57 = vsel %vm68_vm3, %v1145_v1, %v3112_v30  ;;  %v1148_v32 = vsel %vm68_vm3, %v1146_v8, %v3115_v31  ;;  %v1234_v6 = vsel %vm62_vm1, %v3101_v18, %v3147_v28  ;;  %v1068_v25 = vadd.f32 %v1066_v38, %v984_v44  ;;  %v3449_v18 = vpop.permute.xlu1 %1563  ;;  %v3832_v38 = vld [vmem:[#allocation28_spill] sm:$0xff]  ;;  %v3833_v1 = vld [vmem:[#allocation29_spill] sm:$0xff] }
 0x1a3   :  { %v1069_v35 = vadd.f32 %v1067_v9, %v985_v0  ;;  %v1156_v16 = vmul.f32 %v3829_v56, %v1147_v57  ;;  %v1157_v2 = vmul.f32 %v3829_v56, %v1148_v32  ;;  %v1235_v30 = vsel %vm65_vm2, %v1233_v51, %v3132_v55 }
 0x1a4   :  { %v1236_v31 = vsel %vm65_vm2, %v1234_v6, %v3135_v23  ;;  %v1405_v29 = vsel %vm62_vm1, %v3254_v12, %v3272_v63  ;;  %v1406_v28 = vsel %vm62_vm1, %v3257_v43, %v3275_v10  ;;  %v1237_v55 = vsel %vm68_vm3, %v1235_v30, %v3150_v40 }
 0x1a5   :  { %v1158_v49 = vadd.f32 %v1156_v16, %v1068_v25  ;;  %v1159_v36 = vadd.f32 %v1157_v2, %v1069_v35  ;;  %v1238_v23 = vsel %vm68_vm3, %v1236_v31, %v3153_v21  ;;  %v1246_v46 = vmul.f32 %v3830_v14, %v1237_v55  ;;  %v1566_v6 = vpop.permute.xlu0 %1565 }
 0x1a6   :  { %v1247_v37 = vmul.f32 %v3830_v14, %v1238_v23  ;;  %v1407_v47 = vsel %vm65_vm2, %v1405_v29, %v3278_v15  ;;  %v1408_v61 = vsel %vm65_vm2, %v1406_v28, %v3281_v3  ;;  %v3468_v40 = vrot.slane %v3392_v27, 6  ;;  %v1467_v51 = vpop.permute.xlu1 %1466 }
 0x1a7   :  { %v1409_v20 = vsel %vm68_vm3, %v1407_v47, %v3284_v50  ;;  %v1410_v19 = vsel %vm68_vm3, %v1408_v61, %v3287_v60  ;;  %v3471_v21 = vrot.slane %v3395_v62, 6  ;;  %v1248_v44 = vadd.f32 %v1246_v46, %v1158_v49 }
 0x1a8   :  { %v1249_v0 = vadd.f32 %v1247_v37, %v1159_v36  ;;  %v1418_v53 = vmul.f32 %v3831_v42, %v1409_v20  ;;  %v1419_v59 = vmul.f32 %v3831_v42, %v1410_v19  ;;  %v3476_v24 = vrot.slane %v3392_v27, 4 }
 0x1a9   :  { %v3479_v33 = vrot.slane %v3395_v62, 4  ;;  %v3482_v5 = vrot.slane %v3392_v27, 2  ;;  %v3485_v13 = vrot.slane %v3395_v62, 2  ;;  %v1330_v9 = vadd.f32 %v3832_v38, %v1248_v44  ;;  %v1540_v44 = vpop.permute.xlu0 %1539 }
 0x1aa   :  { %v1331_v8 = vadd.f32 %v3833_v1, %v1249_v0  ;;  %v1495_v57 = vsel %vm62_vm1, %v3392_v27, %v3468_v40  ;;  %v1496_v32 = vsel %vm62_vm1, %v3395_v62, %v3471_v21  ;;  %v1439_v56 = vsel %vm62_vm1, %v3278_v15, %v3284_v50  ;;  %v1596_v19 = vpop.permute.xlu1 %1595 }
 0x1ab   :  { %v1497_v25 = vsel %vm65_vm2, %v1495_v57, %v3476_v24  ;;  %v1498_v35 = vsel %vm65_vm2, %v1496_v32, %v3479_v33  ;;  %v1440_v16 = vsel %vm62_vm1, %v3281_v3, %v3287_v60  ;;  %v1299_v2 = vadd.f32 %v3370_v17, %v3355_v45 }
 0x1ac   :  { %v1300_v30 = vadd.f32 %v3373_v22, %v3357_v11  ;;  %v1499_v31 = vsel %vm68_vm3, %v1497_v25, %v3482_v5  ;;  %v1500_v29 = vsel %vm68_vm3, %v1498_v35, %v3485_v13  ;;  %v1441_v36 = vsel %vm65_vm2, %v1439_v56, %v3254_v12 }
 0x1ad   :  { %v1508_v28 = vmul.f32 %v3397_v34, %v1499_v31  ;;  %v1509_v49 = vmul.f32 %v3397_v34, %v1500_v29  ;;  %v1442_v55 = vsel %vm65_vm2, %v1440_v16, %v3257_v43  ;;  %v1443_v45 = vsel %vm68_vm3, %v1441_v36, %v3272_v63  ;;  %v1613_v35 = vpop.permute.xlu0 %1612 }
 0x1ae   :  { %v1444_v11 = vsel %vm68_vm3, %v1442_v55, %v3275_v10  ;;  %v1512_v17 = vsel %vm62_vm1, %v3482_v5, %v3392_v27  ;;  %v1513_v22 = vsel %vm62_vm1, %v3485_v13, %v3395_v62  ;;  %v1420_v34 = vadd.f32 %v1418_v53, %v1330_v9  ;;  %v1654_v25 = vpop.permute.xlu1 %1653 }
 0x1af   :  { %v1421_v23 = vadd.f32 %v1419_v59, %v1331_v8  ;;  %v1452_v14 = vmul.f32 %v3403_v48, %v1443_v45  ;;  %v1453_v46 = vmul.f32 %v3403_v48, %v1444_v11  ;;  %v1514_v37 = vsel %vm65_vm2, %v1512_v17, %v3468_v40  ;;  %v3835_v8 = vld [vmem:[#allocation13_spill] sm:$0xff] }
 0x1b0   :  { %v1515_v47 = vsel %vm65_vm2, %v1513_v22, %v3471_v21  ;;  %v1456_v61 = vsel %vm62_vm1, %v3272_v63, %v3278_v15  ;;  %v1457_v20 = vsel %vm62_vm1, %v3275_v10, %v3281_v3  ;;  %v1381_v0 = vadd.f32 %v3376_v39, %v1299_v2 }
 0x1b1   :  { %v1382_v48 = vadd.f32 %v3379_v26, %v1300_v30  ;;  %v1516_v42 = vsel %vm68_vm3, %v1514_v37, %v3476_v24  ;;  %v1517_v53 = vsel %vm68_vm3, %v1515_v47, %v3479_v33  ;;  %v1510_v59 = vadd.f32 %v1508_v28, %v1420_v34 }
 0x1b2   :  { %v1511_v38 = vadd.f32 %v1509_v49, %v1421_v23  ;;  %v1458_v63 = vsel %vm65_vm2, %v1456_v61, %v3284_v50  ;;  %v1459_v10 = vsel %vm65_vm2, %v1457_v20, %v3287_v60  ;;  %v1454_v15 = vadd.f32 %v1452_v14, %v3342_v41  ;;  %v3834_v41 = vld [vmem:[#allocation12_spill] sm:$0xff] }
 0x1b3   :  { %v1455_v3 = vadd.f32 %v1453_v46, %v3345_v4  ;;  %v1567_v39 = vsel %vm730_vm9, %v3449_v18, %v1566_v6  ;;  %v1568_v26 = vsel %vm730_vm9, %v1566_v6, %v3449_v18  ;;  %v1525_v9 = vmul.f32 %v3451_v7, %v1516_v42  ;;  %v1557_v42 = vpop.permute.xlu1 %1556 }
 0x1b4   :  { %v1526_v1 = vmul.f32 %v3451_v7, %v1517_v53  ;;  %v1460_v50 = vsel %vm68_vm3, %v1458_v63, %v3254_v12  ;;  %v1461_v60 = vsel %vm68_vm3, %v1459_v10, %v3257_v43  ;;  %v3566_v4 = vmul.f32 %v1567_v39, %v3834_v41  ;;  %v1656_v53 = vpop.permute.xlu0 %1655 }
 0x1b5   :  { %v3569_v57 = vmul.f32 %v1568_v26, %v3835_v8  ;;  %v1529_v18 = vsel %vm62_vm1, %v3476_v24, %v3482_v5  ;;  %v1530_v7 = vsel %vm62_vm1, %v3479_v33, %v3485_v13  ;;  %v1469_v32 = vmul.f32 %v1467_v51, %v1460_v50 }
 0x1b6   :  { %v1470_v6 = vmul.f32 %v1467_v51, %v1461_v60  ;;  %v1531_v12 = vsel %vm65_vm2, %v1529_v18, %v3392_v27  ;;  %v1532_v43 = vsel %vm65_vm2, %v1530_v7, %v3395_v62  ;;  %v3582_v56 = vrot.slane %v3566_v4, 6 }
 0x1b7   :  { %v3585_v16 = vrot.slane %v3569_v57, 6  ;;  %v1577_v2 = vrot.slane %v3566_v4, 4  ;;  %v1578_v30 = vrot.slane %v3569_v57, 4  ;;  %v3590_v51 = vrot.slane %v3566_v4, 2  ;;  %v1686_v54 = vpop.permute.xlu1 %1685 }
 0x1b8   :  { %v3593_v31 = vrot.slane %v3569_v57, 2  ;;  %v1533_v29 = vsel %vm68_vm3, %v1531_v12, %v3468_v40  ;;  %v1534_v28 = vsel %vm68_vm3, %v1532_v43, %v3471_v21  ;;  %v1585_v49 = vsel %vm62_vm1, %v3566_v4, %v3582_v56  ;;  %v1630_v7 = vpop.permute.xlu0 %1629 }
 0x1b9   :  { %v1586_v36 = vsel %vm62_vm1, %v3569_v57, %v3585_v16  ;;  %v1542_v55 = vmul.f32 %v1540_v44, %v1533_v29  ;;  %v1543_v45 = vmul.f32 %v1540_v44, %v1534_v28  ;;  %v1587_v11 = vsel %vm65_vm2, %v1585_v49, %v1577_v2 }
 0x1ba   :  { %v1588_v17 = vsel %vm65_vm2, %v1586_v36, %v1578_v30  ;;  %v1602_v22 = vsel %vm62_vm1, %v3590_v51, %v3566_v4  ;;  %v1603_v34 = vsel %vm62_vm1, %v3593_v31, %v3569_v57  ;;  %v1527_v23 = vadd.f32 %v1525_v9, %v3351_v52 }
 0x1bb   :  { %v1528_v14 = vadd.f32 %v1526_v1, %v3353_v58  ;;  %v1589_v46 = vsel %vm68_vm3, %v1587_v11, %v3590_v51  ;;  %v1590_v37 = vsel %vm68_vm3, %v1588_v17, %v3593_v31  ;;  %v1604_v20 = vsel %vm65_vm2, %v1602_v22, %v3582_v56 }
 0x1bc   :  { %v1598_v47 = vmul.f32 %v1596_v19, %v1589_v46  ;;  %v1599_v61 = vmul.f32 %v1596_v19, %v1590_v37  ;;  %v1605_v44 = vsel %vm65_vm2, %v1603_v34, %v3585_v16  ;;  %v1606_v52 = vsel %vm68_vm3, %v1604_v20, %v1577_v2 }
 0x1bd   :  { %v1607_v58 = vsel %vm68_vm3, %v1605_v44, %v1578_v30  ;;  %v1546_v63 = vsel %vm62_vm1, %v3468_v40, %v3476_v24  ;;  %v1547_v19 = vsel %vm62_vm1, %v3471_v21, %v3479_v33  ;;  %v1471_v10 = vadd.f32 %v1469_v32, %v1381_v0 }
 0x1be   :  { %v1472_v39 = vadd.f32 %v1470_v6, %v1382_v48  ;;  %v1544_v26 = vadd.f32 %v1542_v55, %v1454_v15  ;;  %v1545_v9 = vadd.f32 %v1543_v45, %v1455_v3  ;;  %v1548_v1 = vsel %vm65_vm2, %v1546_v63, %v3482_v5  ;;  %v3836_v5 = vld [vmem:[#allocation14_spill] sm:$0xff] }
 0x1bf   :  { %v1549_v50 = vsel %vm65_vm2, %v1547_v19, %v3485_v13  ;;  %v1657_v60 = vsel %vm834_vm10, %v1654_v25, %v1656_v53  ;;  %v1658_v40 = vsel %vm834_vm10, %v1656_v53, %v1654_v25  ;;  %v1600_v24 = vadd.f32 %v1598_v47, %v1510_v59  ;;  %v3837_v13 = vld [vmem:[#allocation15_spill] sm:$0xff]  ;;  %v1647_v47 = vpop.permute.xlu1 %1646 }
 0x1c0   :  { %v1601_v41 = vadd.f32 %v1599_v61, %v1511_v38  ;;  %v1615_v8 = vmul.f32 %v1613_v35, %v1606_v52  ;;  %v1616_v21 = vmul.f32 %v1613_v35, %v1607_v58  ;;  %v1550_v33 = vsel %vm68_vm3, %v1548_v1, %v3392_v27 }
 0x1c1   :  { %v1551_v0 = vsel %vm68_vm3, %v1549_v50, %v3395_v62  ;;  %v3644_v48 = vmul.f32 %v1657_v60, %v3836_v5  ;;  %v3647_v15 = vmul.f32 %v1658_v40, %v3837_v13  ;;  %v1559_v3 = vmul.f32 %v1557_v42, %v1550_v33 }
 0x1c2   :  { %v1560_v18 = vmul.f32 %v1557_v42, %v1551_v0  ;;  %v1619_v59 = vsel %vm62_vm1, %v1577_v2, %v3590_v51  ;;  %v1620_v38 = vsel %vm62_vm1, %v1578_v30, %v3593_v31  ;;  %v1636_v32 = vsel %vm62_vm1, %v3582_v56, %v1577_v2 }
 0x1c3   :  { %v3654_v27 = vrot.slane %v3644_v48, 6  ;;  %v3657_v62 = vrot.slane %v3647_v15, 6  ;;  %v1637_v6 = vsel %vm62_vm1, %v3585_v16, %v1578_v30  ;;  %v1667_v12 = vrot.slane %v3644_v48, 4 }
 0x1c4   :  { %v1668_v43 = vrot.slane %v3647_v15, 4  ;;  %v1671_v25 = vrot.slane %v3644_v48, 2  ;;  %v1672_v35 = vrot.slane %v3647_v15, 2  ;;  %v1621_v2 = vsel %vm65_vm2, %v1619_v59, %v3566_v4 }
 0x1c5   :  { %v1675_v29 = vsel %vm62_vm1, %v3644_v48, %v3654_v27  ;;  %v1676_v28 = vsel %vm62_vm1, %v3647_v15, %v3657_v62  ;;  %v1622_v30 = vsel %vm65_vm2, %v1620_v38, %v3569_v57  ;;  %v1623_v55 = vsel %vm68_vm3, %v1621_v2, %v3582_v56 }
 0x1c6   :  { %v1677_v49 = vsel %vm65_vm2, %v1675_v29, %v1667_v12  ;;  %v1678_v36 = vsel %vm65_vm2, %v1676_v28, %v1668_v43  ;;  %v1624_v45 = vsel %vm68_vm3, %v1622_v30, %v3585_v16  ;;  %v1632_v22 = vmul.f32 %v1630_v7, %v1623_v55  ;;  %v1703_v16 = vpop.permute.xlu0 %1702 }
 0x1c7   :  { %v1679_v11 = vsel %vm68_vm3, %v1677_v49, %v1671_v25  ;;  %v1680_v17 = vsel %vm68_vm3, %v1678_v36, %v1672_v35  ;;  %v1633_v34 = vmul.f32 %v1630_v7, %v1624_v45  ;;  %v1638_v61 = vsel %vm65_vm2, %v1636_v32, %v3590_v51 }
 0x1c8   :  { %v1688_v46 = vmul.f32 %v1686_v54, %v1679_v11  ;;  %v1689_v37 = vmul.f32 %v1686_v54, %v1680_v17  ;;  %v1639_v20 = vsel %vm65_vm2, %v1637_v6, %v3593_v31  ;;  %v1617_v44 = vadd.f32 %v1615_v8, %v1527_v23 }
 0x1c9   :  { %v1618_v56 = vadd.f32 %v1616_v21, %v1528_v14  ;;  %v1561_v42 = vadd.f32 %v1559_v3, %v1471_v10  ;;  %v1562_v53 = vadd.f32 %v1560_v18, %v1472_v39  ;;  %v1634_v52 = vadd.f32 %v1632_v22, %v1544_v26 }
 0x1ca   :  { %v1635_v58 = vadd.f32 %v1633_v34, %v1545_v9  ;;  %v1640_v63 = vsel %vm68_vm3, %v1638_v61, %v3566_v4  ;;  %v1641_v19 = vsel %vm68_vm3, %v1639_v20, %v3569_v57  ;;  %v1692_v1 = vsel %vm62_vm1, %v1671_v25, %v3644_v48  ;;  %v1720_v13 = vpop.permute.xlu0 %1719  ;;  %v1856_v34 = vld [vmem:[%s3736_s0 + $0x8] sm:$0xff] }
 0x1cb   :  { %v1693_v51 = vsel %vm62_vm1, %v1672_v35, %v3647_v15  ;;  %v1726_v31 = vsel %vm62_vm1, %v3654_v27, %v1667_v12  ;;  %v1727_v23 = vsel %vm62_vm1, %v3657_v62, %v1668_v43  ;;  %v1690_v14 = vadd.f32 %v1688_v46, %v1600_v24  ;;  %v1737_v24 = vpop.permute.xlu1 %1736 }
 0x1cc   :  { %v1691_v10 = vadd.f32 %v1689_v37, %v1601_v41  ;;  %v1694_v4 = vsel %vm65_vm2, %v1692_v1, %v3654_v27  ;;  %v1695_v57 = vsel %vm65_vm2, %v1693_v51, %v3657_v62  ;;  %v1728_v9 = vsel %vm65_vm2, %v1726_v31, %v1671_v25 }
 0x1cd   :  { %v1696_v39 = vsel %vm68_vm3, %v1694_v4, %v1667_v12  ;;  %v1697_v26 = vsel %vm68_vm3, %v1695_v57, %v1668_v43  ;;  %v1729_v50 = vsel %vm65_vm2, %v1727_v23, %v1672_v35  ;;  %v1649_v60 = vmul.f32 %v1647_v47, %v1640_v63 }
 0x1ce   :  { %v1650_v40 = vmul.f32 %v1647_v47, %v1641_v19  ;;  %v1705_v8 = vmul.f32 %v1703_v16, %v1696_v39  ;;  %v1706_v21 = vmul.f32 %v1703_v16, %v1697_v26  ;;  %v1730_v41 = vsel %vm68_vm3, %v1728_v9, %v3644_v48  ;;  %v1753_v11 = vpop.permute.xlu0 %1752 }
 0x1cf   :  { %v1731_v33 = vsel %vm68_vm3, %v1729_v50, %v3647_v15  ;;  %v1709_v0 = vsel %vm62_vm1, %v1667_v12, %v1671_v25  ;;  %v1710_v5 = vsel %vm62_vm1, %v1668_v43, %v1672_v35  ;;  %v1739_v38 = vmul.f32 %v1737_v24, %v1730_v41 }
 0x1d0   :  { %v1707_v3 = vadd.f32 %v1705_v8, %v1617_v44  ;;  %v1708_v18 = vadd.f32 %v1706_v21, %v1618_v56  ;;  %v1711_v54 = vsel %vm65_vm2, %v1709_v0, %v3644_v48  ;;  %v1712_v59 = vsel %vm65_vm2, %v1710_v5, %v3647_v15 }
 0x1d1   :  { %v1740_v7 = vmul.f32 %v1737_v24, %v1731_v33  ;;  %v1713_v32 = vsel %vm68_vm3, %v1711_v54, %v3654_v27  ;;  %v1714_v6 = vsel %vm68_vm3, %v1712_v59, %v3657_v62  ;;  %v1651_v29 = vadd.f32 %v1649_v60, %v1561_v42  ;;  %v1855_v62 = vld [vmem:[%s3736_s0] sm:$0xff] }
 0x1d2   :  { %v1743_v12 = vadd.f32 %v1707_v3, %v1690_v14  ;;  %v1744_v25 = vadd.f32 %v1708_v18, %v1691_v10  ;;  %v1722_v43 = vmul.f32 %v1720_v13, %v1713_v32  ;;  %v1723_v35 = vmul.f32 %v1720_v13, %v1714_v6 }
 0x1d3   :  { %v1652_v28 = vadd.f32 %v1650_v40, %v1562_v53  ;;  %v1741_v48 = vadd.f32 %v1739_v38, %v1651_v29 }
 0x1d4   :  { %v1724_v2 = vadd.f32 %v1722_v43, %v1634_v52  ;;  %v1725_v30 = vadd.f32 %v1723_v35, %v1635_v58 }
 0x1d5   :  { %v1742_v49 = vadd.f32 %v1740_v7, %v1652_v28 }
 0x1d6   :  { %v1746_v36 = vadd.f32 %v1744_v25, %v1725_v30  ;;  %v1745_v15 = vadd.f32 %v1743_v12, %v1724_v2 }
 0x1d8   :  { %v1748_v55 = vadd.f32 %v1746_v36, %v1742_v49  ;;  %v1747_v45 = vadd.f32 %v1745_v15, %v1741_v48 }
 0x1da   :  { %v1755_v17 = vadd.f32 %v1753_v11, %v1747_v45  ;;  %v1756_v27 = vadd.f32 %v1753_v11, %v1748_v55 }
 0x1dc   :  { %v1757_v22 = vadd.f32 %v1855_v62, %v1755_v17  ;;  %v1758_v46 = vadd.f32 %v1856_v34, %v1756_v27 }
 0x1de   :  { %v1759_v37 = vmax.f32 %v1757_v22, 0.0  ;;  %v1760_v47 = vmax.f32 %v1758_v46, 0.0 }
 0x1e0   :  { %1761 = vst [vmem:[%s3741_s6] sm:$0xff] %v1759_v37  ;;  %1762 = vst [vmem:[%s3741_s6 + $0x8] sm:$0xff] %v1760_v47 }

</bundles_post_ra>
